<compile_context>
chip_gen: v7x
topology: tpu7x:2x2x1
jax: 0.10.0
libtpu: 0.0.40
codegen_flags: <defaults>
</compile_context>

<pallas_src>
import jax
import jax.numpy as jnp
from jax.experimental import pallas as pl
from jax.experimental.pallas import tpu as pltpu

EPS = 1e-5
EXPANSION = 4
LANE = 128
DOT_DTYPE = jnp.bfloat16          # MXU operand dtype (f32 accumulation)
ACT_DTYPE = jnp.bfloat16          # HBM storage dtype for intermediate activations


def _tpu_vmem_bytes():
    """Physical VMEM per TensorCore; conservative 64 MiB (v7x) fallback."""
    try:
        fn = getattr(pltpu, "get_tpu_info", None)
        if fn is not None:
            info = fn()
            for attr in ("vmem_capacity_bytes", "vmem_bytes"):
                v = getattr(info, attr, None)
                if v:
                    return int(v)
    except Exception:
        pass
    return 64 * 1024 * 1024


_VMEM_CAP = _tpu_vmem_bytes()
VMEM_LIMIT = int(_VMEM_CAP * 3 // 4)                   # ~48 MiB v7x / ~96 MiB v5e-v6e
ROW_TILE = 1024 if _VMEM_CAP > (64 << 20) else 512     # rows (N*H*W) per grid step


# ----------------------------- helpers -----------------------------

def _round_up(x, k):
    return (x + k - 1) // k * k


def _pad_rows(a, m_pad):
    m = a.shape[0]
    if m == m_pad:
        return a
    return jnp.pad(a, ((0, m_pad - m), (0, 0)))


def _pad_axis(a, axis, new):
    if a.shape[axis] == new:
        return a
    pad = [(0, 0)] * a.ndim
    pad[axis] = (0, new - a.shape[axis])
    return jnp.pad(a, pad)


def _grid_cfg(m):
    tm = min(ROW_TILE, _round_up(m, 8))
    m_pad = _round_up(m, tm)
    return tm, m_pad, m_pad // tm


def _compiler_params(semantics):
    return pltpu.CompilerParams(dimension_semantics=semantics,
                                vmem_limit_bytes=VMEM_LIMIT)


def _finalize_stats(partials, m):
    """(G, 2, C) per-tile [sum; sumsq] partials -> per-channel mean, biased var."""
    s = jnp.sum(partials.astype(jnp.float32), axis=0)        # (2, C)
    mean = s[0] / m
    var = jnp.maximum(s[1] / m - mean * mean, 0.0)
    return mean.reshape(1, -1), var.reshape(1, -1)


def _affine_from_stats(gamma, beta, mean, var):
    scale = gamma.reshape(1, -1) / jnp.sqrt(var + EPS)
    bias = beta.reshape(1, -1) - mean * scale
    return scale, bias


# ----------------------------- Pallas kernels & wrappers -----------------------------

def bn_stats(x2d):
    """Per-channel mean / biased var via a tiled reduction (per-tile partials)."""
    m, c = x2d.shape
    tm, m_pad, g = _grid_cfg(m)
    xp = _pad_rows(x2d, m_pad)            # zero rows add nothing to sum / sumsq

    def kernel(x_ref, st_ref):
        x = x_ref[...].astype(jnp.float32)
        st_ref[0] = jnp.concatenate(
            [jnp.sum(x, axis=0, keepdims=True),
             jnp.sum(x * x, axis=0, keepdims=True)], axis=0)

    parts = pl.pallas_call(
        kernel,
        out_shape=jax.ShapeDtypeStruct((g, 2, c), jnp.float32),
        grid=(g,),
        in_specs=[pl.BlockSpec((tm, c), lambda i: (i, 0))],
        out_specs=pl.BlockSpec((1, 2, c), lambda i: (i, 0, 0)),
        compiler_params=_compiler_params(("parallel",)),
    )(xp)
    return _finalize_stats(parts, m)


def bn_relu_matmul_stats(x2d, scale, bias, w):
    """y = relu(x*scale + bias) @ w  (1x1 conv), plus per-tile [sum; sumsq] of y.
    y is written to HBM as bf16 (lane-dense, channel dim pre-padded to 128)."""
    m, cin = x2d.shape
    cout = w.shape[1]
    tm, m_pad, g = _grid_cfg(m)
    xp = _pad_rows(x2d, m_pad)
    need_mask = m_pad != m

    def kernel(x_ref, s_ref, b_ref, w_ref, y_ref, st_ref):
        x = x_ref[...].astype(jnp.float32)
        a = jnp.maximum(x * s_ref[...] + b_ref[...], 0.0)
        if need_mask:                      # keep padded rows out of the stats
            row = (pl.program_id(0) * tm
                   + jax.lax.broadcasted_iota(jnp.int32, (tm, 1), 0))
            a = jnp.where(row < m, a, 0.0)
        y = jnp.dot(a.astype(w_ref.dtype), w_ref[...],
                    preferred_element_type=jnp.float32)
        y_ref[...] = y.astype(y_ref.dtype)
        st_ref[0] = jnp.concatenate(
            [jnp.sum(y, axis=0, keepdims=True),
             jnp.sum(y * y, axis=0, keepdims=True)], axis=0)

    y, parts = pl.pallas_call(
        kernel,
        out_shape=(jax.ShapeDtypeStruct((m_pad, cout), ACT_DTYPE),
                   jax.ShapeDtypeStruct((g, 2, cout), jnp.float32)),
        grid=(g,),
        # TODO(synk): constant-index operands (scale/bias/weight) could use
        # pipeline_mode=pl.Buffered(1) to reclaim their second VMEM buffer.
        in_specs=[pl.BlockSpec((tm, cin), lambda i: (i, 0)),
                  pl.BlockSpec((1, cin), lambda i: (0, 0)),
                  pl.BlockSpec((1, cin), lambda i: (0, 0)),
                  pl.BlockSpec((cin, cout), lambda i: (0, 0))],
        out_specs=[pl.BlockSpec((tm, cout), lambda i: (i, 0)),
                   pl.BlockSpec((1, 2, cout), lambda i: (i, 0, 0))],
        compiler_params=_compiler_params(("parallel",)),
    )(xp, scale, bias, w)
    return y[:m], parts


def bn_relu_matmul(x2d, scale, bias, w):
    """Shortcut branch: relu(bn(x)) @ w  (1x1 conv), no statistics, f32 out."""
    m, cin = x2d.shape
    cout = w.shape[1]
    tm, m_pad, g = _grid_cfg(m)
    xp = _pad_rows(x2d, m_pad)

    def kernel(x_ref, s_ref, b_ref, w_ref, y_ref):
        x = x_ref[...].astype(jnp.float32)
        a = jnp.maximum(x * s_ref[...] + b_ref[...], 0.0)
        y_ref[...] = jnp.dot(a.astype(w_ref.dtype), w_ref[...],
                             preferred_element_type=jnp.float32)

    y = pl.pallas_call(
        kernel,
        out_shape=jax.ShapeDtypeStruct((m_pad, cout), jnp.float32),
        grid=(g,),
        in_specs=[pl.BlockSpec((tm, cin), lambda i: (i, 0)),
                  pl.BlockSpec((1, cin), lambda i: (0, 0)),
                  pl.BlockSpec((1, cin), lambda i: (0, 0)),
                  pl.BlockSpec((cin, cout), lambda i: (0, 0))],
        out_specs=pl.BlockSpec((tm, cout), lambda i: (i, 0)),
        compiler_params=_compiler_params(("parallel",)),
    )(xp, scale, bias, w)
    return y[:m]


def bn_relu_matmul_add(x2d, scale, bias, w, res2d):
    """conv3 epilogue: relu(bn(x)) @ w + residual (residual & output in f32)."""
    m, cin = x2d.shape
    cout = w.shape[1]
    tm, m_pad, g = _grid_cfg(m)
    xp = _pad_rows(x2d, m_pad)
    rp = _pad_rows(res2d, m_pad)

    def kernel(x_ref, s_ref, b_ref, w_ref, r_ref, y_ref):
        x = x_ref[...].astype(jnp.float32)
        a = jnp.maximum(x * s_ref[...] + b_ref[...], 0.0)
        y_ref[...] = (jnp.dot(a.astype(w_ref.dtype), w_ref[...],
                              preferred_element_type=jnp.float32)
                      + r_ref[...].astype(jnp.float32))

    y = pl.pallas_call(
        kernel,
        out_shape=jax.ShapeDtypeStruct((m_pad, cout), jnp.float32),
        grid=(g,),
        in_specs=[pl.BlockSpec((tm, cin), lambda i: (i, 0)),
                  pl.BlockSpec((1, cin), lambda i: (0, 0)),
                  pl.BlockSpec((1, cin), lambda i: (0, 0)),
                  pl.BlockSpec((cin, cout), lambda i: (0, 0)),
                  pl.BlockSpec((tm, cout), lambda i: (i, 0))],
        out_specs=pl.BlockSpec((tm, cout), lambda i: (i, 0)),
        compiler_params=_compiler_params(("parallel",)),
    )(xp, scale, bias, w, rp)
    return y[:m]


def conv3x3_bn_relu_stats(y1_nhwc, scale, bias, w2g):
    """Fused relu(bn(x)) -> 3x3 conv (stride 1, pad 1), one image per grid step.

    y1_nhwc : (N, H, W, C) *unpadded* pre-BN activation (bf16 in HBM).
    w2g     : (3, 3*C, P) -- for each kw, the 3 kh taps stacked along K.
    Returns y (N, H*W, P) bf16 and per-image [sum; sumsq] partials (N, 2, P).

    The zero halo is built in a VMEM scratch (no jnp.pad HBM pass).  The three
    W-shifts are applied once on the f32 post-ReLU activation (aligned f32
    slices), cast to bf16, and stored so all subsequent tap reads are aligned
    leading-dim slices.  The conv is 3 MXU matmuls with K = 3*C.
    """
    n, h, wd, c = y1_nhwc.shape
    kgrp = w2g.shape[1]                     # 3*C
    p_out = w2g.shape[-1]
    hp2 = h + 2

    def kernel(x_ref, s_ref, b_ref, w_ref, y_ref, st_ref, hbuf):
        # hbuf[kw, r, j, :] == zero-padded activation at (r, j+kw); zero the
        # buffer every step (scratch is per-core; cheap vs. the matmuls).
        hbuf[...] = jnp.zeros_like(hbuf)
        x = x_ref[0].astype(jnp.float32)                       # (H, W, C)
        a = jnp.maximum(x * s_ref[...] + b_ref[...], 0.0)
        zcol = jnp.zeros((h, 1, c), jnp.float32)
        shifted = (jnp.concatenate([zcol, a[:, :wd - 1, :]], axis=1),  # kw = 0
                   a,                                                   # kw = 1
                   jnp.concatenate([a[:, 1:, :], zcol], axis=1))        # kw = 2
        for kw in range(3):
            hbuf[kw, 1:h + 1, :, :] = shifted[kw].astype(hbuf.dtype)

        acc = jnp.zeros((h * wd, p_out), jnp.float32)
        for kw in range(3):                 # 3 matmuls, kh taps grouped along K
            tap = jnp.concatenate(
                [hbuf[kw, kh:kh + h, :, :] for kh in range(3)],
                axis=-1).reshape(h * wd, kgrp)
            acc = acc + jnp.dot(tap, w_ref[kw],
                                preferred_element_type=jnp.float32)
        y_ref[0] = acc.astype(y_ref.dtype)
        st_ref[0] = jnp.concatenate(
            [jnp.sum(acc, axis=0, keepdims=True),
             jnp.sum(acc * acc, axis=0, keepdims=True)], axis=0)

    y, parts = pl.pallas_call(
        kernel,
        out_shape=(jax.ShapeDtypeStruct((n, h * wd, p_out), ACT_DTYPE),
                   jax.ShapeDtypeStruct((n, 2, p_out), jnp.float32)),
        grid=(n,),
        # TODO(synk): tile over row bands (grid=(N, H//band)) with a 1-row halo
        # so tiny batches still feed both v7x TensorCores / the DMA pipeline.
        in_specs=[pl.BlockSpec((1, h, wd, c), lambda b: (b, 0, 0, 0)),
                  pl.BlockSpec((1, c), lambda b: (0, 0)),
                  pl.BlockSpec((1, c), lambda b: (0, 0)),
                  pl.BlockSpec((3, kgrp, p_out), lambda b: (0, 0, 0))],
        out_specs=[pl.BlockSpec((1, h * wd, p_out), lambda b: (b, 0, 0)),
                   pl.BlockSpec((1, 2, p_out), lambda b: (b, 0, 0))],
        scratch_shapes=[pltpu.VMEM((3, hp2, wd, c), DOT_DTYPE)],
        compiler_params=_compiler_params(("parallel",)),
    )(y1_nhwc, scale, bias, w2g)
    return y, parts


# ----------------------------- parameter prep (one-time) -----------------------------

def prepare_params(p):
    """Hoisted weight transposes / bf16 casts / lane-dense channel padding."""
    planes, cin = p["w1"].shape[0], p["w1"].shape[1]
    cout = EXPANSION * planes
    pp = _round_up(planes, LANE)            # lane-dense intermediate channel width

    w1 = jnp.transpose(p["w1"][:, :, 0, 0])                       # (Cin, P)
    w1 = _pad_axis(w1, 1, pp).astype(DOT_DTYPE)                   # (Cin, Pp)

    w2 = jnp.transpose(p["w2"], (2, 3, 1, 0))                     # (kh, kw, P, P)
    w2 = _pad_axis(_pad_axis(w2, 2, pp), 3, pp)                   # (3, 3, Pp, Pp)
    w2 = (jnp.transpose(w2, (1, 0, 2, 3))                         # (kw, kh, Pp, Pp)
          .reshape(3, 3 * pp, pp).astype(DOT_DTYPE))              # (3, 3*Pp, Pp)

    w3 = jnp.transpose(p["w3"][:, :, 0, 0])                       # (P, 4P)
    w3 = _pad_axis(w3, 0, pp).astype(DOT_DTYPE)                   # (Pp, 4P)

    prep = {
        "w1": w1, "w2": w2, "w3": w3,
        "g1": p["g1"], "b1": p["b1"],
        # pad gamma/beta with zeros -> padded channels stay exactly zero
        "g2": _pad_axis(p["g2"], 0, pp), "b2": _pad_axis(p["b2"], 0, pp),
        "g3": _pad_axis(p["g3"], 0, pp), "b3": _pad_axis(p["b3"], 0, pp),
    }
    if "ws" in p:
        prep["ws"] = jnp.transpose(p["ws"][:, :, 0, 0]).astype(DOT_DTYPE)   # (Cin, 4P)
    return prep


# ----------------------------- forward (JAX glue) -----------------------------

def preact_bottleneck_forward(x_nchw, prep, stride=1):
    n, cin, h, w = x_nchw.shape
    pp = prep["w1"].shape[1]                 # padded planes
    cout = prep["w3"].shape[1]               # EXPANSION * planes

    x = jnp.transpose(x_nchw, (0, 2, 3, 1)).astype(jnp.float32)     # NHWC
    m = n * h * w
    x2d = x.reshape(m, cin)

    # bn1 : tiled reduction over the external input
    mean1, var1 = bn_stats(x2d)
    s1, b1 = _affine_from_stats(prep["g1"], prep["b1"], mean1, var1)

    # conv1 (1x1) fused with relu(bn1(.)) and bn2 partial statistics
    y1, st1 = bn_relu_matmul_stats(x2d, s1, b1, prep["w1"])          # (M, Pp) bf16
    mean2, var2 = _finalize_stats(st1, m)
    s2, b2 = _affine_from_stats(prep["g2"], prep["b2"], mean2, var2)

    # shortcut branch
    ho = (h - 1) // stride + 1
    wo = (w - 1) // stride + 1
    if stride != 1 or cin != cout:
        xs = x[:, ::stride, ::stride, :].reshape(n * ho * wo, cin)
        shortcut = bn_relu_matmul(xs, s1, b1, prep["ws"])
    else:
        shortcut = x2d

    # conv2 (3x3, pad 1): halo synthesized in VMEM, bn3 partial statistics
    y2_full, st2 = conv3x3_bn_relu_stats(y1.reshape(n, h, w, pp), s2, b2,
                                         prep["w2"])                 # (N, H*W, Pp)
    if stride == 1:
        y2 = y2_full.reshape(m, pp)
        mean3, var3 = _finalize_stats(st2, m)
    else:
        # TODO(synk): compute only strided output positions (and their stats)
        # in-kernel; this dense conv + subsample + extra stats pass wastes MACs.
        y2 = (y2_full.reshape(n, h, w, pp)[:, ::stride, ::stride, :]
              .reshape(n * ho * wo, pp))
        mean3, var3 = bn_stats(y2)
    s3, b3 = _affine_from_stats(prep["g3"], prep["b3"], mean3, var3)

    # conv3 (1x1) fused with relu(bn3(.)) and the residual add
    out2d = bn_relu_matmul_add(y2, s3, b3, prep["w3"], shortcut)
    out = out2d.reshape(n, ho, wo, cout)
    return jnp.transpose(out, (0, 3, 1, 2))                          # NCHW


# ----------------------------- reference (pure JAX) -----------------------------

def _ref_forward(x, p, stride=1):
    def bn(x, g, b):
        mean = jnp.mean(x, axis=(0, 2, 3), keepdims=True)
        var = jnp.var(x, axis=(0, 2, 3), keepdims=True)
        return ((x - mean) / jnp.sqrt(var + EPS) * g.reshape(1, -1, 1, 1)
                + b.reshape(1, -1, 1, 1))

    def conv(x, w, stride=1, pad=0):
        return jax.lax.conv_general_dilated(
            x, w, (stride, stride), [(pad, pad), (pad, pad)],
            dimension_numbers=("NCHW", "OIHW", "NCHW"))

    cin = x.shape[1]
    planes = p["w1"].shape[0]
    out = jax.nn.relu(bn(x, p["g1"], p["b1"]))
    if stride != 1 or cin != EXPANSION * planes:
        shortcut = conv(out, p["ws"], stride=stride)
    else:
        shortcut = x
    out = conv(out, p["w1"])
    out = conv(jax.nn.relu(bn(out, p["g2"], p["b2"])), p["w2"], stride=stride, pad=1)
    out = conv(jax.nn.relu(bn(out, p["g3"], p["b3"])), p["w3"])
    return out + shortcut


# ----------------------------- init & main -----------------------------

def init_params(key, in_planes, planes):
    ks = jax.random.split(key, 10)
    cout = EXPANSION * planes
    return {
        "w1": 0.2 * jax.random.normal(ks[0], (planes, in_planes, 1, 1), jnp.float32),
        "w2": 0.1 * jax.random.normal(ks[1], (planes, planes, 3, 3), jnp.float32),
        "w3": 0.2 * jax.random.normal(ks[2], (cout, planes, 1, 1), jnp.float32),
        "ws": 0.2 * jax.random.normal(ks[3], (cout, in_planes, 1, 1), jnp.float32),
        "g1": 1.0 + 0.1 * jax.random.normal(ks[4], (in_planes,), jnp.float32),
        "b1": 0.1 * jax.random.normal(ks[5], (in_planes,), jnp.float32),
        "g2": 1.0 + 0.1 * jax.random.normal(ks[6], (planes,), jnp.float32),
        "b2": 0.1 * jax.random.normal(ks[7], (planes,), jnp.float32),
        "g3": 1.0 + 0.1 * jax.random.normal(ks[8], (planes,), jnp.float32),
        "b3": 0.1 * jax.random.normal(ks[9], (planes,), jnp.float32),
    }


if __name__ == "__main__":
    key = jax.random.PRNGKey(0)
    k_x, k_p = jax.random.split(key)

    N, IN_PLANES, H, W = 2, 4, 16, 16
    PLANES, STRIDE = 4, 1

    x = jax.random.normal(k_x, (N, IN_PLANES, H, W), jnp.float32)
    params = init_params(k_p, IN_PLANES, PLANES)
    prep = prepare_params(params)            # one-time weight prep (hoisted)

    fwd = jax.jit(preact_bottleneck_forward, static_argnames=("stride",))
    out = jax.block_until_ready(fwd(x, prep, stride=STRIDE))

    ref = jax.block_until_ready(_ref_forward(x, params, stride=STRIDE))
    assert out.shape == (N, EXPANSION * PLANES, H, W), out.shape
    # bf16 MXU operands + bf16 intermediate activations (f32 accumulation and
    # f32 batch statistics) -> compare with a bf16-level tolerance (intentional).
    assert jnp.allclose(out, ref, rtol=3e-2, atol=3e-2), float(
        jnp.max(jnp.abs(out - ref)))

    print("KERNEL_OK")
</pallas_src>

<mosaic_0001>
module attributes {stable_mosaic.version = 11 : i64} {
  func.func @kernel(%arg0: i32, %arg1: memref<512x4xf32, #tpu.memory_space<vmem>>, %arg2: memref<1x2x4xf32, #tpu.memory_space<vmem>>) attributes {dimension_semantics = [#tpu.dimension_semantics<parallel>], iteration_bounds = array<i64: 1>, scalar_prefetch = 0 : i64, scratch_operands = 0 : i64, tpu.core_type = #tpu.core_type<tc>, window_params = [{transform_indices = @transform_0, window_bounds = array<i64: 512, 4>}, {transform_indices = @transform_1, window_bounds = array<i64: 1, 2, 4>}]} {
    %c0 = arith.constant 0 : index
    %c0_0 = arith.constant 0 : index
    %0 = vector.load %arg1[%c0, %c0_0] : memref<512x4xf32, #tpu.memory_space<vmem>>, vector<512x4xf32>
    %cst = arith.constant dense<0.000000e+00> : vector<4xf32>
    %1 = vector.multi_reduction <add>, %0, %cst [0] : vector<512x4xf32> to vector<4xf32>
    %2 = vector.shape_cast %1 : vector<4xf32> to vector<1x4xf32>
    %3 = arith.mulf %0, %0 : vector<512x4xf32>
    %cst_1 = arith.constant dense<0.000000e+00> : vector<4xf32>
    %4 = vector.multi_reduction <add>, %3, %cst_1 [0] : vector<512x4xf32> to vector<4xf32>
    %5 = vector.shape_cast %4 : vector<4xf32> to vector<1x4xf32>
    %6 = tpu.concatenate %2, %5 in 0 : vector<1x4xf32>, vector<1x4xf32> -> vector<2x4xf32>
    %c0_2 = arith.constant 0 : index
    %c0_3 = arith.constant 0 : index
    %c0_4 = arith.constant 0 : index
    %7 = vector.load %arg2[%c0_2, %c0_3, %c0_4] : memref<1x2x4xf32, #tpu.memory_space<vmem>>, vector<1x2x4xf32>
    %8 = vector.shape_cast %7 : vector<1x2x4xf32> to vector<2x4xf32>
    %9 = vector.shape_cast %6 : vector<2x4xf32> to vector<1x2x4xf32>
    tpu.vector_store %arg2[%c0_2, %c0_3, %c0_4], %9 {strides = array<i32>} : memref<1x2x4xf32, #tpu.memory_space<vmem>>, vector<1x2x4xf32>,
    return
  }
  func.func @transform_0(%arg0: i32) -> (i32, i32) {
    %c0_i32 = arith.constant 0 : i32
    %c0_i32_0 = arith.constant 0 : i32
    return %arg0, %c0_i32 : i32, i32
  }
  func.func @transform_1(%arg0: i32) -> (i32, i32, i32) {
    %c0_i32 = arith.constant 0 : i32
    %c0_i32_0 = arith.constant 0 : i32
    %c0_i32_1 = arith.constant 0 : i32
    return %arg0, %c0_i32, %c0_i32_0 : i32, i32, i32
  }
}

module attributes {stable_mosaic.version = 11 : i64} {
  func.func @kernel(%arg0: i32, %arg1: memref<512x4xf32, #tpu.memory_space<vmem>>, %arg2: memref<1x4xf32, #tpu.memory_space<vmem>>, %arg3: memref<1x4xf32, #tpu.memory_space<vmem>>, %arg4: memref<4x128xbf16, #tpu.memory_space<vmem>>, %arg5: memref<512x128xbf16, #tpu.memory_space<vmem>>, %arg6: memref<1x2x128xf32, #tpu.memory_space<vmem>>) attributes {dimension_semantics = [#tpu.dimension_semantics<parallel>], iteration_bounds = array<i64: 1>, scalar_prefetch = 0 : i64, scratch_operands = 0 : i64, tpu.core_type = #tpu.core_type<tc>, window_params = [{transform_indices = @transform_0, window_bounds = array<i64: 512, 4>}, {pipeline_mode = #tpu.pipeline_mode<synchronous>, transform_indices = @transform_1, window_bounds = array<i64: 1, 4>}, {pipeline_mode = #tpu.pipeline_mode<synchronous>, transform_indices = @transform_2, window_bounds = array<i64: 1, 4>}, {pipeline_mode = #tpu.pipeline_mode<synchronous>, transform_indices = @transform_3, window_bounds = array<i64: 4, 128>}, {transform_indices = @transform_4, window_bounds = array<i64: 512, 128>}, {transform_indices = @transform_5, window_bounds = array<i64: 1, 2, 128>}]} {
    %c0 = arith.constant 0 : index
    %c0_0 = arith.constant 0 : index
    %0 = vector.load %arg1[%c0, %c0_0] : memref<512x4xf32, #tpu.memory_space<vmem>>, vector<512x4xf32>
    %c0_1 = arith.constant 0 : index
    %c0_2 = arith.constant 0 : index
    %1 = vector.load %arg2[%c0_1, %c0_2] : memref<1x4xf32, #tpu.memory_space<vmem>>, vector<1x4xf32>
    %2 = vector.broadcast %1 : vector<1x4xf32> to vector<512x4xf32>
    %3 = arith.mulf %0, %2 : vector<512x4xf32>
    %c0_3 = arith.constant 0 : index
    %c0_4 = arith.constant 0 : index
    %4 = vector.load %arg3[%c0_3, %c0_4] : memref<1x4xf32, #tpu.memory_space<vmem>>, vector<1x4xf32>
    %5 = vector.broadcast %4 : vector<1x4xf32> to vector<512x4xf32>
    %6 = arith.addf %3, %5 : vector<512x4xf32>
    %cst = arith.constant 0.000000e+00 : f32
    %7 = vector.broadcast %cst : f32 to vector<512x4xf32>
    %8 = arith.maximumf %6, %7 : vector<512x4xf32>
    %9 = arith.truncf %8 : vector<512x4xf32> to vector<512x4xbf16>
    %c0_5 = arith.constant 0 : index
    %c0_6 = arith.constant 0 : index
    %10 = vector.load %arg4[%c0_5, %c0_6] : memref<4x128xbf16, #tpu.memory_space<vmem>>, vector<4x128xbf16>
    %cst_7 = arith.constant dense<0.000000e+00> : vector<512x128xf32>
    %11 = tpu.matmul %9, %10, %cst_7 {dimension_numbers = #tpu.dot_dimension_numbers<[1], [0], [0], [1], [0, 0, 1, 1], [], []>} : vector<512x4xbf16>, vector<4x128xbf16>, vector<512x128xf32> -> vector<512x128xf32>
    %12 = arith.truncf %11 : vector<512x128xf32> to vector<512x128xbf16>
    %c0_8 = arith.constant 0 : index
    %c0_9 = arith.constant 0 : index
    %13 = vector.load %arg5[%c0_8, %c0_9] : memref<512x128xbf16, #tpu.memory_space<vmem>>, vector<512x128xbf16>
    tpu.vector_store %arg5[%c0_8, %c0_9], %12 {strides = array<i32>} : memref<512x128xbf16, #tpu.memory_space<vmem>>, vector<512x128xbf16>,
    %cst_10 = arith.constant dense<0.000000e+00> : vector<128xf32>
    %14 = vector.multi_reduction <add>, %11, %cst_10 [0] : vector<512x128xf32> to vector<128xf32>
    %15 = vector.shape_cast %14 : vector<128xf32> to vector<1x128xf32>
    %16 = arith.mulf %11, %11 : vector<512x128xf32>
    %cst_11 = arith.constant dense<0.000000e+00> : vector<128xf32>
    %17 = vector.multi_reduction <add>, %16, %cst_11 [0] : vector<512x128xf32> to vector<128xf32>
    %18 = vector.shape_cast %17 : vector<128xf32> to vector<1x128xf32>
    %19 = tpu.concatenate %15, %18 in 0 : vector<1x128xf32>, vector<1x128xf32> -> vector<2x128xf32>
    %c0_12 = arith.constant 0 : index
    %c0_13 = arith.constant 0 : index
    %c0_14 = arith.constant 0 : index
    %20 = vector.load %arg6[%c0_12, %c0_13, %c0_14] : memref<1x2x128xf32, #tpu.memory_space<vmem>>, vector<1x2x128xf32>
    %21 = vector.shape_cast %20 : vector<1x2x128xf32> to vector<2x128xf32>
    %22 = vector.shape_cast %19 : vector<2x128xf32> to vector<1x2x128xf32>
    tpu.vector_store %arg6[%c0_12, %c0_13, %c0_14], %22 {strides = array<i32>} : memref<1x2x128xf32, #tpu.memory_space<vmem>>, vector<1x2x128xf32>,
    return
  }
  func.func @transform_0(%arg0: i32) -> (i32, i32) {
    %c0_i32 = arith.constant 0 : i32
    %c0_i32_0 = arith.constant 0 : i32
    return %arg0, %c0_i32 : i32, i32
  }
  func.func @transform_1(%arg0: i32) -> (i32, i32) {
    %c0_i32 = arith.constant 0 : i32
    %c0_i32_0 = arith.constant 0 : i32
    %c0_i32_1 = arith.constant 0 : i32
    return %c0_i32, %c0_i32_0 : i32, i32
  }
  func.func @transform_2(%arg0: i32) -> (i32, i32) {
    %c0_i32 = arith.constant 0 : i32
    %c0_i32_0 = arith.constant 0 : i32
    %c0_i32_1 = arith.constant 0 : i32
    return %c0_i32, %c0_i32_0 : i32, i32
  }
  func.func @transform_3(%arg0: i32) -> (i32, i32) {
    %c0_i32 = arith.constant 0 : i32
    %c0_i32_0 = arith.constant 0 : i32
    %c0_i32_1 = arith.constant 0 : i32
    return %c0_i32, %c0_i32_0 : i32, i32
  }
  func.func @transform_4(%arg0: i32) -> (i32, i32) {
    %c0_i32 = arith.constant 0 : i32
    %c0_i32_0 = arith.constant 0 : i32
    return %arg0, %c0_i32 : i32, i32
  }
  func.func @transform_5(%arg0: i32) -> (i32, i32, i32) {
    %c0_i32 = arith.constant 0 : i32
    %c0_i32_0 = arith.constant 0 : i32
    %c0_i32_1 = arith.constant 0 : i32
    return %arg0, %c0_i32, %c0_i32_0 : i32, i32, i32
  }
}

module attributes {stable_mosaic.version = 11 : i64} {
  func.func @kernel(%arg0: i32, %arg1: memref<1x16x16x128xbf16, #tpu.memory_space<vmem>>, %arg2: memref<1x128xf32, #tpu.memory_space<vmem>>, %arg3: memref<1x128xf32, #tpu.memory_space<vmem>>, %arg4: memref<3x384x128xbf16, #tpu.memory_space<vmem>>, %arg5: memref<1x256x128xbf16, #tpu.memory_space<vmem>>, %arg6: memref<1x2x128xf32, #tpu.memory_space<vmem>>, %arg7: memref<3x18x16x128xbf16, #tpu.memory_space<vmem>>) attributes {dimension_semantics = [#tpu.dimension_semantics<parallel>], iteration_bounds = array<i64: 2>, scalar_prefetch = 0 : i64, scratch_operands = 1 : i64, tpu.core_type = #tpu.core_type<tc>, window_params = [{transform_indices = @transform_0, window_bounds = array<i64: 1, 16, 16, 128>}, {pipeline_mode = #tpu.pipeline_mode<synchronous>, transform_indices = @transform_1, window_bounds = array<i64: 1, 128>}, {pipeline_mode = #tpu.pipeline_mode<synchronous>, transform_indices = @transform_2, window_bounds = array<i64: 1, 128>}, {pipeline_mode = #tpu.pipeline_mode<synchronous>, transform_indices = @transform_3, window_bounds = array<i64: 3, 384, 128>}, {transform_indices = @transform_4, window_bounds = array<i64: 1, 256, 128>}, {transform_indices = @transform_5, window_bounds = array<i64: 1, 2, 128>}]} {
    %cst = arith.constant 0.000000e+00 : bf16
    %0 = vector.broadcast %cst : bf16 to vector<3x18x16x128xbf16>
    %c0 = arith.constant 0 : index
    %c0_0 = arith.constant 0 : index
    %c0_1 = arith.constant 0 : index
    %c0_2 = arith.constant 0 : index
    %1 = vector.load %arg7[%c0, %c0_0, %c0_1, %c0_2] : memref<3x18x16x128xbf16, #tpu.memory_space<vmem>>, vector<3x18x16x128xbf16>
    tpu.vector_store %arg7[%c0, %c0_0, %c0_1, %c0_2], %0 {strides = array<i32>} : memref<3x18x16x128xbf16, #tpu.memory_space<vmem>>, vector<3x18x16x128xbf16>,
    %c0_3 = arith.constant 0 : index
    %c0_4 = arith.constant 0 : index
    %c0_5 = arith.constant 0 : index
    %c0_6 = arith.constant 0 : index
    %2 = vector.load %arg1[%c0_3, %c0_4, %c0_5, %c0_6] : memref<1x16x16x128xbf16, #tpu.memory_space<vmem>>, vector<1x16x16x128xbf16>
    %3 = vector.shape_cast %2 : vector<1x16x16x128xbf16> to vector<16x16x128xbf16>
    %4 = arith.extf %3 : vector<16x16x128xbf16> to vector<16x16x128xf32>
    %c0_7 = arith.constant 0 : index
    %c0_8 = arith.constant 0 : index
    %5 = vector.load %arg2[%c0_7, %c0_8] : memref<1x128xf32, #tpu.memory_space<vmem>>, vector<1x128xf32>
    %6 = vector.shape_cast %5 : vector<1x128xf32> to vector<1x1x128xf32>
    %7 = vector.broadcast %6 : vector<1x1x128xf32> to vector<16x16x128xf32>
    %8 = arith.mulf %4, %7 : vector<16x16x128xf32>
    %c0_9 = arith.constant 0 : index
    %c0_10 = arith.constant 0 : index
    %9 = vector.load %arg3[%c0_9, %c0_10] : memref<1x128xf32, #tpu.memory_space<vmem>>, vector<1x128xf32>
    %10 = vector.shape_cast %9 : vector<1x128xf32> to vector<1x1x128xf32>
    %11 = vector.broadcast %10 : vector<1x1x128xf32> to vector<16x16x128xf32>
    %12 = arith.addf %8, %11 : vector<16x16x128xf32>
    %cst_11 = arith.constant 0.000000e+00 : f32
    %13 = vector.broadcast %cst_11 : f32 to vector<16x16x128xf32>
    %14 = arith.maximumf %12, %13 : vector<16x16x128xf32>
    %cst_12 = arith.constant 0.000000e+00 : f32
    %15 = vector.broadcast %cst_12 : f32 to vector<16x1x128xf32>
    %16 = vector.extract_strided_slice %14 {offsets = [0, 0, 0], sizes = [16, 15, 128], strides = [1, 1, 1]} : vector<16x16x128xf32> to vector<16x15x128xf32>
    %17 = tpu.concatenate %15, %16 in 1 : vector<16x1x128xf32>, vector<16x15x128xf32> -> vector<16x16x128xf32>
    %18 = vector.extract_strided_slice %14 {offsets = [0, 1, 0], sizes = [16, 15, 128], strides = [1, 1, 1]} : vector<16x16x128xf32> to vector<16x15x128xf32>
    %19 = tpu.concatenate %18, %15 in 1 : vector<16x15x128xf32>, vector<16x1x128xf32> -> vector<16x16x128xf32>
    %20 = arith.truncf %17 : vector<16x16x128xf32> to vector<16x16x128xbf16>
    %c0_13 = arith.constant 0 : index
    %c1 = arith.constant 1 : index
    %c0_14 = arith.constant 0 : index
    %c0_15 = arith.constant 0 : index
    %21 = vector.load %arg7[%c0_13, %c1, %c0_14, %c0_15] : memref<3x18x16x128xbf16, #tpu.memory_space<vmem>>, vector<1x16x16x128xbf16>
    %22 = vector.shape_cast %21 : vector<1x16x16x128xbf16> to vector<16x16x128xbf16>
    %23 = vector.shape_cast %20 : vector<16x16x128xbf16> to vector<1x16x16x128xbf16>
    tpu.vector_store %arg7[%c0_13, %c1, %c0_14, %c0_15], %23 {strides = array<i32>} : memref<3x18x16x128xbf16, #tpu.memory_space<vmem>>, vector<1x16x16x128xbf16>,
    %24 = arith.truncf %14 : vector<16x16x128xf32> to vector<16x16x128xbf16>
    %c1_16 = arith.constant 1 : index
    %c1_17 = arith.constant 1 : index
    %c0_18 = arith.constant 0 : index
    %c0_19 = arith.constant 0 : index
    %25 = vector.load %arg7[%c1_16, %c1_17, %c0_18, %c0_19] : memref<3x18x16x128xbf16, #tpu.memory_space<vmem>>, vector<1x16x16x128xbf16>
    %26 = vector.shape_cast %25 : vector<1x16x16x128xbf16> to vector<16x16x128xbf16>
    %27 = vector.shape_cast %24 : vector<16x16x128xbf16> to vector<1x16x16x128xbf16>
    tpu.vector_store %arg7[%c1_16, %c1_17, %c0_18, %c0_19], %27 {strides = array<i32>} : memref<3x18x16x128xbf16, #tpu.memory_space<vmem>>, vector<1x16x16x128xbf16>,
    %28 = arith.truncf %19 : vector<16x16x128xf32> to vector<16x16x128xbf16>
    %c2 = arith.constant 2 : index
    %c1_20 = arith.constant 1 : index
    %c0_21 = arith.constant 0 : index
    %c0_22 = arith.constant 0 : index
    %29 = vector.load %arg7[%c2, %c1_20, %c0_21, %c0_22] : memref<3x18x16x128xbf16, #tpu.memory_space<vmem>>, vector<1x16x16x128xbf16>
    %30 = vector.shape_cast %29 : vector<1x16x16x128xbf16> to vector<16x16x128xbf16>
    %31 = vector.shape_cast %28 : vector<16x16x128xbf16> to vector<1x16x16x128xbf16>
    tpu.vector_store %arg7[%c2, %c1_20, %c0_21, %c0_22], %31 {strides = array<i32>} : memref<3x18x16x128xbf16, #tpu.memory_space<vmem>>, vector<1x16x16x128xbf16>,
    %cst_23 = arith.constant 0.000000e+00 : f32
    %32 = vector.broadcast %cst_23 : f32 to vector<256x128xf32>
    %c0_24 = arith.constant 0 : index
    %c0_25 = arith.constant 0 : index
    %c0_26 = arith.constant 0 : index
    %c0_27 = arith.constant 0 : index
    %33 = vector.load %arg7[%c0_24, %c0_25, %c0_26, %c0_27] : memref<3x18x16x128xbf16, #tpu.memory_space<vmem>>, vector<1x16x16x128xbf16>
    %34 = vector.shape_cast %33 : vector<1x16x16x128xbf16> to vector<16x16x128xbf16>
    %c0_28 = arith.constant 0 : index
    %c1_29 = arith.constant 1 : index
    %c0_30 = arith.constant 0 : index
    %c0_31 = arith.constant 0 : index
    %35 = vector.load %arg7[%c0_28, %c1_29, %c0_30, %c0_31] : memref<3x18x16x128xbf16, #tpu.memory_space<vmem>>, vector<1x16x16x128xbf16>
    %36 = vector.shape_cast %35 : vector<1x16x16x128xbf16> to vector<16x16x128xbf16>
    %c0_32 = arith.constant 0 : index
    %c2_33 = arith.constant 2 : index
    %c0_34 = arith.constant 0 : index
    %c0_35 = arith.constant 0 : index
    %37 = vector.load %arg7[%c0_32, %c2_33, %c0_34, %c0_35] : memref<3x18x16x128xbf16, #tpu.memory_space<vmem>>, vector<1x16x16x128xbf16>
    %38 = vector.shape_cast %37 : vector<1x16x16x128xbf16> to vector<16x16x128xbf16>
    %39 = tpu.concatenate %34, %36, %38 in 2 : vector<16x16x128xbf16>, vector<16x16x128xbf16>, vector<16x16x128xbf16> -> vector<16x16x384xbf16>
    %40 = vector.shape_cast %39 : vector<16x16x384xbf16> to vector<256x384xbf16>
    %c0_36 = arith.constant 0 : index
    %c0_37 = arith.constant 0 : index
    %c0_38 = arith.constant 0 : index
    %41 = vector.load %arg4[%c0_36, %c0_37, %c0_38] : memref<3x384x128xbf16, #tpu.memory_space<vmem>>, vector<1x384x128xbf16>
    %42 = vector.shape_cast %41 : vector<1x384x128xbf16> to vector<384x128xbf16>
    %cst_39 = arith.constant dense<0.000000e+00> : vector<256x128xf32>
    %43 = tpu.matmul %40, %42, %cst_39 {dimension_numbers = #tpu.dot_dimension_numbers<[1], [0], [0], [1], [0, 0, 1, 1], [], []>} : vector<256x384xbf16>, vector<384x128xbf16>, vector<256x128xf32> -> vector<256x128xf32>
    %44 = arith.addf %32, %43 : vector<256x128xf32>
    %c1_40 = arith.constant 1 : index
    %c0_41 = arith.constant 0 : index
    %c0_42 = arith.constant 0 : index
    %c0_43 = arith.constant 0 : index
    %45 = vector.load %arg7[%c1_40, %c0_41, %c0_42, %c0_43] : memref<3x18x16x128xbf16, #tpu.memory_space<vmem>>, vector<1x16x16x128xbf16>
    %46 = vector.shape_cast %45 : vector<1x16x16x128xbf16> to vector<16x16x128xbf16>
    %c1_44 = arith.constant 1 : index
    %c1_45 = arith.constant 1 : index
    %c0_46 = arith.constant 0 : index
    %c0_47 = arith.constant 0 : index
    %47 = vector.load %arg7[%c1_44, %c1_45, %c0_46, %c0_47] : memref<3x18x16x128xbf16, #tpu.memory_space<vmem>>, vector<1x16x16x128xbf16>
    %48 = vector.shape_cast %47 : vector<1x16x16x128xbf16> to vector<16x16x128xbf16>
    %c1_48 = arith.constant 1 : index
    %c2_49 = arith.constant 2 : index
    %c0_50 = arith.constant 0 : index
    %c0_51 = arith.constant 0 : index
    %49 = vector.load %arg7[%c1_48, %c2_49, %c0_50, %c0_51] : memref<3x18x16x128xbf16, #tpu.memory_space<vmem>>, vector<1x16x16x128xbf16>
    %50 = vector.shape_cast %49 : vector<1x16x16x128xbf16> to vector<16x16x128xbf16>
    %51 = tpu.concatenate %46, %48, %50 in 2 : vector<16x16x128xbf16>, vector<16x16x128xbf16>, vector<16x16x128xbf16> -> vector<16x16x384xbf16>
    %52 = vector.shape_cast %51 : vector<16x16x384xbf16> to vector<256x384xbf16>
    %c1_52 = arith.constant 1 : index
    %c0_53 = arith.constant 0 : index
    %c0_54 = arith.constant 0 : index
    %53 = vector.load %arg4[%c1_52, %c0_53, %c0_54] : memref<3x384x128xbf16, #tpu.memory_space<vmem>>, vector<1x384x128xbf16>
    %54 = vector.shape_cast %53 : vector<1x384x128xbf16> to vector<384x128xbf16>
    %cst_55 = arith.constant dense<0.000000e+00> : vector<256x128xf32>
    %55 = tpu.matmul %52, %54, %cst_55 {dimension_numbers = #tpu.dot_dimension_numbers<[1], [0], [0], [1], [0, 0, 1, 1], [], []>} : vector<256x384xbf16>, vector<384x128xbf16>, vector<256x128xf32> -> vector<256x128xf32>
    %56 = arith.addf %44, %55 : vector<256x128xf32>
    %c2_56 = arith.constant 2 : index
    %c0_57 = arith.constant 0 : index
    %c0_58 = arith.constant 0 : index
    %c0_59 = arith.constant 0 : index
    %57 = vector.load %arg7[%c2_56, %c0_57, %c0_58, %c0_59] : memref<3x18x16x128xbf16, #tpu.memory_space<vmem>>, vector<1x16x16x128xbf16>
    %58 = vector.shape_cast %57 : vector<1x16x16x128xbf16> to vector<16x16x128xbf16>
    %c2_60 = arith.constant 2 : index
    %c1_61 = arith.constant 1 : index
    %c0_62 = arith.constant 0 : index
    %c0_63 = arith.constant 0 : index
    %59 = vector.load %arg7[%c2_60, %c1_61, %c0_62, %c0_63] : memref<3x18x16x128xbf16, #tpu.memory_space<vmem>>, vector<1x16x16x128xbf16>
    %60 = vector.shape_cast %59 : vector<1x16x16x128xbf16> to vector<16x16x128xbf16>
    %c2_64 = arith.constant 2 : index
    %c2_65 = arith.constant 2 : index
    %c0_66 = arith.constant 0 : index
    %c0_67 = arith.constant 0 : index
    %61 = vector.load %arg7[%c2_64, %c2_65, %c0_66, %c0_67] : memref<3x18x16x128xbf16, #tpu.memory_space<vmem>>, vector<1x16x16x128xbf16>
    %62 = vector.shape_cast %61 : vector<1x16x16x128xbf16> to vector<16x16x128xbf16>
    %63 = tpu.concatenate %58, %60, %62 in 2 : vector<16x16x128xbf16>, vector<16x16x128xbf16>, vector<16x16x128xbf16> -> vector<16x16x384xbf16>
    %64 = vector.shape_cast %63 : vector<16x16x384xbf16> to vector<256x384xbf16>
    %c2_68 = arith.constant 2 : index
    %c0_69 = arith.constant 0 : index
    %c0_70 = arith.constant 0 : index
    %65 = vector.load %arg4[%c2_68, %c0_69, %c0_70] : memref<3x384x128xbf16, #tpu.memory_space<vmem>>, vector<1x384x128xbf16>
    %66 = vector.shape_cast %65 : vector<1x384x128xbf16> to vector<384x128xbf16>
    %cst_71 = arith.constant dense<0.000000e+00> : vector<256x128xf32>
    %67 = tpu.matmul %64, %66, %cst_71 {dimension_numbers = #tpu.dot_dimension_numbers<[1], [0], [0], [1], [0, 0, 1, 1], [], []>} : vector<256x384xbf16>, vector<384x128xbf16>, vector<256x128xf32> -> vector<256x128xf32>
    %68 = arith.addf %56, %67 : vector<256x128xf32>
    %69 = arith.truncf %68 : vector<256x128xf32> to vector<256x128xbf16>
    %c0_72 = arith.constant 0 : index
    %c0_73 = arith.constant 0 : index
    %c0_74 = arith.constant 0 : index
    %70 = vector.load %arg5[%c0_72, %c0_73, %c0_74] : memref<1x256x128xbf16, #tpu.memory_space<vmem>>, vector<1x256x128xbf16>
    %71 = vector.shape_cast %70 : vector<1x256x128xbf16> to vector<256x128xbf16>
    %72 = vector.shape_cast %69 : vector<256x128xbf16> to vector<1x256x128xbf16>
    tpu.vector_store %arg5[%c0_72, %c0_73, %c0_74], %72 {strides = array<i32>} : memref<1x256x128xbf16, #tpu.memory_space<vmem>>, vector<1x256x128xbf16>,
    %cst_75 = arith.constant dense<0.000000e+00> : vector<128xf32>
    %73 = vector.multi_reduction <add>, %68, %cst_75 [0] : vector<256x128xf32> to vector<128xf32>
    %74 = vector.shape_cast %73 : vector<128xf32> to vector<1x128xf32>
    %75 = arith.mulf %68, %68 : vector<256x128xf32>
    %cst_76 = arith.constant dense<0.000000e+00> : vector<128xf32>
    %76 = vector.multi_reduction <add>, %75, %cst_76 [0] : vector<256x128xf32> to vector<128xf32>
    %77 = vector.shape_cast %76 : vector<128xf32> to vector<1x128xf32>
    %78 = tpu.concatenate %74, %77 in 0 : vector<1x128xf32>, vector<1x128xf32> -> vector<2x128xf32>
    %c0_77 = arith.constant 0 : index
    %c0_78 = arith.constant 0 : index
    %c0_79 = arith.constant 0 : index
    %79 = vector.load %arg6[%c0_77, %c0_78, %c0_79] : memref<1x2x128xf32, #tpu.memory_space<vmem>>, vector<1x2x128xf32>
    %80 = vector.shape_cast %79 : vector<1x2x128xf32> to vector<2x128xf32>
    %81 = vector.shape_cast %78 : vector<2x128xf32> to vector<1x2x128xf32>
    tpu.vector_store %arg6[%c0_77, %c0_78, %c0_79], %81 {strides = array<i32>} : memref<1x2x128xf32, #tpu.memory_space<vmem>>, vector<1x2x128xf32>,
    return
  }
  func.func @transform_0(%arg0: i32) -> (i32, i32, i32, i32) {
    %c0_i32 = arith.constant 0 : i32
    %c0_i32_0 = arith.constant 0 : i32
    %c0_i32_1 = arith.constant 0 : i32
    %c0_i32_2 = arith.constant 0 : i32
    return %arg0, %c0_i32, %c0_i32_0, %c0_i32_1 : i32, i32, i32, i32
  }
  func.func @transform_1(%arg0: i32) -> (i32, i32) {
    %c0_i32 = arith.constant 0 : i32
    %c0_i32_0 = arith.constant 0 : i32
    %c0_i32_1 = arith.constant 0 : i32
    return %c0_i32, %c0_i32_0 : i32, i32
  }
  func.func @transform_2(%arg0: i32) -> (i32, i32) {
    %c0_i32 = arith.constant 0 : i32
    %c0_i32_0 = arith.constant 0 : i32
    %c0_i32_1 = arith.constant 0 : i32
    return %c0_i32, %c0_i32_0 : i32, i32
  }
  func.func @transform_3(%arg0: i32) -> (i32, i32, i32) {
    %c0_i32 = arith.constant 0 : i32
    %c0_i32_0 = arith.constant 0 : i32
    %c0_i32_1 = arith.constant 0 : i32
    %c0_i32_2 = arith.constant 0 : i32
    return %c0_i32, %c0_i32_0, %c0_i32_1 : i32, i32, i32
  }
  func.func @transform_4(%arg0: i32) -> (i32, i32, i32) {
    %c0_i32 = arith.constant 0 : i32
    %c0_i32_0 = arith.constant 0 : i32
    %c0_i32_1 = arith.constant 0 : i32
    return %arg0, %c0_i32, %c0_i32_0 : i32, i32, i32
  }
  func.func @transform_5(%arg0: i32) -> (i32, i32, i32) {
    %c0_i32 = arith.constant 0 : i32
    %c0_i32_0 = arith.constant 0 : i32
    %c0_i32_1 = arith.constant 0 : i32
    return %arg0, %c0_i32, %c0_i32_0 : i32, i32, i32
  }
}

module attributes {stable_mosaic.version = 11 : i64} {
  func.func @kernel(%arg0: i32, %arg1: memref<512x4xf32, #tpu.memory_space<vmem>>, %arg2: memref<1x4xf32, #tpu.memory_space<vmem>>, %arg3: memref<1x4xf32, #tpu.memory_space<vmem>>, %arg4: memref<4x16xbf16, #tpu.memory_space<vmem>>, %arg5: memref<512x16xf32, #tpu.memory_space<vmem>>) attributes {dimension_semantics = [#tpu.dimension_semantics<parallel>], iteration_bounds = array<i64: 1>, scalar_prefetch = 0 : i64, scratch_operands = 0 : i64, tpu.core_type = #tpu.core_type<tc>, window_params = [{transform_indices = @transform_0, window_bounds = array<i64: 512, 4>}, {pipeline_mode = #tpu.pipeline_mode<synchronous>, transform_indices = @transform_1, window_bounds = array<i64: 1, 4>}, {pipeline_mode = #tpu.pipeline_mode<synchronous>, transform_indices = @transform_2, window_bounds = array<i64: 1, 4>}, {pipeline_mode = #tpu.pipeline_mode<synchronous>, transform_indices = @transform_3, window_bounds = array<i64: 4, 16>}, {transform_indices = @transform_4, window_bounds = array<i64: 512, 16>}]} {
    %c0 = arith.constant 0 : index
    %c0_0 = arith.constant 0 : index
    %0 = vector.load %arg1[%c0, %c0_0] : memref<512x4xf32, #tpu.memory_space<vmem>>, vector<512x4xf32>
    %c0_1 = arith.constant 0 : index
    %c0_2 = arith.constant 0 : index
    %1 = vector.load %arg2[%c0_1, %c0_2] : memref<1x4xf32, #tpu.memory_space<vmem>>, vector<1x4xf32>
    %2 = vector.broadcast %1 : vector<1x4xf32> to vector<512x4xf32>
    %3 = arith.mulf %0, %2 : vector<512x4xf32>
    %c0_3 = arith.constant 0 : index
    %c0_4 = arith.constant 0 : index
    %4 = vector.load %arg3[%c0_3, %c0_4] : memref<1x4xf32, #tpu.memory_space<vmem>>, vector<1x4xf32>
    %5 = vector.broadcast %4 : vector<1x4xf32> to vector<512x4xf32>
    %6 = arith.addf %3, %5 : vector<512x4xf32>
    %cst = arith.constant 0.000000e+00 : f32
    %7 = vector.broadcast %cst : f32 to vector<512x4xf32>
    %8 = arith.maximumf %6, %7 : vector<512x4xf32>
    %9 = arith.truncf %8 : vector<512x4xf32> to vector<512x4xbf16>
    %c0_5 = arith.constant 0 : index
    %c0_6 = arith.constant 0 : index
    %10 = vector.load %arg4[%c0_5, %c0_6] : memref<4x16xbf16, #tpu.memory_space<vmem>>, vector<4x16xbf16>
    %cst_7 = arith.constant dense<0.000000e+00> : vector<512x16xf32>
    %11 = tpu.matmul %9, %10, %cst_7 {dimension_numbers = #tpu.dot_dimension_numbers<[1], [0], [0], [1], [0, 0, 1, 1], [], []>} : vector<512x4xbf16>, vector<4x16xbf16>, vector<512x16xf32> -> vector<512x16xf32>
    %c0_8 = arith.constant 0 : index
    %c0_9 = arith.constant 0 : index
    %12 = vector.load %arg5[%c0_8, %c0_9] : memref<512x16xf32, #tpu.memory_space<vmem>>, vector<512x16xf32>
    tpu.vector_store %arg5[%c0_8, %c0_9], %11 {strides = array<i32>} : memref<512x16xf32, #tpu.memory_space<vmem>>, vector<512x16xf32>,
    return
  }
  func.func @transform_0(%arg0: i32) -> (i32, i32) {
    %c0_i32 = arith.constant 0 : i32
    %c0_i32_0 = arith.constant 0 : i32
    return %arg0, %c0_i32 : i32, i32
  }
  func.func @transform_1(%arg0: i32) -> (i32, i32) {
    %c0_i32 = arith.constant 0 : i32
    %c0_i32_0 = arith.constant 0 : i32
    %c0_i32_1 = arith.constant 0 : i32
    return %c0_i32, %c0_i32_0 : i32, i32
  }
  func.func @transform_2(%arg0: i32) -> (i32, i32) {
    %c0_i32 = arith.constant 0 : i32
    %c0_i32_0 = arith.constant 0 : i32
    %c0_i32_1 = arith.constant 0 : i32
    return %c0_i32, %c0_i32_0 : i32, i32
  }
  func.func @transform_3(%arg0: i32) -> (i32, i32) {
    %c0_i32 = arith.constant 0 : i32
    %c0_i32_0 = arith.constant 0 : i32
    %c0_i32_1 = arith.constant 0 : i32
    return %c0_i32, %c0_i32_0 : i32, i32
  }
  func.func @transform_4(%arg0: i32) -> (i32, i32) {
    %c0_i32 = arith.constant 0 : i32
    %c0_i32_0 = arith.constant 0 : i32
    return %arg0, %c0_i32 : i32, i32
  }
}

module attributes {stable_mosaic.version = 11 : i64} {
  func.func @kernel(%arg0: i32, %arg1: memref<512x128xbf16, #tpu.memory_space<vmem>>, %arg2: memref<1x128xf32, #tpu.memory_space<vmem>>, %arg3: memref<1x128xf32, #tpu.memory_space<vmem>>, %arg4: memref<128x16xbf16, #tpu.memory_space<vmem>>, %arg5: memref<512x16xf32, #tpu.memory_space<vmem>>, %arg6: memref<512x16xf32, #tpu.memory_space<vmem>>) attributes {dimension_semantics = [#tpu.dimension_semantics<parallel>], iteration_bounds = array<i64: 1>, scalar_prefetch = 0 : i64, scratch_operands = 0 : i64, tpu.core_type = #tpu.core_type<tc>, window_params = [{transform_indices = @transform_0, window_bounds = array<i64: 512, 128>}, {pipeline_mode = #tpu.pipeline_mode<synchronous>, transform_indices = @transform_1, window_bounds = array<i64: 1, 128>}, {pipeline_mode = #tpu.pipeline_mode<synchronous>, transform_indices = @transform_2, window_bounds = array<i64: 1, 128>}, {pipeline_mode = #tpu.pipeline_mode<synchronous>, transform_indices = @transform_3, window_bounds = array<i64: 128, 16>}, {transform_indices = @transform_4, window_bounds = array<i64: 512, 16>}, {transform_indices = @transform_5, window_bounds = array<i64: 512, 16>}]} {
    %c0 = arith.constant 0 : index
    %c0_0 = arith.constant 0 : index
    %0 = vector.load %arg1[%c0, %c0_0] : memref<512x128xbf16, #tpu.memory_space<vmem>>, vector<512x128xbf16>
    %1 = arith.extf %0 : vector<512x128xbf16> to vector<512x128xf32>
    %c0_1 = arith.constant 0 : index
    %c0_2 = arith.constant 0 : index
    %2 = vector.load %arg2[%c0_1, %c0_2] : memref<1x128xf32, #tpu.memory_space<vmem>>, vector<1x128xf32>
    %3 = vector.broadcast %2 : vector<1x128xf32> to vector<512x128xf32>
    %4 = arith.mulf %1, %3 : vector<512x128xf32>
    %c0_3 = arith.constant 0 : index
    %c0_4 = arith.constant 0 : index
    %5 = vector.load %arg3[%c0_3, %c0_4] : memref<1x128xf32, #tpu.memory_space<vmem>>, vector<1x128xf32>
    %6 = vector.broadcast %5 : vector<1x128xf32> to vector<512x128xf32>
    %7 = arith.addf %4, %6 : vector<512x128xf32>
    %cst = arith.constant 0.000000e+00 : f32
    %8 = vector.broadcast %cst : f32 to vector<512x128xf32>
    %9 = arith.maximumf %7, %8 : vector<512x128xf32>
    %10 = arith.truncf %9 : vector<512x128xf32> to vector<512x128xbf16>
    %c0_5 = arith.constant 0 : index
    %c0_6 = arith.constant 0 : index
    %11 = vector.load %arg4[%c0_5, %c0_6] : memref<128x16xbf16, #tpu.memory_space<vmem>>, vector<128x16xbf16>
    %cst_7 = arith.constant dense<0.000000e+00> : vector<512x16xf32>
    %12 = tpu.matmul %10, %11, %cst_7 {dimension_numbers = #tpu.dot_dimension_numbers<[1], [0], [0], [1], [0, 0, 1, 1], [], []>} : vector<512x128xbf16>, vector<128x16xbf16>, vector<512x16xf32> -> vector<512x16xf32>
    %c0_8 = arith.constant 0 : index
    %c0_9 = arith.constant 0 : index
    %13 = vector.load %arg5[%c0_8, %c0_9] : memref<512x16xf32, #tpu.memory_space<vmem>>, vector<512x16xf32>
    %14 = arith.addf %12, %13 : vector<512x16xf32>
    %c0_10 = arith.constant 0 : index
    %c0_11 = arith.constant 0 : index
    %15 = vector.load %arg6[%c0_10, %c0_11] : memref<512x16xf32, #tpu.memory_space<vmem>>, vector<512x16xf32>
    tpu.vector_store %arg6[%c0_10, %c0_11], %14 {strides = array<i32>} : memref<512x16xf32, #tpu.memory_space<vmem>>, vector<512x16xf32>,
    return
  }
  func.func @transform_0(%arg0: i32) -> (i32, i32) {
    %c0_i32 = arith.constant 0 : i32
    %c0_i32_0 = arith.constant 0 : i32
    return %arg0, %c0_i32 : i32, i32
  }
  func.func @transform_1(%arg0: i32) -> (i32, i32) {
    %c0_i32 = arith.constant 0 : i32
    %c0_i32_0 = arith.constant 0 : i32
    %c0_i32_1 = arith.constant 0 : i32
    return %c0_i32, %c0_i32_0 : i32, i32
  }
  func.func @transform_2(%arg0: i32) -> (i32, i32) {
    %c0_i32 = arith.constant 0 : i32
    %c0_i32_0 = arith.constant 0 : i32
    %c0_i32_1 = arith.constant 0 : i32
    return %c0_i32, %c0_i32_0 : i32, i32
  }
  func.func @transform_3(%arg0: i32) -> (i32, i32) {
    %c0_i32 = arith.constant 0 : i32
    %c0_i32_0 = arith.constant 0 : i32
    %c0_i32_1 = arith.constant 0 : i32
    return %c0_i32, %c0_i32_0 : i32, i32
  }
  func.func @transform_4(%arg0: i32) -> (i32, i32) {
    %c0_i32 = arith.constant 0 : i32
    %c0_i32_0 = arith.constant 0 : i32
    return %arg0, %c0_i32 : i32, i32
  }
  func.func @transform_5(%arg0: i32) -> (i32, i32) {
    %c0_i32 = arith.constant 0 : i32
    %c0_i32_0 = arith.constant 0 : i32
    return %arg0, %c0_i32 : i32, i32
  }
}

</mosaic_0001>

<bundles_post_ra>
// kernel: preact_bottleneck_forward.5
= control target key start
LH: loop header
LB: loop body
LE: loop exit
PB: predicated region body
PF: predicated region fallthrough
CT: control target
= control target key end

     0   :  { %vm72_vm0 = vcmask 31744   ;;  %vm403_vm1 = vcmask 1040384   ;;  %vm405_vm2 = vcmask 25600   ;;  %s1276_s0 = inlined_call_operand.vmem [shape: f32[512,4], index: 0, kind: input, shape index: {}]   ;;  %s1277_s1 = inlined_call_operand.vmem [shape: f32[1,2,4], index: 1, kind: output, shape index: {}]  }
   0x1   :  { %v424_v0 = vld [vmem:[%s1276_s0] sm:$0xff]  ;;  %v429_v1 = vld [vmem:[%s1276_s0 + $0x8] sm:$0xff]  ;;  %v434_v2 = vld [vmem:[%s1276_s0 + $0x10] sm:$0xff] }
   0x2   :  { %v73_v3 = vsel %vm72_vm0, %v424_v0, 0.0  ;;  %v74_v4 = vsel %vm72_vm0, %v429_v1, 0.0  ;;  %v76_v5 = vsel %vm72_vm0, %v434_v2, 0.0  ;;  %v445_v6 = vld [vmem:[%s1276_s0 + $0x18] sm:$0xff]  ;;  %v452_v9 = vld [vmem:[%s1276_s0 + $0x20] sm:$0xff]  ;;  %v459_v12 = vld [vmem:[%s1276_s0 + $0x28] sm:$0xff] }
   0x3   :  { %v75_v7 = vadd.f32 %v74_v4, %v73_v3  ;;  %v78_v8 = vsel %vm72_vm0, %v445_v6, 0.0  ;;  %v80_v11 = vsel %vm72_vm0, %v452_v9, 0.0  ;;  %v82_v14 = vsel %vm72_vm0, %v459_v12, 0.0  ;;  %v466_v15 = vld [vmem:[%s1276_s0 + $0x30] sm:$0xff]  ;;  %v471_v17 = vld [vmem:[%s1276_s0 + $0x38] sm:$0xff]  ;;  %v476_v18 = vld [vmem:[%s1276_s0 + $0x40] sm:$0xff] }
   0x4   :  { %v84_v19 = vsel %vm72_vm0, %v466_v15, 0.0  ;;  %v483_v20 = vld [vmem:[%s1276_s0 + $0x48] sm:$0xff]  ;;  %v488_v21 = vld [vmem:[%s1276_s0 + $0x50] sm:$0xff]  ;;  %v493_v22 = vld [vmem:[%s1276_s0 + $0x58] sm:$0xff]  ;;  %v86_v24 = vsel %vm72_vm0, %v471_v17, 0.0  ;;  %v88_v25 = vsel %vm72_vm0, %v476_v18, 0.0 }
   0x5   :  { %v77_v10 = vadd.f32 %v76_v5, %v75_v7  ;;  %v502_v26 = vld [vmem:[%s1276_s0 + $0x108] sm:$0xff]  ;;  %v507_v27 = vld [vmem:[%s1276_s0 + $0x110] sm:$0xff]  ;;  %v512_v28 = vld [vmem:[%s1276_s0 + $0x118] sm:$0xff]  ;;  %v90_v29 = vsel %vm72_vm0, %v483_v20, 0.0  ;;  %v92_v30 = vsel %vm72_vm0, %v488_v21, 0.0  ;;  %v520_v31 = vsel %vm72_vm0, %v493_v22, 0.0 }
   0x6   :  { %v525_v32 = vld [vmem:[%s1276_s0 + $0x120] sm:$0xff]  ;;  %v530_v33 = vld [vmem:[%s1276_s0 + $0x128] sm:$0xff]  ;;  %v535_v34 = vld [vmem:[%s1276_s0 + $0x130] sm:$0xff]  ;;  %v539_v36 = vsel %vm72_vm0, %v502_v26, 0.0  ;;  %v543_v37 = vsel %vm72_vm0, %v507_v27, 0.0  ;;  %v547_v38 = vsel %vm72_vm0, %v512_v28, 0.0 }
   0x7   :  { %v79_v13 = vadd.f32 %v78_v8, %v77_v10  ;;  %1296 = vst [vmem:[#allocation2_spill] sm:$0xff] %v539_v36  ;;  %1297 = vst [vmem:[#allocation3_spill] sm:$0xff] %v543_v37  ;;  %v552_v39 = vld [vmem:[%s1276_s0 + $0x138] sm:$0xff]  ;;  %v557_v40 = vld [vmem:[%s1276_s0 + $0x140] sm:$0xff]  ;;  %v566_v42 = vsel %vm72_vm0, %v525_v32, 0.0  ;;  %v570_v43 = vsel %vm72_vm0, %v530_v33, 0.0  ;;  %v208_v36 = vmul.f32 %v434_v2, %v434_v2 }
   0x8   :  { %1298 = vst [vmem:[#allocation4_spill] sm:$0xff] %v547_v38  ;;  %v562_v41 = vld [vmem:[%s1276_s0 + $0x148] sm:$0xff]  ;;  %1299 = vst [vmem:[#allocation5_spill] sm:$0xff] %v566_v42  ;;  %v574_v44 = vsel %vm72_vm0, %v535_v34, 0.0  ;;  %v579_v45 = vld [vmem:[%s1276_s0 + $0x150] sm:$0xff]  ;;  %v593_v49 = vsel %vm72_vm0, %v552_v39, 0.0 }
   0x9   :  { %v81_v16 = vadd.f32 %v80_v11, %v79_v13  ;;  %1300 = vst [vmem:[#allocation6_spill] sm:$0xff] %v570_v43  ;;  %1301 = vst [vmem:[#allocation7_spill] sm:$0xff] %v574_v44  ;;  %v584_v46 = vld [vmem:[%s1276_s0 + $0x158] sm:$0xff]  ;;  %v589_v47 = vld [vmem:[%s1276_s0 + $0x160] sm:$0xff]  ;;  %v597_v50 = vsel %vm72_vm0, %v557_v40, 0.0  ;;  %v601_v51 = vsel %vm72_vm0, %v562_v41, 0.0 }
   0xa   :  { %1302 = vst [vmem:[#allocation8_spill] sm:$0xff] %v593_v49  ;;  %1303 = vst [vmem:[#allocation9_spill] sm:$0xff] %v597_v50  ;;  %v606_v52 = vld [vmem:[%s1276_s0 + $0x168] sm:$0xff]  ;;  %v611_v53 = vld [vmem:[%s1276_s0 + $0x170] sm:$0xff]  ;;  %v620_v55 = vsel %vm72_vm0, %v579_v45, 0.0  ;;  %v624_v56 = vsel %vm72_vm0, %v584_v46, 0.0 }
   0xb   :  { %v83_v23 = vadd.f32 %v82_v14, %v81_v16  ;;  %1304 = vst [vmem:[#allocation10_spill] sm:$0xff] %v601_v51  ;;  %v616_v54 = vld [vmem:[%s1276_s0 + $0x178] sm:$0xff]  ;;  %1305 = vst [vmem:[#allocation11_spill] sm:$0xff] %v620_v55  ;;  %v628_v57 = vsel %vm72_vm0, %v589_v47, 0.0  ;;  %v633_v58 = vld [vmem:[%s1276_s0 + $0x180] sm:$0xff]  ;;  %v647_v62 = vsel %vm72_vm0, %v606_v52, 0.0 }
   0xc   :  { %1306 = vst [vmem:[#allocation12_spill] sm:$0xff] %v624_v56  ;;  %1307 = vst [vmem:[#allocation13_spill] sm:$0xff] %v628_v57  ;;  %v638_v59 = vld [vmem:[%s1276_s0 + $0x188] sm:$0xff]  ;;  %v643_v60 = vld [vmem:[%s1276_s0 + $0x190] sm:$0xff]  ;;  %v651_v63 = vsel %vm72_vm0, %v611_v53, 0.0  ;;  %v655_v3 = vsel %vm72_vm0, %v616_v54, 0.0 }
   0xd   :  { %v85_v35 = vadd.f32 %v84_v19, %v83_v23  ;;  %1308 = vst [vmem:[#allocation14_spill] sm:$0xff] %v647_v62  ;;  %1309 = vst [vmem:[#allocation15_spill] sm:$0xff] %v651_v63  ;;  %v660_v4 = vld [vmem:[%s1276_s0 + $0x198] sm:$0xff]  ;;  %v665_v5 = vld [vmem:[%s1276_s0 + $0x1a0] sm:$0xff]  ;;  %v674_v8 = vsel %vm72_vm0, %v633_v58, 0.0  ;;  %v678_v10 = vsel %vm72_vm0, %v638_v59, 0.0 }
   0xe   :  { %1310 = vst [vmem:[#allocation16_spill] sm:$0xff] %v655_v3  ;;  %v670_v7 = vld [vmem:[%s1276_s0 + $0x1a8] sm:$0xff]  ;;  %1311 = vst [vmem:[#allocation17_spill] sm:$0xff] %v674_v8  ;;  %v682_v11 = vsel %vm72_vm0, %v643_v60, 0.0  ;;  %v687_v13 = vld [vmem:[%s1276_s0 + $0x60] sm:$0xff] }
   0xf   :  { %v87_v48 = vadd.f32 %v86_v24, %v85_v35  ;;  %1312 = vst [vmem:[#allocation18_spill] sm:$0xff] %v678_v10  ;;  %1313 = vst [vmem:[#allocation19_spill] sm:$0xff] %v682_v11  ;;  %v692_v14 = vld [vmem:[%s1276_s0 + $0x1b0] sm:$0xff]  ;;  %v697_v16 = vld [vmem:[%s1276_s0 + $0x1b8] sm:$0xff]  ;;  %v706_v24 = vsel %vm72_vm0, %v660_v4, 0.0  ;;  %v714_v35 = vsel %vm72_vm0, %v670_v7, 0.0 }
  0x10   :  { %v702_v19 = vld [vmem:[%s1276_s0 + $0x1c0] sm:$0xff]  ;;  %1314 = vst [vmem:[#allocation20_spill] sm:$0xff] %v706_v24  ;;  %1316 = vst [vmem:[#allocation22_spill] sm:$0xff] %v714_v35  ;;  %v737_v35 = vsel %vm72_vm0, %v697_v16, 0.0  ;;  %v751_v10 = vld [vmem:[%s1276_s0 + $0x1e8] sm:$0xff] }
  0x11   :  { %v89_v61 = vadd.f32 %v88_v25, %v87_v48  ;;  %v710_v25 = vsel %vm72_vm0, %v665_v5, 0.0  ;;  %v719_v48 = vld [vmem:[%s1276_s0 + $0x1c8] sm:$0xff]  ;;  %1318 = vst [vmem:[#allocation24_spill] sm:$0xff] %v737_v35  ;;  %v741_v24 = vsel %vm72_vm0, %v702_v19, 0.0  ;;  %v746_v11 = vld [vmem:[%s1276_s0 + $0x1e0] sm:$0xff]  ;;  %v773_v63 = vld [vmem:[%s1276_s0 + $0x1f8] sm:$0xff] }
  0x12   :  { %1315 = vst [vmem:[#allocation21_spill] sm:$0xff] %v710_v25  ;;  %v733_v25 = vsel %vm72_vm0, %v692_v14, 0.0  ;;  %1319 = vst [vmem:[#allocation25_spill] sm:$0xff] %v741_v24  ;;  %v760_v8 = vsel %vm72_vm0, %v719_v48, 0.0  ;;  %v795_v57 = vsel %vm72_vm0, %v773_v63, 0.0  ;;  %v824_v55 = vld [vmem:[%s1276_s0 + $0x90] sm:$0xff] }
  0x13   :  { %v91_v23 = vadd.f32 %v90_v29, %v89_v61  ;;  %v724_v29 = vld [vmem:[%s1276_s0 + $0x1d0] sm:$0xff]  ;;  %v729_v61 = vld [vmem:[%s1276_s0 + $0x1d8] sm:$0xff]  ;;  %1317 = vst [vmem:[#allocation23_spill] sm:$0xff] %v733_v25  ;;  %1321 = vst [vmem:[#allocation27_spill] sm:$0xff] %v760_v8  ;;  %v783_v8 = vsel %vm72_vm0, %v751_v10, 0.0 }
  0x14   :  { %v756_v25 = vld [vmem:[%s1276_s0 + $0x1f0] sm:$0xff]  ;;  %v764_v24 = vsel %vm72_vm0, %v724_v29, 0.0  ;;  %v768_v3 = vsel %vm72_vm0, %v729_v61, 0.0  ;;  %1324 = vst [vmem:[#allocation30_spill] sm:$0xff] %v773_v63  ;;  %1326 = vst [vmem:[#allocation32_spill] sm:$0xff] %v783_v8  ;;  %v829_v51 = vld [vmem:[%s1276_s0 + $0x98] sm:$0xff] }
  0x15   :  { %1320 = vst [vmem:[#allocation26_spill] sm:$0xff] %v756_v25  ;;  %v93_v35 = vadd.f32 %v92_v30, %v91_v23  ;;  %1322 = vst [vmem:[#allocation28_spill] sm:$0xff] %v764_v24  ;;  %v96_v30 = vsel %vm72_vm0, %v687_v13, 0.0  ;;  %v779_v23 = vsel %vm72_vm0, %v746_v11, 0.0  ;;  %v787_v24 = vsel %vm72_vm0, %v756_v25, 0.0  ;;  %v22_v8 = vld [vmem:[%s1276_s0 + $0x70] sm:$0xff] }
  0x16   :  { %1323 = vst [vmem:[#allocation29_spill] sm:$0xff] %v768_v3  ;;  %1325 = vst [vmem:[#allocation31_spill] sm:$0xff] %v779_v23  ;;  %v21_v3 = vld [vmem:[%s1276_s0 + $0x68] sm:$0xff]  ;;  %v834_v50 = vld [vmem:[%s1276_s0 + $0xa0] sm:$0xff]  ;;  %v110_v38 = vsel %vm72_vm0, %v829_v51, 0.0 }
  0x17   :  { %1327 = vst [vmem:[#allocation33_spill] sm:$0xff] %v787_v24  ;;  %v95_v62 = vadd.f32 %v520_v31, %v93_v35  ;;  %1328 = vst [vmem:[#allocation34_spill] sm:$0xff] %v795_v57  ;;  %v98_v23 = vsel %vm72_vm0, %v21_v3, 0.0  ;;  %v804_v24 = vld [vmem:[%s1276_s0 + $0x78] sm:$0xff]  ;;  %v809_v31 = vld [vmem:[%s1276_s0 + $0x80] sm:$0xff]  ;;  %v100_v57 = vsel %vm72_vm0, %v22_v8, 0.0 }
  0x18   :  { %1329 = vst [vmem:[#allocation35_spill] sm:$0xff] %v804_v24  ;;  %1330 = vst [vmem:[#allocation36_spill] sm:$0xff] %v809_v31  ;;  %v814_v35 = vld [vmem:[%s1276_s0 + $0x88] sm:$0xff]  ;;  %v850_v42 = vld [vmem:[%s1276_s0 + $0xb0] sm:$0xff]  ;;  %v112_v37 = vsel %vm72_vm0, %v834_v50, 0.0 }
  0x19   :  { %v97_v56 = vadd.f32 %v96_v30, %v95_v62  ;;  %1331 = vst [vmem:[#allocation37_spill] sm:$0xff] %v814_v35  ;;  %v206_v62 = vmul.f32 %v424_v0, %v424_v0  ;;  %v207_v30 = vmul.f32 %v429_v1, %v429_v1  ;;  %1332 = vst [vmem:[#allocation38_spill] sm:$0xff] %v824_v55  ;;  %v102_v0 = vsel %vm72_vm0, %v804_v24, 0.0  ;;  %v845_v43 = vld [vmem:[%s1276_s0 + $0xa8] sm:$0xff]  ;;  %v891_v63 = vld [vmem:[%s1276_s0 + $0xd8] sm:$0xff] }
  0x1a   :  { %1333 = vst [vmem:[#allocation39_spill] sm:$0xff] %v829_v51  ;;  %1334 = vst [vmem:[#allocation40_spill] sm:$0xff] %v834_v50  ;;  %v104_v1 = vsel %vm72_vm0, %v809_v31, 0.0  ;;  %v106_v44 = vsel %vm72_vm0, %v814_v35, 0.0  ;;  %v868_v35 = vld [vmem:[%s1276_s0 + $0xc0] sm:$0xff]  ;;  %v873_v31 = vld [vmem:[%s1276_s0 + $0xc8] sm:$0xff]  ;;  %v209_v24 = vmul.f32 %v445_v6, %v445_v6 }
  0x1b   :  { %v99_v49 = vadd.f32 %v98_v23, %v97_v56  ;;  %1335 = vst [vmem:[#allocation41_spill] sm:$0xff] %v845_v43  ;;  %1336 = vst [vmem:[#allocation42_spill] sm:$0xff] %v850_v42  ;;  %v855_v56 = vld [vmem:[%s1276_s0 + $0xb8] sm:$0xff]  ;;  %v108_v23 = vsel %vm72_vm0, %v824_v55, 0.0  ;;  %v878_v51 = vld [vmem:[%s1276_s0 + $0xd0] sm:$0xff]  ;;  %v114_v50 = vsel %vm72_vm0, %v845_v43, 0.0 }
  0x1c   :  { %1337 = vst [vmem:[#allocation43_spill] sm:$0xff] %v855_v56  ;;  %1338 = vst [vmem:[#allocation44_spill] sm:$0xff] %v868_v35  ;;  %v884_v2 = vsel %vm72_vm0, %v850_v42, 0.0  ;;  %v896_v25 = vld [vmem:[%s1276_s0 + $0xe0] sm:$0xff]  ;;  %v908_v6 = vsel %vm72_vm0, %v873_v31, 0.0  ;;  %v912_v42 = vsel %vm72_vm0, %v878_v51, 0.0 }
  0x1d   :  { %1339 = vst [vmem:[#allocation45_spill] sm:$0xff] %v873_v31  ;;  %1340 = vst [vmem:[#allocation46_spill] sm:$0xff] %v878_v51  ;;  %v101_v55 = vadd.f32 %v100_v57, %v99_v49  ;;  %v900_v49 = vsel %vm72_vm0, %v855_v56, 0.0  ;;  %v904_v57 = vsel %vm72_vm0, %v868_v35, 0.0  ;;  %v917_v43 = vld [vmem:[%s1276_s0 + $0xe8] sm:$0xff]  ;;  %v922_v56 = vld [vmem:[%s1276_s0 + $0xf0] sm:$0xff]  ;;  %v210_v51 = vmul.f32 %v452_v9, %v452_v9 }
  0x1e   :  { %1341 = vst [vmem:[#allocation47_spill] sm:$0xff] %v891_v63  ;;  %1342 = vst [vmem:[#allocation48_spill] sm:$0xff] %v896_v25  ;;  %v930_v31 = vsel %vm72_vm0, %v896_v25, 0.0  ;;  %v213_v25 = vmul.f32 %v471_v17, %v471_v17  ;;  %v214_v9 = vmul.f32 %v476_v18, %v476_v18  ;;  %v239_v17 = vmul.f32 %v502_v26, %v502_v26 }
  0x1f   :  { %1343 = vst [vmem:[#allocation49_spill] sm:$0xff] %v904_v57  ;;  %1344 = vst [vmem:[#allocation50_spill] sm:$0xff] %v908_v6  ;;  %v103_v35 = vadd.f32 %v102_v0, %v101_v55  ;;  %v926_v57 = vsel %vm72_vm0, %v891_v63, 0.0  ;;  %v940_v6 = vsel %vm72_vm0, %v922_v56, 0.0  ;;  %v211_v55 = vmul.f32 %v459_v12, %v459_v12 }
  0x20   :  { %1345 = vst [vmem:[#allocation51_spill] sm:$0xff] %v912_v42  ;;  %1346 = vst [vmem:[#allocation52_spill] sm:$0xff] %v917_v43  ;;  %v936_v42 = vsel %vm72_vm0, %v917_v43, 0.0  ;;  %v212_v0 = vmul.f32 %v466_v15, %v466_v15  ;;  %v215_v43 = vmul.f32 %v483_v20, %v483_v20  ;;  %v218_v12 = vmul.f32 %v687_v13, %v687_v13 }
  0x21   :  { %1347 = vst [vmem:[#allocation53_spill] sm:$0xff] %v922_v56  ;;  %1348 = vst [vmem:[#allocation54_spill] sm:$0xff] %v940_v6  ;;  %v105_v63 = vadd.f32 %v104_v1, %v103_v35  ;;  %v216_v56 = vmul.f32 %v488_v21, %v488_v21  ;;  %v217_v6 = vmul.f32 %v493_v22, %v493_v22 }
  0x22   :  { %v958_v15 = vmul.f32 %v21_v3, %v21_v3  ;;  %v960_v1 = vmul.f32 %v22_v8, %v22_v8  ;;  %v240_v18 = vmul.f32 %v507_v27, %v507_v27  ;;  %v241_v20 = vmul.f32 %v512_v28, %v512_v28 }
  0x23   :  { %v107_v35 = vadd.f32 %v106_v44, %v105_v63  ;;  %v242_v21 = vmul.f32 %v525_v32, %v525_v32  ;;  %v243_v22 = vmul.f32 %v530_v33, %v530_v33  ;;  %v244_v44 = vmul.f32 %v535_v34, %v535_v34 }
  0x24   :  { %v245_v3 = vmul.f32 %v552_v39, %v552_v39  ;;  %v246_v26 = vmul.f32 %v557_v40, %v557_v40  ;;  %v247_v27 = vmul.f32 %v562_v41, %v562_v41  ;;  %v248_v28 = vmul.f32 %v579_v45, %v579_v45 }
  0x25   :  { %v109_v63 = vadd.f32 %v108_v23, %v107_v35  ;;  %v249_v32 = vmul.f32 %v584_v46, %v584_v46  ;;  %v270_v33 = vsel %vm72_vm0, %v206_v62, 0.0  ;;  %v271_v34 = vsel %vm72_vm0, %v207_v30, 0.0 }
  0x26   :  { %v250_v39 = vmul.f32 %v589_v47, %v589_v47  ;;  %v272_v13 = vadd.f32 %v271_v34, %v270_v33  ;;  %v273_v40 = vsel %vm72_vm0, %v208_v36, 0.0  ;;  %v251_v41 = vmul.f32 %v606_v52, %v606_v52  ;;  %v1350_v33 = vld [vmem:[#allocation30_spill] sm:$0xff] }
  0x27   :  { %v111_v8 = vadd.f32 %v110_v38, %v109_v63  ;;  %v252_v45 = vmul.f32 %v611_v53, %v611_v53  ;;  %v253_v46 = vmul.f32 %v616_v54, %v616_v54  ;;  %v275_v62 = vsel %vm72_vm0, %v209_v24, 0.0  ;;  %v1349_v63 = vld [vmem:[#allocation26_spill] sm:$0xff] }
  0x28   :  { %v254_v38 = vmul.f32 %v633_v58, %v633_v58  ;;  %v255_v47 = vmul.f32 %v638_v59, %v638_v59  ;;  %v274_v30 = vadd.f32 %v273_v40, %v272_v13  ;;  %v256_v36 = vmul.f32 %v643_v60, %v643_v60  ;;  %v1351_v40 = vld [vmem:[#allocation49_spill] sm:$0xff] }
  0x29   :  { %v113_v23 = vadd.f32 %v112_v37, %v111_v8  ;;  %v257_v52 = vmul.f32 %v660_v4, %v660_v4  ;;  %v258_v53 = vmul.f32 %v665_v5, %v665_v5  ;;  %v277_v54 = vsel %vm72_vm0, %v210_v51, 0.0 }
  0x2a   :  { %v259_v37 = vmul.f32 %v670_v7, %v670_v7  ;;  %v260_v58 = vmul.f32 %v692_v14, %v692_v14  ;;  %v276_v59 = vadd.f32 %v275_v62, %v274_v30  ;;  %v261_v35 = vmul.f32 %v697_v16, %v697_v16 }
  0x2b   :  { %v115_v24 = vadd.f32 %v114_v50, %v113_v23  ;;  %v262_v60 = vmul.f32 %v702_v19, %v702_v19  ;;  %v263_v4 = vmul.f32 %v719_v48, %v719_v48  ;;  %v279_v5 = vsel %vm72_vm0, %v211_v55, 0.0 }
  0x2c   :  { %v264_v51 = vmul.f32 %v724_v29, %v724_v29  ;;  %v265_v7 = vmul.f32 %v729_v61, %v729_v61  ;;  %v278_v14 = vadd.f32 %v277_v54, %v276_v59  ;;  %v266_v16 = vmul.f32 %v746_v11, %v746_v11 }
  0x2d   :  { %v117_v50 = vadd.f32 %v884_v2, %v115_v24  ;;  %v267_v19 = vmul.f32 %v751_v10, %v751_v10  ;;  %v268_v48 = vmul.f32 %v1349_v63, %v1349_v63  ;;  %v281_v55 = vsel %vm72_vm0, %v212_v0, 0.0  ;;  %v1353_v24 = vld [vmem:[#allocation51_spill] sm:$0xff] }
  0x2e   :  { %v269_v29 = vmul.f32 %v1350_v33, %v1350_v33  ;;  %v280_v34 = vadd.f32 %v279_v5, %v278_v14  ;;  %v283_v61 = vsel %vm72_vm0, %v213_v25, 0.0  ;;  %v285_v8 = vsel %vm72_vm0, %v214_v9, 0.0  ;;  %v1355_v33 = vld [vmem:[#allocation54_spill] sm:$0xff] }
  0x2f   :  { %v119_v2 = vadd.f32 %v900_v49, %v117_v50  ;;  %v287_v11 = vsel %vm72_vm0, %v215_v43, 0.0  ;;  %v289_v13 = vsel %vm72_vm0, %v216_v56, 0.0  ;;  %v291_v10 = vsel %vm72_vm0, %v217_v6, 0.0  ;;  %v1352_v6 = vld [vmem:[#allocation50_spill] sm:$0xff] }
  0x30   :  { %v282_v23 = vadd.f32 %v281_v55, %v280_v34  ;;  %v293_v0 = vsel %vm72_vm0, %v218_v12, 0.0  ;;  %v1041_v49 = vsel %vm72_vm0, %v239_v17, 0.0  ;;  %v1044_v30 = vsel %vm72_vm0, %v240_v18, 0.0  ;;  %v1354_v55 = vld [vmem:[#allocation35_spill] sm:$0xff] }
  0x31   :  { %v121_v62 = vadd.f32 %v1351_v40, %v119_v2  ;;  %v1047_v25 = vsel %vm72_vm0, %v241_v20, 0.0  ;;  %v1050_v43 = vsel %vm72_vm0, %v242_v21, 0.0  ;;  %v1053_v56 = vsel %vm72_vm0, %v243_v22, 0.0 }
  0x32   :  { %v284_v54 = vadd.f32 %v283_v61, %v282_v23  ;;  %v1057_v12 = vsel %vm72_vm0, %v244_v44, 0.0  ;;  %v1060_v17 = vsel %vm72_vm0, %v245_v3, 0.0  ;;  %v1063_v18 = vsel %vm72_vm0, %v246_v26, 0.0  ;;  %v1356_v61 = vld [vmem:[#allocation36_spill] sm:$0xff] }
  0x33   :  { %v123_v9 = vadd.f32 %v1352_v6, %v121_v62  ;;  %v1066_v20 = vsel %vm72_vm0, %v247_v27, 0.0  ;;  %v1069_v21 = vsel %vm72_vm0, %v248_v28, 0.0  ;;  %v1072_v22 = vsel %vm72_vm0, %v249_v32, 0.0 }
  0x34   :  { %v286_v5 = vadd.f32 %v285_v8, %v284_v54  ;;  %v1076_v44 = vsel %vm72_vm0, %v250_v39, 0.0  ;;  %v1079_v3 = vsel %vm72_vm0, %v251_v41, 0.0  ;;  %v1082_v26 = vsel %vm72_vm0, %v252_v45, 0.0 }
  0x35   :  { %v125_v59 = vadd.f32 %v1353_v24, %v123_v9  ;;  %v1085_v27 = vsel %vm72_vm0, %v253_v46, 0.0  ;;  %v1088_v28 = vsel %vm72_vm0, %v254_v38, 0.0  ;;  %v1091_v32 = vsel %vm72_vm0, %v255_v47, 0.0  ;;  %v1358_v9 = vld [vmem:[#allocation38_spill] sm:$0xff] }
  0x36   :  { %v288_v14 = vadd.f32 %v287_v11, %v286_v5  ;;  %v1095_v39 = vsel %vm72_vm0, %v256_v36, 0.0  ;;  %v1098_v41 = vsel %vm72_vm0, %v257_v52, 0.0  ;;  %v1101_v45 = vsel %vm72_vm0, %v258_v53, 0.0  ;;  %v1359_v24 = vld [vmem:[#allocation2_spill] sm:$0xff] }
  0x37   :  { %v127_v50 = vadd.f32 %v926_v57, %v125_v59  ;;  %v1104_v46 = vsel %vm72_vm0, %v259_v37, 0.0  ;;  %v1107_v38 = vsel %vm72_vm0, %v260_v58, 0.0  ;;  %v1110_v47 = vsel %vm72_vm0, %v261_v35, 0.0 }
  0x38   :  { %v290_v63 = vadd.f32 %v289_v13, %v288_v14  ;;  %v1114_v36 = vsel %vm72_vm0, %v262_v60, 0.0  ;;  %v1117_v52 = vsel %vm72_vm0, %v263_v4, 0.0  ;;  %v1120_v53 = vsel %vm72_vm0, %v264_v51, 0.0 }
  0x39   :  { %v129_v57 = vadd.f32 %v930_v31, %v127_v50  ;;  %v1123_v37 = vsel %vm72_vm0, %v265_v7, 0.0  ;;  %v1126_v58 = vsel %vm72_vm0, %v266_v16, 0.0  ;;  %v1129_v35 = vsel %vm72_vm0, %v267_v19, 0.0  ;;  %v1134_v31 = vld [vmem:[%s1276_s0 + $0xf8] sm:$0xff]  ;;  %v1360_v50 = vld [vmem:[#allocation39_spill] sm:$0xff] }
  0x3a   :  { %v292_v4 = vadd.f32 %v291_v10, %v290_v63  ;;  %v1138_v51 = vsel %vm72_vm0, %v268_v48, 0.0  ;;  %v1141_v7 = vsel %vm72_vm0, %v269_v29, 0.0  ;;  %v134_v16 = vsel %vm72_vm0, %v1134_v31, 0.0 }
  0x3b   :  { %v131_v60 = vadd.f32 %v936_v42, %v129_v57  ;;  %v221_v19 = vmul.f32 %v1354_v55, %v1354_v55  ;;  %v295_v2 = vsel %vm72_vm0, %v958_v15, 0.0  ;;  %v1152_v42 = vld [vmem:[%s1276_s0 + $0x100] sm:$0xff]  ;;  %v222_v8 = vmul.f32 %v1356_v61, %v1356_v61  ;;  %v1357_v15 = vld [vmem:[#allocation37_spill] sm:$0xff]  ;;  %v1361_v57 = vld [vmem:[#allocation3_spill] sm:$0xff] }
  0x3c   :  { %v294_v34 = vadd.f32 %v293_v0, %v292_v4  ;;  %v136_v29 = vsel %vm72_vm0, %v1152_v42, 0.0  ;;  %v297_v11 = vsel %vm72_vm0, %v960_v1, 0.0  ;;  %v223_v40 = vmul.f32 %v1357_v15, %v1357_v15  ;;  %v1362_v4 = vld [vmem:[#allocation40_spill] sm:$0xff]  ;;  %v1365_v61 = vld [vmem:[#allocation5_spill] sm:$0xff] }
  0x3d   :  { %v133_v48 = vadd.f32 %v1355_v33, %v131_v60  ;;  %v299_v62 = vsel %vm72_vm0, %v221_v19, 0.0  ;;  %v224_v0 = vmul.f32 %v1358_v9, %v1358_v9  ;;  %v301_v54 = vsel %vm72_vm0, %v222_v8, 0.0  ;;  %v1363_v19 = vld [vmem:[#allocation4_spill] sm:$0xff] }
  0x3e   :  { %v296_v10 = vadd.f32 %v295_v2, %v294_v34  ;;  %v225_v1 = vmul.f32 %v1360_v50, %v1360_v50  ;;  %v303_v14 = vsel %vm72_vm0, %v223_v40, 0.0  ;;  %v1367_v40 = vld [vmem:[#allocation6_spill] sm:$0xff] }
  0x3f   :  { %v135_v13 = vadd.f32 %v134_v16, %v133_v48  ;;  %v226_v16 = vmul.f32 %v1362_v4, %v1362_v4  ;;  %v305_v55 = vsel %vm72_vm0, %v224_v0, 0.0  ;;  %v1364_v48 = vld [vmem:[#allocation41_spill] sm:$0xff] }
  0x40   :  { %v298_v6 = vadd.f32 %v297_v11, %v296_v10  ;;  %v227_v34 = vmul.f32 %v1364_v48, %v1364_v48 }
  0x41   :  { %v137_v23 = vadd.f32 %v136_v29, %v135_v13  ;;  %v307_v29 = vsel %vm72_vm0, %v225_v1, 0.0  ;;  %v1366_v13 = vld [vmem:[#allocation42_spill] sm:$0xff]  ;;  %v309_v15 = vsel %vm72_vm0, %v226_v16, 0.0 }
  0x42   :  { %v300_v5 = vadd.f32 %v299_v62, %v298_v6  ;;  %v228_v10 = vmul.f32 %v1366_v13, %v1366_v13  ;;  %v1368_v6 = vld [vmem:[#allocation43_spill] sm:$0xff]  ;;  %v311_v0 = vsel %vm72_vm0, %v227_v34, 0.0 }
  0x43   :  { %v139_v59 = vadd.f32 %v1359_v24, %v137_v23  ;;  %v229_v9 = vmul.f32 %v1368_v6, %v1368_v6 }
  0x44   :  { %v302_v60 = vadd.f32 %v301_v54, %v300_v5  ;;  %v1369_v54 = vld [vmem:[#allocation7_spill] sm:$0xff]  ;;  %v1370_v5 = vld [vmem:[#allocation44_spill] sm:$0xff]  ;;  %v313_v1 = vsel %vm72_vm0, %v228_v10, 0.0 }
  0x45   :  { %v141_v63 = vadd.f32 %v1361_v57, %v139_v59  ;;  %v230_v50 = vmul.f32 %v1370_v5, %v1370_v5  ;;  %v315_v16 = vsel %vm72_vm0, %v229_v9, 0.0 }
  0x46   :  { %v304_v33 = vadd.f32 %v303_v14, %v302_v60  ;;  %v1371_v14 = vld [vmem:[#allocation8_spill] sm:$0xff]  ;;  %v1372_v60 = vld [vmem:[#allocation45_spill] sm:$0xff] }
  0x47   :  { %v143_v2 = vadd.f32 %v1363_v19, %v141_v63  ;;  %v231_v4 = vmul.f32 %v1372_v60, %v1372_v60  ;;  %v317_v34 = vsel %vm72_vm0, %v230_v50, 0.0 }
  0x48   :  { %v306_v11 = vadd.f32 %v305_v55, %v304_v33  ;;  %v1373_v55 = vld [vmem:[#allocation9_spill] sm:$0xff]  ;;  %v1374_v33 = vld [vmem:[#allocation46_spill] sm:$0xff] }
  0x49   :  { %v145_v8 = vadd.f32 %v1365_v61, %v143_v2  ;;  %v232_v48 = vmul.f32 %v1374_v33, %v1374_v33  ;;  %v319_v10 = vsel %vm72_vm0, %v231_v4, 0.0 }
  0x4a   :  { %v308_v23 = vadd.f32 %v307_v29, %v306_v11  ;;  %v1375_v29 = vld [vmem:[#allocation10_spill] sm:$0xff]  ;;  %v1376_v11 = vld [vmem:[#allocation47_spill] sm:$0xff] }
  0x4b   :  { %v147_v62 = vadd.f32 %v1367_v40, %v145_v8  ;;  %v233_v13 = vmul.f32 %v1376_v11, %v1376_v11  ;;  %v321_v9 = vsel %vm72_vm0, %v232_v48, 0.0  ;;  %v1384_v48 = vld [vmem:[#allocation15_spill] sm:$0xff]  ;;  %v1385_v11 = vld [vmem:[#allocation16_spill] sm:$0xff] }
  0x4c   :  { %v310_v59 = vadd.f32 %v309_v15, %v308_v23  ;;  %v1377_v15 = vld [vmem:[#allocation11_spill] sm:$0xff]  ;;  %v1378_v23 = vld [vmem:[#allocation48_spill] sm:$0xff] }
  0x4d   :  { %v149_v24 = vadd.f32 %v1369_v54, %v147_v62  ;;  %v234_v6 = vmul.f32 %v1378_v23, %v1378_v23  ;;  %v323_v50 = vsel %vm72_vm0, %v233_v13, 0.0 }
  0x4e   :  { %v312_v63 = vadd.f32 %v311_v0, %v310_v59  ;;  %v1379_v0 = vld [vmem:[#allocation12_spill] sm:$0xff] }
  0x4f   :  { %v151_v57 = vadd.f32 %v1371_v14, %v149_v24  ;;  %v1380_v59 = vld [vmem:[#allocation52_spill] sm:$0xff]  ;;  %v325_v4 = vsel %vm72_vm0, %v234_v6, 0.0  ;;  %v1387_v6 = vld [vmem:[#allocation18_spill] sm:$0xff] }
  0x50   :  { %v314_v2 = vadd.f32 %v313_v1, %v312_v63  ;;  %v235_v5 = vmul.f32 %v1380_v59, %v1380_v59  ;;  %v1381_v1 = vld [vmem:[#allocation13_spill] sm:$0xff] }
  0x51   :  { %v153_v19 = vadd.f32 %v1373_v55, %v151_v57  ;;  %v1382_v63 = vld [vmem:[#allocation53_spill] sm:$0xff] }
  0x52   :  { %v316_v8 = vadd.f32 %v315_v16, %v314_v2  ;;  %v236_v60 = vmul.f32 %v1382_v63, %v1382_v63  ;;  %v1383_v16 = vld [vmem:[#allocation14_spill] sm:$0xff]  ;;  %v237_v2 = vmul.f32 %v1134_v31, %v1134_v31  ;;  %v327_v33 = vsel %vm72_vm0, %v235_v5, 0.0  ;;  %v1389_v5 = vld [vmem:[#allocation20_spill] sm:$0xff] }
  0x53   :  { %v155_v61 = vadd.f32 %v1375_v29, %v153_v19  ;;  %v1391_v63 = vld [vmem:[#allocation22_spill] sm:$0xff] }
  0x54   :  { %v318_v62 = vadd.f32 %v317_v34, %v316_v8  ;;  %v329_v8 = vsel %vm72_vm0, %v236_v60, 0.0 }
  0x55   :  { %v157_v40 = vadd.f32 %v1377_v15, %v155_v61  ;;  %v238_v61 = vmul.f32 %v1152_v42, %v1152_v42  ;;  %v331_v15 = vsel %vm72_vm0, %v237_v2, 0.0  ;;  %v1393_v2 = vld [vmem:[#allocation24_spill] sm:$0xff] }
  0x56   :  { %v320_v24 = vadd.f32 %v319_v10, %v318_v62 }
  0x57   :  { %v159_v54 = vadd.f32 %v1379_v0, %v157_v40  ;;  %v1386_v40 = vld [vmem:[#allocation17_spill] sm:$0xff]  ;;  %v333_v31 = vsel %vm72_vm0, %v238_v61, 0.0  ;;  %v1395_v61 = vld [vmem:[#allocation27_spill] sm:$0xff] }
  0x58   :  { %v322_v57 = vadd.f32 %v321_v9, %v320_v24 }
  0x59   :  { %v161_v14 = vadd.f32 %v1381_v1, %v159_v54  ;;  %v1388_v54 = vld [vmem:[#allocation19_spill] sm:$0xff]  ;;  %v1390_v1 = vld [vmem:[#allocation21_spill] sm:$0xff] }
  0x5a   :  { %v324_v19 = vadd.f32 %v323_v50, %v322_v57 }
  0x5b   :  { %v163_v55 = vadd.f32 %v1383_v16, %v161_v14  ;;  %v1392_v16 = vld [vmem:[#allocation23_spill] sm:$0xff] }
  0x5c   :  { %v326_v29 = vadd.f32 %v325_v4, %v324_v19 }
  0x5d   :  { %v165_v34 = vadd.f32 %v1384_v48, %v163_v55 }
  0x5e   :  { %v328_v10 = vadd.f32 %v327_v33, %v326_v29 }
  0x5f   :  { %v167_v13 = vadd.f32 %v1385_v11, %v165_v34  ;;  %v1394_v34 = vld [vmem:[#allocation25_spill] sm:$0xff]  ;;  %v1396_v11 = vld [vmem:[#allocation28_spill] sm:$0xff] }
  0x60   :  { %v330_v23 = vadd.f32 %v329_v8, %v328_v10  ;;  %v1397_v10 = vld [vmem:[#allocation29_spill] sm:$0xff] }
  0x61   :  { %v169_v62 = vadd.f32 %v1386_v40, %v167_v13  ;;  %v1398_v40 = vld [vmem:[#allocation31_spill] sm:$0xff] }
  0x62   :  { %v332_v0 = vadd.f32 %v331_v15, %v330_v23  ;;  %v1399_v23 = vld [vmem:[#allocation32_spill] sm:$0xff] }
  0x63   :  { %v171_v9 = vadd.f32 %v1387_v6, %v169_v62  ;;  %v1400_v6 = vld [vmem:[#allocation33_spill] sm:$0xff] }
  0x64   :  { %v334_v59 = vadd.f32 %v333_v31, %v332_v0  ;;  %v1401_v0 = vld [vmem:[#allocation34_spill] sm:$0xff] }
  0x65   :  { %v173_v24 = vadd.f32 %v1388_v54, %v171_v9 }
  0x66   :  { %v336_v50 = vadd.f32 %v1041_v49, %v334_v59 }
  0x67   :  { %v175_v42 = vadd.f32 %v1389_v5, %v173_v24 }
  0x68   :  { %v338_v57 = vadd.f32 %v1044_v30, %v336_v50 }
  0x69   :  { %v177_v14 = vadd.f32 %v1390_v1, %v175_v42 }
  0x6a   :  { %v340_v4 = vadd.f32 %v1047_v25, %v338_v57 }
  0x6b   :  { %v179_v60 = vadd.f32 %v1391_v63, %v177_v14 }
  0x6c   :  { %v342_v19 = vadd.f32 %v1050_v43, %v340_v4 }
  0x6d   :  { %v181_v55 = vadd.f32 %v1392_v16, %v179_v60 }
  0x6e   :  { %v344_v48 = vadd.f32 %v1053_v56, %v342_v19 }
  0x6f   :  { %v183_v33 = vadd.f32 %v1393_v2, %v181_v55 }
  0x70   :  { %v346_v49 = vadd.f32 %v1057_v12, %v344_v48 }
  0x71   :  { %v185_v29 = vadd.f32 %v1394_v34, %v183_v33 }
  0x72   :  { %v348_v30 = vadd.f32 %v1060_v17, %v346_v49 }
  0x73   :  { %v187_v8 = vadd.f32 %v1395_v61, %v185_v29 }
  0x74   :  { %v350_v25 = vadd.f32 %v1063_v18, %v348_v30 }
  0x75   :  { %v189_v13 = vadd.f32 %v1396_v11, %v187_v8 }
  0x76   :  { %v352_v43 = vadd.f32 %v1066_v20, %v350_v25 }
  0x77   :  { %v191_v15 = vadd.f32 %v1397_v10, %v189_v13 }
  0x78   :  { %v354_v56 = vadd.f32 %v1069_v21, %v352_v43 }
  0x79   :  { %v193_v62 = vadd.f32 %v1398_v40, %v191_v15 }
  0x7a   :  { %v356_v12 = vadd.f32 %v1072_v22, %v354_v56 }
  0x7b   :  { %v195_v31 = vadd.f32 %v1399_v23, %v193_v62 }
  0x7c   :  { %v358_v17 = vadd.f32 %v1076_v44, %v356_v12 }
  0x7d   :  { %v197_v9 = vadd.f32 %v1400_v6, %v195_v31 }
  0x7e   :  { %v360_v18 = vadd.f32 %v1079_v3, %v358_v17 }
  0x7f   :  { %v199_v54 = vadd.f32 %v1401_v0, %v197_v9 }
  0x80   :  { %v362_v24 = vadd.f32 %v1082_v26, %v360_v18 }
  0x81   :  { %v200_v1 = vrot.slane %v199_v54, 4 }
  0x82   :  { %v364_v20 = vadd.f32 %v1085_v27, %v362_v24 }
  0x84   :  { %v366_v59 = vadd.f32 %v1088_v28, %v364_v20 }
  0x86   :  { %v368_v21 = vadd.f32 %v1091_v32, %v366_v59 }
  0x88   :  { %v370_v5 = vadd.f32 %v1095_v39, %v368_v21  ;;  %v201_v39 = vadd.f32 %v200_v1, %v199_v54 }
  0x8a   :  { %v372_v22 = vadd.f32 %v1098_v41, %v370_v5  ;;  %v202_v14 = vrot.slane %v201_v39, 2 }
  0x8c   :  { %v374_v42 = vadd.f32 %v1101_v45, %v372_v22 }
  0x8e   :  { %v376_v44 = vadd.f32 %v1104_v46, %v374_v42 }
  0x90   :  { %v378_v50 = vadd.f32 %v1107_v38, %v376_v44 }
  0x92   :  { %v380_v3 = vadd.f32 %v1110_v47, %v378_v50  ;;  %v203_v47 = vadd.f32 %v202_v14, %v201_v39 }
  0x94   :  { %v382_v26 = vadd.f32 %v1114_v36, %v380_v3  ;;  %v204_v63 = vrot.slane %v203_v47, 1 }
  0x96   :  { %v384_v27 = vadd.f32 %v1117_v52, %v382_v26  ;;  %v205_v4 = vadd.f32 %v204_v63, %v203_v47 }
  0x98   :  { %v386_v28 = vadd.f32 %v1120_v53, %v384_v27 }
  0x9a   :  { %v388_v32 = vadd.f32 %v1123_v37, %v386_v28 }
  0x9c   :  { %v390_v41 = vadd.f32 %v1126_v58, %v388_v32 }
  0x9e   :  { %v392_v45 = vadd.f32 %v1129_v35, %v390_v41 }
  0xa0   :  { %v394_v46 = vadd.f32 %v1138_v51, %v392_v45 }
  0xa2   :  { %v396_v38 = vadd.f32 %v1141_v7, %v394_v46 }
  0xa4   :  { %v397_v57 = vrot.slane %v396_v38, 4 }
  0xa6   :  { %v398_v36 = vadd.f32 %v397_v57, %v396_v38 }
  0xa8   :  { %v399_v52 = vrot.slane %v398_v36, 2 }
  0xaa   :  { %v400_v60 = vadd.f32 %v399_v52, %v398_v36 }
  0xac   :  { %v401_v53 = vrot.slane %v400_v60, 1 }
  0xae   :  { %v402_v37 = vadd.f32 %v401_v53, %v400_v60 }
  0xb0   :  { %v404_v16 = vsel %vm403_vm1, %v205_v4, %v402_v37 }
  0xb1   :  { %406 = vst.msk [vmem:[%s1277_s1] sm:$0x3] %vm405_vm2, %v404_v16 }

// kernel: preact_bottleneck_forward.7
= control target key start
LH: loop header
LB: loop body
LE: loop exit
PB: predicated region body
PF: predicated region fallthrough
CT: control target
= control target key end

     0   :  { %vm418_vm0 = vcmask 1041408   ;;  %vm321_vm1 = vcmask 31744   ;;  %vm711_vm2 = vcmask 130048   ;;  %s1563_s3 = inlined_call_operand.vmem [shape: bf16[4,16], index: 3, kind: input, shape index: {}]   ;;  %s1564_s0 = inlined_call_operand.vmem [shape: f32[512,4], index: 0, kind: input, shape index: {}]   ;;  %s1565_s1 = inlined_call_operand.vmem [shape: f32[1,4], index: 1, kind: input, shape index: {}]   ;;  %s1566_s2 = inlined_call_operand.vmem [shape: f32[1,4], index: 2, kind: input, shape index: {}]   ;;  %s1567_s4 = inlined_call_operand.vmem [shape: f32[512,16], index: 4, kind: output, shape index: {}]  }
   0x1   :  { %v320_v0 = vld [vmem:[%s1563_s3] sm:$0x3]  ;;  %v19_v2 = vld [vmem:[%s1564_s0 + $0x8] sm:$0xff]  ;;  %v20_v11 = vld [vmem:[%s1564_s0 + $0x10] sm:$0xff] }
   0x2   :  { %v18_v1 = vld [vmem:[%s1564_s0] sm:$0xff]  ;;  %915 = vmatprep.subr.msk.bf16.mxu0 %vm418_vm0, %v320_v0  ;;  %916 = vmatprep.subr.msk.bf16.mxu1 %vm418_vm0, %v320_v0  ;;  %v420_v3 = vsel %vm418_vm0, %v320_v0, 0  ;;  %v51_v9 = vld [vmem:[%s1564_s0 + $0x108] sm:$0xff]  ;;  %v21_v12 = vld [vmem:[%s1564_s0 + $0x18] sm:$0xff] }
   0x3   :  { %v954_v4 = vld [vmem:[%s1565_s1] ss:$0 sm:$0xff]  ;;  %848 = vmatpush3.bf16.msra.mxu0 %v420_v3  ;;  %914 = vmatpush3.bf16.msra.mxu1 %v420_v3  ;;  %v52_v16 = vld [vmem:[%s1564_s0 + $0x110] sm:$0xff]  ;;  %v53_v17 = vld [vmem:[%s1564_s0 + $0x118] sm:$0xff] }
   0x4   :  { %v959_v5 = vld [vmem:[%s1566_s2] ss:$0 sm:$0xff]  ;;  %v89_v7 = vmul.f32 %v954_v4, %v18_v1  ;;  %v90_v8 = vmul.f32 %v954_v4, %v19_v2  ;;  %v122_v13 = vmul.f32 %v954_v4, %v51_v9  ;;  %v91_v14 = vmul.f32 %v954_v4, %v20_v11  ;;  %v23_v27 = vld [vmem:[%s1564_s0 + $0x28] sm:$0xff]  ;;  %v24_v38 = vld [vmem:[%s1564_s0 + $0x30] sm:$0xff] }
   0x5   :  { %v50_v6 = vld [vmem:[%s1564_s0 + $0x100] sm:$0xff]  ;;  %v92_v15 = vmul.f32 %v954_v4, %v21_v12  ;;  %v123_v21 = vmul.f32 %v954_v4, %v52_v16  ;;  %v124_v25 = vmul.f32 %v954_v4, %v53_v17  ;;  %v55_v37 = vld [vmem:[%s1564_s0 + $0x128] sm:$0xff]  ;;  %v94_v42 = vmul.f32 %v954_v4, %v23_v27  ;;  %v25_v43 = vld [vmem:[%s1564_s0 + $0x38] sm:$0xff] }
   0x6   :  { %v121_v10 = vmul.f32 %v954_v4, %v50_v6  ;;  %v160_v18 = vadd.f32 %v959_v5, %v89_v7  ;;  %v161_v19 = vadd.f32 %v959_v5, %v90_v8  ;;  %v193_v22 = vadd.f32 %v959_v5, %v122_v13  ;;  %v22_v26 = vld [vmem:[%s1564_s0 + $0x20] sm:$0xff]  ;;  %v56_v52 = vld [vmem:[%s1564_s0 + $0x130] sm:$0xff]  ;;  %v57_v53 = vld [vmem:[%s1564_s0 + $0x138] sm:$0xff] }
   0x7   :  { %v162_v23 = vadd.f32 %v959_v5, %v91_v14  ;;  %v163_v24 = vadd.f32 %v959_v5, %v92_v15  ;;  %v194_v31 = vadd.f32 %v959_v5, %v123_v21  ;;  %v54_v32 = vld [vmem:[%s1564_s0 + $0x120] sm:$0xff]  ;;  %v195_v36 = vadd.f32 %v959_v5, %v124_v25  ;;  %v27_v62 = vld [vmem:[%s1564_s0 + $0x48] sm:$0xff]  ;;  %v28_v15 = vld [vmem:[%s1564_s0 + $0x50] sm:$0xff] }
   0x8   :  { %v192_v20 = vadd.f32 %v959_v5, %v121_v10  ;;  %v224_v28 = vmax.f32 %v160_v18, 0.0  ;;  %v225_v29 = vmax.f32 %v161_v19, 0.0  ;;  %v257_v33 = vmax.f32 %v193_v22, 0.0  ;;  %v26_v57 = vld [vmem:[%s1564_s0 + $0x40] sm:$0xff]  ;;  %v59_v6 = vld [vmem:[%s1564_s0 + $0x148] sm:$0xff]  ;;  %v60_v21 = vld [vmem:[%s1564_s0 + $0x150] sm:$0xff] }
   0x9   :  { %v226_v34 = vmax.f32 %v162_v23, 0.0  ;;  %v227_v35 = vmax.f32 %v163_v24, 0.0  ;;  %v258_v40 = vmax.f32 %v194_v31, 0.0  ;;  %v93_v41 = vmul.f32 %v954_v4, %v22_v26  ;;  %v58_v3 = vld [vmem:[%s1564_s0 + $0x140] sm:$0xff]  ;;  %v61_v26 = vld [vmem:[%s1564_s0 + $0x158] sm:$0xff] }
   0xa   :  { %v256_v30 = vmax.f32 %v192_v20, 0.0  ;;  %v288_v39 = vpack.c.bf16 %v225_v29, %v224_v28  ;;  %v259_v46 = vmax.f32 %v195_v36, 0.0  ;;  %v125_v47 = vmul.f32 %v954_v4, %v54_v32  ;;  %v29_v20 = vld [vmem:[%s1564_s0 + $0x58] sm:$0xff]  ;;  %v30_v31 = vld [vmem:[%s1564_s0 + $0x60] sm:$0xff]  ;;  %v31_v36 = vld [vmem:[%s1564_s0 + $0x68] sm:$0xff] }
   0xb   :  { %v289_v45 = vpack.c.bf16 %v227_v35, %v226_v34  ;;  %v164_v48 = vadd.f32 %v959_v5, %v93_v41  ;;  %v165_v49 = vadd.f32 %v959_v5, %v94_v42  ;;  %v126_v50 = vmul.f32 %v954_v4, %v55_v37  ;;  %v62_v41 = vld [vmem:[%s1564_s0 + $0x160] sm:$0xff] }
   0xc   :  { %v304_v44 = vpack.c.bf16 %v257_v33, %v256_v30  ;;  %849 = vmatprep.mubr.msk.bf16.mxu0 %vm321_vm1, %v288_v39  ;;  %v95_v51 = vmul.f32 %v954_v4, %v24_v38  ;;  %v305_v54 = vpack.c.bf16 %v259_v46, %v258_v40  ;;  %v196_v55 = vadd.f32 %v959_v5, %v125_v47  ;;  %v63_v46 = vld [vmem:[%s1564_s0 + $0x168] sm:$0xff]  ;;  %v32_v47 = vld [vmem:[%s1564_s0 + $0x70] sm:$0xff] }
   0xd   :  { %850 = vmatmul.mubr.msk.bf16.vlgmr.msra.gmra.mrb[0].mxu0 %vm321_vm1, %v289_v45  ;;  %v96_v56 = vmul.f32 %v954_v4, %v25_v43  ;;  %v228_v58 = vmax.f32 %v164_v48, 0.0  ;;  %v229_v59 = vmax.f32 %v165_v49, 0.0  ;;  %v197_v60 = vadd.f32 %v959_v5, %v126_v50 }
   0xe   :  { %881 = vmatprep.mubr.msk.bf16.mxu1 %vm321_vm1, %v304_v44  ;;  %v166_v61 = vadd.f32 %v959_v5, %v95_v51  ;;  %v260_v63 = vmax.f32 %v196_v55, 0.0  ;;  %v127_v1 = vmul.f32 %v954_v4, %v56_v52  ;;  %v128_v2 = vmul.f32 %v954_v4, %v57_v53  ;;  %v33_v52 = vld [vmem:[%s1564_s0 + $0x78] sm:$0xff] }
   0xf   :  { %882 = vmatmul.mubr.msk.bf16.vlgmr.msra.gmra.mrb[0].mxu1 %vm321_vm1, %v305_v54  ;;  %v167_v0 = vadd.f32 %v959_v5, %v96_v56  ;;  %v290_v7 = vpack.c.bf16 %v229_v59, %v228_v58  ;;  %v261_v8 = vmax.f32 %v197_v60, 0.0  ;;  %v97_v10 = vmul.f32 %v954_v4, %v26_v57 }
  0x10   :  { %v230_v9 = vmax.f32 %v166_v61, 0.0  ;;  %v198_v12 = vadd.f32 %v959_v5, %v127_v1  ;;  %v199_v13 = vadd.f32 %v959_v5, %v128_v2  ;;  %v98_v14 = vmul.f32 %v954_v4, %v27_v62  ;;  %v64_v61 = vld [vmem:[%s1564_s0 + $0x170] sm:$0xff]  ;;  %v65_v62 = vld [vmem:[%s1564_s0 + $0x178] sm:$0xff] }
  0x11   :  { %v231_v11 = vmax.f32 %v167_v0, 0.0  ;;  %853 = vmatprep.mubr.msk.bf16.mxu0 %vm321_vm1, %v290_v7  ;;  %v306_v16 = vpack.c.bf16 %v261_v8, %v260_v63  ;;  %v168_v17 = vadd.f32 %v959_v5, %v97_v10  ;;  %v129_v18 = vmul.f32 %v954_v4, %v58_v3  ;;  %v34_v3 = vld [vmem:[%s1564_s0 + $0x80] sm:$0xff]  ;;  %v35_v10 = vld [vmem:[%s1564_s0 + $0x88] sm:$0xff] }
  0x12   :  { %v130_v19 = vmul.f32 %v954_v4, %v59_v6  ;;  %v262_v23 = vmax.f32 %v198_v12, 0.0  ;;  %v263_v24 = vmax.f32 %v199_v13, 0.0  ;;  %v169_v25 = vadd.f32 %v959_v5, %v98_v14 }
  0x13   :  { %v291_v22 = vpack.c.bf16 %v231_v11, %v230_v9  ;;  %885 = vmatprep.mubr.msk.bf16.mxu1 %vm321_vm1, %v306_v16  ;;  %v232_v27 = vmax.f32 %v168_v17, 0.0  ;;  %v200_v28 = vadd.f32 %v959_v5, %v129_v18  ;;  %v99_v30 = vmul.f32 %v954_v4, %v28_v15  ;;  %v66_v15 = vld [vmem:[%s1564_s0 + $0x180] sm:$0xff]  ;;  %v67_v16 = vld [vmem:[%s1564_s0 + $0x188] sm:$0xff] }
  0x14   :  { %v201_v29 = vadd.f32 %v959_v5, %v130_v19  ;;  %v307_v32 = vpack.c.bf16 %v263_v24, %v262_v23  ;;  %v233_v33 = vmax.f32 %v169_v25, 0.0  ;;  %v100_v34 = vmul.f32 %v954_v4, %v29_v20  ;;  %v36_v25 = vld [vmem:[%s1564_s0 + $0x90] sm:$0xff] }
  0x15   :  { %854 = vmatmul.mubr.msk.bf16.gmra.mrb[4].mxu0 %vm321_vm1, %v291_v22  ;;  %v131_v35 = vmul.f32 %v954_v4, %v60_v21  ;;  %v264_v37 = vmax.f32 %v200_v28, 0.0  ;;  %v170_v39 = vadd.f32 %v959_v5, %v99_v30  ;;  %v132_v40 = vmul.f32 %v954_v4, %v61_v26  ;;  %v37_v30 = vld [vmem:[%s1564_s0 + $0x98] sm:$0xff] }
  0x16   :  { %v265_v38 = vmax.f32 %v201_v29, 0.0  ;;  %v292_v42 = vpack.c.bf16 %v233_v33, %v232_v27  ;;  %v171_v43 = vadd.f32 %v959_v5, %v100_v34  ;;  %v101_v45 = vmul.f32 %v954_v4, %v30_v31  ;;  %v68_v31 = vld [vmem:[%s1564_s0 + $0x190] sm:$0xff] }
  0x17   :  { %886 = vmatmul.mubr.msk.bf16.gmra.mrb[4].mxu1 %vm321_vm1, %v307_v32  ;;  %v202_v44 = vadd.f32 %v959_v5, %v131_v35  ;;  %v234_v49 = vmax.f32 %v170_v39, 0.0  ;;  %v203_v50 = vadd.f32 %v959_v5, %v132_v40  ;;  %v102_v51 = vmul.f32 %v954_v4, %v31_v36  ;;  %v69_v36 = vld [vmem:[%s1564_s0 + $0x198] sm:$0xff] }
  0x18   :  { %v308_v48 = vpack.c.bf16 %v265_v38, %v264_v37  ;;  %857 = vmatprep.mubr.msk.bf16.mxu0 %vm321_vm1, %v292_v42  ;;  %v235_v53 = vmax.f32 %v171_v43, 0.0  ;;  %v172_v55 = vadd.f32 %v959_v5, %v101_v45  ;;  %v133_v56 = vmul.f32 %v954_v4, %v62_v41  ;;  %v38_v41 = vld [vmem:[%s1564_s0 + $0xa0] sm:$0xff] }
  0x19   :  { %v266_v54 = vmax.f32 %v202_v44, 0.0  ;;  %v267_v57 = vmax.f32 %v203_v50, 0.0  ;;  %v173_v58 = vadd.f32 %v959_v5, %v102_v51  ;;  %v134_v59 = vmul.f32 %v954_v4, %v63_v46  ;;  %v39_v46 = vld [vmem:[%s1564_s0 + $0xa8] sm:$0xff]  ;;  %v70_v51 = vld [vmem:[%s1564_s0 + $0x1a0] sm:$0xff] }
  0x1a   :  { %889 = vmatprep.mubr.msk.bf16.mxu1 %vm321_vm1, %v308_v48  ;;  %v103_v60 = vmul.f32 %v954_v4, %v32_v47  ;;  %v293_v63 = vpack.c.bf16 %v235_v53, %v234_v49  ;;  %v236_v0 = vmax.f32 %v172_v55, 0.0  ;;  %v204_v1 = vadd.f32 %v959_v5, %v133_v56  ;;  %v71_v56 = vld [vmem:[%s1564_s0 + $0x1a8] sm:$0xff] }
  0x1b   :  { %v104_v2 = vmul.f32 %v954_v4, %v33_v52  ;;  %v309_v6 = vpack.c.bf16 %v267_v57, %v266_v54  ;;  %v237_v7 = vmax.f32 %v173_v58, 0.0  ;;  %v205_v8 = vadd.f32 %v959_v5, %v134_v59  ;;  %v40_v57 = vld [vmem:[%s1564_s0 + $0xb0] sm:$0xff] }
  0x1c   :  { %v174_v9 = vadd.f32 %v959_v5, %v103_v60  ;;  %v268_v11 = vmax.f32 %v204_v1, 0.0  ;;  %v135_v13 = vmul.f32 %v954_v4, %v64_v61  ;;  %v136_v14 = vmul.f32 %v954_v4, %v65_v62  ;;  %v41_v62 = vld [vmem:[%s1564_s0 + $0xb8] sm:$0xff] }
  0x1d   :  { %858 = vmatmul.mubr.msk.bf16.gmra.mrb[8].mxu0 %vm321_vm1, %v293_v63  ;;  %v175_v12 = vadd.f32 %v959_v5, %v104_v2  ;;  %v294_v17 = vpack.c.bf16 %v237_v7, %v236_v0  ;;  %v269_v18 = vmax.f32 %v205_v8, 0.0  ;;  %v105_v20 = vmul.f32 %v954_v4, %v34_v3 }
  0x1e   :  { %v238_v19 = vmax.f32 %v174_v9, 0.0  ;;  %v206_v22 = vadd.f32 %v959_v5, %v135_v13  ;;  %v207_v23 = vadd.f32 %v959_v5, %v136_v14  ;;  %v106_v24 = vmul.f32 %v954_v4, %v35_v10  ;;  %v72_v9 = vld [vmem:[%s1564_s0 + $0x1b0] sm:$0xff]  ;;  %v73_v10 = vld [vmem:[%s1564_s0 + $0x1b8] sm:$0xff] }
  0x1f   :  { %890 = vmatmul.mubr.msk.bf16.gmra.mrb[8].mxu1 %vm321_vm1, %v309_v6  ;;  %v239_v21 = vmax.f32 %v175_v12, 0.0  ;;  %861 = vmatprep.mubr.msk.bf16.mxu0 %vm321_vm1, %v294_v17  ;;  %v310_v26 = vpack.c.bf16 %v269_v18, %v268_v11  ;;  %v176_v27 = vadd.f32 %v959_v5, %v105_v20  ;;  %v137_v28 = vmul.f32 %v954_v4, %v66_v15  ;;  %v42_v15 = vld [vmem:[%s1564_s0 + $0xc0] sm:$0xff]  ;;  %v43_v20 = vld [vmem:[%s1564_s0 + $0xc8] sm:$0xff] }
  0x20   :  { %v138_v29 = vmul.f32 %v954_v4, %v67_v16  ;;  %v270_v33 = vmax.f32 %v206_v22, 0.0  ;;  %v271_v34 = vmax.f32 %v207_v23, 0.0  ;;  %v177_v35 = vadd.f32 %v959_v5, %v106_v24 }
  0x21   :  { %v295_v32 = vpack.c.bf16 %v239_v21, %v238_v19  ;;  %893 = vmatprep.mubr.msk.bf16.mxu1 %vm321_vm1, %v310_v26  ;;  %v240_v37 = vmax.f32 %v176_v27, 0.0  ;;  %v208_v38 = vadd.f32 %v959_v5, %v137_v28  ;;  %v107_v40 = vmul.f32 %v954_v4, %v36_v25  ;;  %v74_v25 = vld [vmem:[%s1564_s0 + $0x1c0] sm:$0xff]  ;;  %v75_v26 = vld [vmem:[%s1564_s0 + $0x1c8] sm:$0xff] }
  0x22   :  { %v209_v39 = vadd.f32 %v959_v5, %v138_v29  ;;  %v311_v42 = vpack.c.bf16 %v271_v34, %v270_v33  ;;  %v241_v43 = vmax.f32 %v177_v35, 0.0  ;;  %v108_v44 = vmul.f32 %v954_v4, %v37_v30  ;;  %v44_v35 = vld [vmem:[%s1564_s0 + $0xd0] sm:$0xff] }
  0x23   :  { %v139_v45 = vmul.f32 %v954_v4, %v68_v31  ;;  %v272_v47 = vmax.f32 %v208_v38, 0.0  ;;  %v178_v49 = vadd.f32 %v959_v5, %v107_v40  ;;  %v140_v50 = vmul.f32 %v954_v4, %v69_v36  ;;  %v45_v40 = vld [vmem:[%s1564_s0 + $0xd8] sm:$0xff] }
  0x24   :  { %v273_v48 = vmax.f32 %v209_v39, 0.0  ;;  %v296_v52 = vpack.c.bf16 %v241_v43, %v240_v37  ;;  %v179_v53 = vadd.f32 %v959_v5, %v108_v44  ;;  %v109_v55 = vmul.f32 %v954_v4, %v38_v41  ;;  %v76_v41 = vld [vmem:[%s1564_s0 + $0x1d0] sm:$0xff] }
  0x25   :  { %862 = vmatmul.mubr.msk.bf16.gmra.mrb[12].mxu0 %vm321_vm1, %v295_v32  ;;  %v210_v54 = vadd.f32 %v959_v5, %v139_v45  ;;  %v242_v59 = vmax.f32 %v178_v49, 0.0  ;;  %v211_v60 = vadd.f32 %v959_v5, %v140_v50  ;;  %v110_v61 = vmul.f32 %v954_v4, %v39_v46  ;;  %v77_v46 = vld [vmem:[%s1564_s0 + $0x1d8] sm:$0xff] }
  0x26   :  { %v312_v58 = vpack.c.bf16 %v273_v48, %v272_v47  ;;  %865 = vmatprep.mubr.msk.bf16.mxu0 %vm321_vm1, %v296_v52  ;;  %v243_v63 = vmax.f32 %v179_v53, 0.0  ;;  %v180_v1 = vadd.f32 %v959_v5, %v109_v55  ;;  %v141_v2 = vmul.f32 %v954_v4, %v70_v51  ;;  %v46_v51 = vld [vmem:[%s1564_s0 + $0xe0] sm:$0xff] }
  0x27   :  { %894 = vmatmul.mubr.msk.bf16.gmra.mrb[12].mxu1 %vm321_vm1, %v311_v42  ;;  %v274_v0 = vmax.f32 %v210_v54, 0.0  ;;  %v275_v3 = vmax.f32 %v211_v60, 0.0  ;;  %v181_v6 = vadd.f32 %v959_v5, %v110_v61  ;;  %v142_v7 = vmul.f32 %v954_v4, %v71_v56  ;;  %v47_v56 = vld [vmem:[%s1564_s0 + $0xe8] sm:$0xff]  ;;  %v78_v61 = vld [vmem:[%s1564_s0 + $0x1e0] sm:$0xff] }
  0x28   :  { %897 = vmatprep.mubr.msk.bf16.mxu1 %vm321_vm1, %v312_v58  ;;  %v111_v8 = vmul.f32 %v954_v4, %v40_v57  ;;  %v297_v11 = vpack.c.bf16 %v243_v63, %v242_v59  ;;  %v244_v12 = vmax.f32 %v180_v1, 0.0  ;;  %v212_v13 = vadd.f32 %v959_v5, %v141_v2  ;;  %v79_v2 = vld [vmem:[%s1564_s0 + $0x1e8] sm:$0xff] }
  0x29   :  { %v112_v14 = vmul.f32 %v954_v4, %v41_v62  ;;  %v313_v16 = vpack.c.bf16 %v275_v3, %v274_v0  ;;  %v245_v17 = vmax.f32 %v181_v6, 0.0  ;;  %v213_v18 = vadd.f32 %v959_v5, %v142_v7  ;;  %v48_v3 = vld [vmem:[%s1564_s0 + $0xf0] sm:$0xff] }
  0x2a   :  { %v182_v19 = vadd.f32 %v959_v5, %v111_v8  ;;  %v276_v21 = vmax.f32 %v212_v13, 0.0  ;;  %v143_v23 = vmul.f32 %v954_v4, %v72_v9  ;;  %v144_v24 = vmul.f32 %v954_v4, %v73_v10  ;;  %v49_v10 = vld [vmem:[%s1564_s0 + $0xf8] sm:$0xff] }
  0x2b   :  { %v183_v22 = vadd.f32 %v959_v5, %v112_v14  ;;  %v298_v27 = vpack.c.bf16 %v245_v17, %v244_v12  ;;  %v277_v28 = vmax.f32 %v213_v18, 0.0  ;;  %v113_v30 = vmul.f32 %v954_v4, %v42_v15  ;;  %v80_v18 = vld [vmem:[%s1564_s0 + $0x1f0] sm:$0xff] }
  0x2c   :  { %v246_v29 = vmax.f32 %v182_v19, 0.0  ;;  %v214_v32 = vadd.f32 %v959_v5, %v143_v23  ;;  %v215_v33 = vadd.f32 %v959_v5, %v144_v24  ;;  %v114_v34 = vmul.f32 %v954_v4, %v43_v20  ;;  %v81_v19 = vld [vmem:[%s1564_s0 + $0x1f8] sm:$0xff] }
  0x2d   :  { %866 = vmatmul.mubr.msk.bf16.gmra.mrb[16].mxu0 %vm321_vm1, %v297_v11  ;;  %v247_v31 = vmax.f32 %v183_v22, 0.0  ;;  %v314_v36 = vpack.c.bf16 %v277_v28, %v276_v21  ;;  %v184_v37 = vadd.f32 %v959_v5, %v113_v30  ;;  %v145_v38 = vmul.f32 %v954_v4, %v74_v25 }
  0x2e   :  { %869 = vmatprep.mubr.msk.bf16.mxu0 %vm321_vm1, %v298_v27  ;;  %v146_v39 = vmul.f32 %v954_v4, %v75_v26  ;;  %v278_v43 = vmax.f32 %v214_v32, 0.0  ;;  %v279_v44 = vmax.f32 %v215_v33, 0.0  ;;  %v185_v45 = vadd.f32 %v959_v5, %v114_v34 }
  0x2f   :  { %898 = vmatmul.mubr.msk.bf16.gmra.mrb[16].mxu1 %vm321_vm1, %v313_v16  ;;  %v299_v42 = vpack.c.bf16 %v247_v31, %v246_v29  ;;  %v248_v47 = vmax.f32 %v184_v37, 0.0  ;;  %v216_v48 = vadd.f32 %v959_v5, %v145_v38  ;;  %v115_v50 = vmul.f32 %v954_v4, %v44_v35 }
  0x30   :  { %901 = vmatprep.mubr.msk.bf16.mxu1 %vm321_vm1, %v314_v36  ;;  %v217_v49 = vadd.f32 %v959_v5, %v146_v39  ;;  %v315_v52 = vpack.c.bf16 %v279_v44, %v278_v43  ;;  %v249_v53 = vmax.f32 %v185_v45, 0.0  ;;  %v116_v54 = vmul.f32 %v954_v4, %v45_v40 }
  0x31   :  { %v147_v55 = vmul.f32 %v954_v4, %v76_v41  ;;  %v280_v57 = vmax.f32 %v216_v48, 0.0  ;;  %v186_v59 = vadd.f32 %v959_v5, %v115_v50  ;;  %v148_v60 = vmul.f32 %v954_v4, %v77_v46 }
  0x32   :  { %v281_v58 = vmax.f32 %v217_v49, 0.0  ;;  %v300_v62 = vpack.c.bf16 %v249_v53, %v248_v47  ;;  %v187_v63 = vadd.f32 %v959_v5, %v116_v54  ;;  %v117_v1 = vmul.f32 %v954_v4, %v46_v51 }
  0x33   :  { %v218_v0 = vadd.f32 %v959_v5, %v147_v55  ;;  %v250_v7 = vmax.f32 %v186_v59, 0.0  ;;  %v219_v8 = vadd.f32 %v959_v5, %v148_v60  ;;  %v118_v9 = vmul.f32 %v954_v4, %v47_v56 }
  0x34   :  { %v316_v6 = vpack.c.bf16 %v281_v58, %v280_v57  ;;  %v251_v11 = vmax.f32 %v187_v63, 0.0  ;;  %v188_v12 = vadd.f32 %v959_v5, %v117_v1  ;;  %v149_v13 = vmul.f32 %v954_v4, %v78_v61 }
  0x35   :  { %870 = vmatmul.mubr.msk.bf16.gmra.mrb[20].mxu0 %vm321_vm1, %v299_v42  ;;  %v282_v14 = vmax.f32 %v218_v0, 0.0  ;;  %v189_v15 = vadd.f32 %v959_v5, %v118_v9  ;;  %v150_v16 = vmul.f32 %v954_v4, %v79_v2  ;;  %v119_v17 = vmul.f32 %v954_v4, %v48_v3 }
  0x36   :  { %873 = vmatprep.mubr.msk.bf16.mxu0 %vm321_vm1, %v300_v62  ;;  %v283_v20 = vmax.f32 %v219_v8, 0.0  ;;  %v252_v21 = vmax.f32 %v188_v12, 0.0  ;;  %v220_v22 = vadd.f32 %v959_v5, %v149_v13  ;;  %v120_v23 = vmul.f32 %v954_v4, %v49_v10 }
  0x37   :  { %902 = vmatmul.mubr.msk.bf16.gmra.mrb[20].mxu1 %vm321_vm1, %v315_v52  ;;  %v301_v24 = vpack.c.bf16 %v251_v11, %v250_v7  ;;  %v253_v25 = vmax.f32 %v189_v15, 0.0  ;;  %v221_v26 = vadd.f32 %v959_v5, %v150_v16  ;;  %v190_v27 = vadd.f32 %v959_v5, %v119_v17 }
  0x38   :  { %905 = vmatprep.mubr.msk.bf16.mxu1 %vm321_vm1, %v316_v6  ;;  %v284_v28 = vmax.f32 %v220_v22, 0.0  ;;  %v191_v29 = vadd.f32 %v959_v5, %v120_v23  ;;  %v151_v30 = vmul.f32 %v954_v4, %v80_v18  ;;  %v152_v31 = vmul.f32 %v954_v4, %v81_v19 }
  0x39   :  { %v302_v32 = vpack.c.bf16 %v253_v25, %v252_v21  ;;  %v285_v33 = vmax.f32 %v221_v26, 0.0  ;;  %v317_v34 = vpack.c.bf16 %v283_v20, %v282_v14  ;;  %v254_v38 = vmax.f32 %v190_v27, 0.0 }
  0x3a   :  { %v222_v35 = vadd.f32 %v959_v5, %v151_v30  ;;  %v223_v36 = vadd.f32 %v959_v5, %v152_v31  ;;  %v255_v39 = vmax.f32 %v191_v29, 0.0 }
  0x3b   :  { %v318_v37 = vpack.c.bf16 %v285_v33, %v284_v28 }
  0x3c   :  { %v286_v40 = vmax.f32 %v222_v35, 0.0  ;;  %v287_v41 = vmax.f32 %v223_v36, 0.0  ;;  %v303_v4 = vpack.c.bf16 %v255_v39, %v254_v38 }
  0x3d   :  { %874 = vmatmul.mubr.msk.bf16.gmra.mrb[24].mxu0 %vm321_vm1, %v301_v24 }
  0x3e   :  { %877 = vmatprep.mubr.msk.bf16.mxu0 %vm321_vm1, %v302_v32  ;;  %v319_v42 = vpack.c.bf16 %v287_v41, %v286_v40 }
  0x3f   :  { %906 = vmatmul.mubr.msk.bf16.gmra.mrb[24].mxu1 %vm321_vm1, %v317_v34 }
  0x40   :  { %909 = vmatprep.mubr.msk.bf16.mxu1 %vm321_vm1, %v318_v37 }
  0x45   :  { %878 = vmatmul.mubr.msk.bf16.gmra.mrb[28].mxu0 %vm321_vm1, %v303_v4 }
  0x47   :  { %910 = vmatmul.mubr.msk.bf16.gmra.mrb[28].mxu1 %vm321_vm1, %v319_v42 }
  0xe0   :  { %v851_v5 = vpop.f32.mrb[0].mxu0 }
  0xe1   :  { %714 = vst.msk [vmem:[%s1567_s4 + $0x10] sm:$0xff] %vm711_vm2, %v851_v5  ;;  %v456_v43 = vpop.f32.mrb[1].mxu0 }
  0xe2   :  { %v883_v44 = vpop.f32.mrb[0].mxu1  ;;  %712 = vst.msk [vmem:[%s1567_s4] sm:$0xff] %vm711_vm2, %v456_v43  ;;  %v852_v45 = vpop.f32.mrb[2].mxu0 }
  0xe3   :  { %746 = vst.msk [vmem:[%s1567_s4 + $0x110] sm:$0xff] %vm711_vm2, %v883_v44  ;;  %v584_v46 = vpop.f32.mrb[1].mxu1  ;;  %715 = vst.msk [vmem:[%s1567_s4 + $0x18] sm:$0xff] %vm711_vm2, %v852_v45  ;;  %v459_v47 = vpop.f32.mrb[3].mxu0 }
  0xe4   :  { %744 = vst.msk [vmem:[%s1567_s4 + $0x100] sm:$0xff] %vm711_vm2, %v584_v46  ;;  %v884_v48 = vpop.f32.mrb[2].mxu1  ;;  %713 = vst.msk [vmem:[%s1567_s4 + $0x8] sm:$0xff] %vm711_vm2, %v459_v47 }
  0xe5   :  { %747 = vst.msk [vmem:[%s1567_s4 + $0x118] sm:$0xff] %vm711_vm2, %v884_v48  ;;  %v587_v49 = vpop.f32.mrb[3].mxu1 }
  0xe6   :  { %745 = vst.msk [vmem:[%s1567_s4 + $0x108] sm:$0xff] %vm711_vm2, %v587_v49 }
  0xe8   :  { %v855_v50 = vpop.f32.mrb[4].mxu0 }
  0xe9   :  { %718 = vst.msk [vmem:[%s1567_s4 + $0x30] sm:$0xff] %vm711_vm2, %v855_v50  ;;  %v472_v51 = vpop.f32.mrb[5].mxu0 }
  0xea   :  { %v887_v52 = vpop.f32.mrb[4].mxu1  ;;  %716 = vst.msk [vmem:[%s1567_s4 + $0x20] sm:$0xff] %vm711_vm2, %v472_v51  ;;  %v856_v53 = vpop.f32.mrb[6].mxu0 }
  0xeb   :  { %750 = vst.msk [vmem:[%s1567_s4 + $0x130] sm:$0xff] %vm711_vm2, %v887_v52  ;;  %v600_v54 = vpop.f32.mrb[5].mxu1  ;;  %719 = vst.msk [vmem:[%s1567_s4 + $0x38] sm:$0xff] %vm711_vm2, %v856_v53  ;;  %v475_v55 = vpop.f32.mrb[7].mxu0 }
  0xec   :  { %748 = vst.msk [vmem:[%s1567_s4 + $0x120] sm:$0xff] %vm711_vm2, %v600_v54  ;;  %v888_v56 = vpop.f32.mrb[6].mxu1  ;;  %717 = vst.msk [vmem:[%s1567_s4 + $0x28] sm:$0xff] %vm711_vm2, %v475_v55 }
  0xed   :  { %751 = vst.msk [vmem:[%s1567_s4 + $0x138] sm:$0xff] %vm711_vm2, %v888_v56  ;;  %v603_v57 = vpop.f32.mrb[7].mxu1 }
  0xee   :  { %749 = vst.msk [vmem:[%s1567_s4 + $0x128] sm:$0xff] %vm711_vm2, %v603_v57 }
  0xf0   :  { %v859_v58 = vpop.f32.mrb[8].mxu0 }
  0xf1   :  { %722 = vst.msk [vmem:[%s1567_s4 + $0x50] sm:$0xff] %vm711_vm2, %v859_v58  ;;  %v488_v59 = vpop.f32.mrb[9].mxu0 }
  0xf2   :  { %v891_v60 = vpop.f32.mrb[8].mxu1  ;;  %720 = vst.msk [vmem:[%s1567_s4 + $0x40] sm:$0xff] %vm711_vm2, %v488_v59  ;;  %v860_v61 = vpop.f32.mrb[10].mxu0 }
  0xf3   :  { %754 = vst.msk [vmem:[%s1567_s4 + $0x150] sm:$0xff] %vm711_vm2, %v891_v60  ;;  %v616_v62 = vpop.f32.mrb[9].mxu1  ;;  %723 = vst.msk [vmem:[%s1567_s4 + $0x58] sm:$0xff] %vm711_vm2, %v860_v61  ;;  %v491_v63 = vpop.f32.mrb[11].mxu0 }
  0xf4   :  { %752 = vst.msk [vmem:[%s1567_s4 + $0x140] sm:$0xff] %vm711_vm2, %v616_v62  ;;  %v892_v0 = vpop.f32.mrb[10].mxu1  ;;  %721 = vst.msk [vmem:[%s1567_s4 + $0x48] sm:$0xff] %vm711_vm2, %v491_v63 }
  0xf5   :  { %755 = vst.msk [vmem:[%s1567_s4 + $0x158] sm:$0xff] %vm711_vm2, %v892_v0  ;;  %v619_v1 = vpop.f32.mrb[11].mxu1 }
  0xf6   :  { %753 = vst.msk [vmem:[%s1567_s4 + $0x148] sm:$0xff] %vm711_vm2, %v619_v1 }
  0xf8   :  { %v863_v2 = vpop.f32.mrb[12].mxu0 }
  0xf9   :  { %726 = vst.msk [vmem:[%s1567_s4 + $0x70] sm:$0xff] %vm711_vm2, %v863_v2  ;;  %v504_v3 = vpop.f32.mrb[13].mxu0 }
  0xfa   :  { %v895_v6 = vpop.f32.mrb[12].mxu1  ;;  %724 = vst.msk [vmem:[%s1567_s4 + $0x60] sm:$0xff] %vm711_vm2, %v504_v3  ;;  %v864_v7 = vpop.f32.mrb[14].mxu0 }
  0xfb   :  { %758 = vst.msk [vmem:[%s1567_s4 + $0x170] sm:$0xff] %vm711_vm2, %v895_v6  ;;  %v632_v8 = vpop.f32.mrb[13].mxu1  ;;  %727 = vst.msk [vmem:[%s1567_s4 + $0x78] sm:$0xff] %vm711_vm2, %v864_v7  ;;  %v507_v9 = vpop.f32.mrb[15].mxu0 }
  0xfc   :  { %756 = vst.msk [vmem:[%s1567_s4 + $0x160] sm:$0xff] %vm711_vm2, %v632_v8  ;;  %v896_v10 = vpop.f32.mrb[14].mxu1  ;;  %725 = vst.msk [vmem:[%s1567_s4 + $0x68] sm:$0xff] %vm711_vm2, %v507_v9 }
  0xfd   :  { %759 = vst.msk [vmem:[%s1567_s4 + $0x178] sm:$0xff] %vm711_vm2, %v896_v10  ;;  %v635_v11 = vpop.f32.mrb[15].mxu1 }
  0xfe   :  { %757 = vst.msk [vmem:[%s1567_s4 + $0x168] sm:$0xff] %vm711_vm2, %v635_v11 }
 0x100   :  { %v867_v12 = vpop.f32.mrb[16].mxu0 }
 0x101   :  { %730 = vst.msk [vmem:[%s1567_s4 + $0x90] sm:$0xff] %vm711_vm2, %v867_v12  ;;  %v520_v13 = vpop.f32.mrb[17].mxu0 }
 0x102   :  { %v899_v14 = vpop.f32.mrb[16].mxu1  ;;  %728 = vst.msk [vmem:[%s1567_s4 + $0x80] sm:$0xff] %vm711_vm2, %v520_v13  ;;  %v868_v15 = vpop.f32.mrb[18].mxu0 }
 0x103   :  { %762 = vst.msk [vmem:[%s1567_s4 + $0x190] sm:$0xff] %vm711_vm2, %v899_v14  ;;  %v648_v16 = vpop.f32.mrb[17].mxu1  ;;  %731 = vst.msk [vmem:[%s1567_s4 + $0x98] sm:$0xff] %vm711_vm2, %v868_v15  ;;  %v523_v17 = vpop.f32.mrb[19].mxu0 }
 0x104   :  { %760 = vst.msk [vmem:[%s1567_s4 + $0x180] sm:$0xff] %vm711_vm2, %v648_v16  ;;  %v900_v18 = vpop.f32.mrb[18].mxu1  ;;  %729 = vst.msk [vmem:[%s1567_s4 + $0x88] sm:$0xff] %vm711_vm2, %v523_v17 }
 0x105   :  { %763 = vst.msk [vmem:[%s1567_s4 + $0x198] sm:$0xff] %vm711_vm2, %v900_v18  ;;  %v651_v19 = vpop.f32.mrb[19].mxu1 }
 0x106   :  { %761 = vst.msk [vmem:[%s1567_s4 + $0x188] sm:$0xff] %vm711_vm2, %v651_v19 }
 0x108   :  { %v871_v20 = vpop.f32.mrb[20].mxu0 }
 0x109   :  { %734 = vst.msk [vmem:[%s1567_s4 + $0xb0] sm:$0xff] %vm711_vm2, %v871_v20  ;;  %v536_v21 = vpop.f32.mrb[21].mxu0 }
 0x10a   :  { %v903_v22 = vpop.f32.mrb[20].mxu1  ;;  %732 = vst.msk [vmem:[%s1567_s4 + $0xa0] sm:$0xff] %vm711_vm2, %v536_v21  ;;  %v872_v23 = vpop.f32.mrb[22].mxu0 }
 0x10b   :  { %766 = vst.msk [vmem:[%s1567_s4 + $0x1b0] sm:$0xff] %vm711_vm2, %v903_v22  ;;  %v664_v24 = vpop.f32.mrb[21].mxu1  ;;  %735 = vst.msk [vmem:[%s1567_s4 + $0xb8] sm:$0xff] %vm711_vm2, %v872_v23  ;;  %v539_v25 = vpop.f32.mrb[23].mxu0 }
 0x10c   :  { %764 = vst.msk [vmem:[%s1567_s4 + $0x1a0] sm:$0xff] %vm711_vm2, %v664_v24  ;;  %v904_v26 = vpop.f32.mrb[22].mxu1  ;;  %733 = vst.msk [vmem:[%s1567_s4 + $0xa8] sm:$0xff] %vm711_vm2, %v539_v25 }
 0x10d   :  { %767 = vst.msk [vmem:[%s1567_s4 + $0x1b8] sm:$0xff] %vm711_vm2, %v904_v26  ;;  %v667_v27 = vpop.f32.mrb[23].mxu1 }
 0x10e   :  { %765 = vst.msk [vmem:[%s1567_s4 + $0x1a8] sm:$0xff] %vm711_vm2, %v667_v27 }
 0x110   :  { %v875_v28 = vpop.f32.mrb[24].mxu0 }
 0x111   :  { %738 = vst.msk [vmem:[%s1567_s4 + $0xd0] sm:$0xff] %vm711_vm2, %v875_v28  ;;  %v552_v29 = vpop.f32.mrb[25].mxu0 }
 0x112   :  { %v907_v30 = vpop.f32.mrb[24].mxu1  ;;  %736 = vst.msk [vmem:[%s1567_s4 + $0xc0] sm:$0xff] %vm711_vm2, %v552_v29  ;;  %v876_v31 = vpop.f32.mrb[26].mxu0 }
 0x113   :  { %770 = vst.msk [vmem:[%s1567_s4 + $0x1d0] sm:$0xff] %vm711_vm2, %v907_v30  ;;  %v680_v32 = vpop.f32.mrb[25].mxu1  ;;  %739 = vst.msk [vmem:[%s1567_s4 + $0xd8] sm:$0xff] %vm711_vm2, %v876_v31  ;;  %v555_v33 = vpop.f32.mrb[27].mxu0 }
 0x114   :  { %768 = vst.msk [vmem:[%s1567_s4 + $0x1c0] sm:$0xff] %vm711_vm2, %v680_v32  ;;  %v908_v34 = vpop.f32.mrb[26].mxu1  ;;  %737 = vst.msk [vmem:[%s1567_s4 + $0xc8] sm:$0xff] %vm711_vm2, %v555_v33 }
 0x115   :  { %771 = vst.msk [vmem:[%s1567_s4 + $0x1d8] sm:$0xff] %vm711_vm2, %v908_v34  ;;  %v683_v35 = vpop.f32.mrb[27].mxu1 }
 0x116   :  { %769 = vst.msk [vmem:[%s1567_s4 + $0x1c8] sm:$0xff] %vm711_vm2, %v683_v35 }
 0x118   :  { %v879_v36 = vpop.f32.mrb[28].mxu0 }
 0x119   :  { %742 = vst.msk [vmem:[%s1567_s4 + $0xf0] sm:$0xff] %vm711_vm2, %v879_v36  ;;  %v568_v37 = vpop.f32.mrb[29].mxu0 }
 0x11a   :  { %v911_v38 = vpop.f32.mrb[28].mxu1  ;;  %740 = vst.msk [vmem:[%s1567_s4 + $0xe0] sm:$0xff] %vm711_vm2, %v568_v37  ;;  %v880_v39 = vpop.f32.mrb[30].mxu0 }
 0x11b   :  { %774 = vst.msk [vmem:[%s1567_s4 + $0x1f0] sm:$0xff] %vm711_vm2, %v911_v38  ;;  %v696_v40 = vpop.f32.mrb[29].mxu1  ;;  %743 = vst.msk [vmem:[%s1567_s4 + $0xf8] sm:$0xff] %vm711_vm2, %v880_v39  ;;  %v571_v41 = vpop.f32.mrb[31].mxu0 }
 0x11c   :  { %772 = vst.msk [vmem:[%s1567_s4 + $0x1e0] sm:$0xff] %vm711_vm2, %v696_v40  ;;  %v912_v4 = vpop.f32.mrb[30].mxu1  ;;  %741 = vst.msk [vmem:[%s1567_s4 + $0xe8] sm:$0xff] %vm711_vm2, %v571_v41 }
 0x11d   :  { %775 = vst.msk [vmem:[%s1567_s4 + $0x1f8] sm:$0xff] %vm711_vm2, %v912_v4  ;;  %v699_v42 = vpop.f32.mrb[31].mxu1 }
 0x11e   :  { %773 = vst.msk [vmem:[%s1567_s4 + $0x1e8] sm:$0xff] %vm711_vm2, %v699_v42 }

// kernel: preact_bottleneck_forward.6
= control target key start
LH: loop header
LB: loop body
LE: loop exit
PB: predicated region body
PF: predicated region fallthrough
CT: control target
= control target key end

     0   :  { %vm420_vm0 = vcmask 1041408   ;;  %vm323_vm1 = vcmask 31744   ;;  %vm1235_vm2 = vcmask 1040384   ;;  %s2439_s3 = inlined_call_operand.vmem [shape: bf16[4,128], index: 3, kind: input, shape index: {}]   ;;  %s2440_s0 = inlined_call_operand.vmem [shape: f32[512,4], index: 0, kind: input, shape index: {}]   ;;  %s2441_s1 = inlined_call_operand.vmem [shape: f32[1,4], index: 1, kind: input, shape index: {}]   ;;  %s2442_s2 = inlined_call_operand.vmem [shape: f32[1,4], index: 2, kind: input, shape index: {}]   ;;  %s2443_s4 = inlined_call_operand.vmem [shape: bf16[512,128], index: 4, kind: output, shape index: {0}]   ;;  %s2444_s5 = inlined_call_operand.vmem [shape: f32[1,2,128], index: 5, kind: output, shape index: {1}]  }
   0x1   :  { %v322_v0 = vld [vmem:[%s2439_s3] sm:$0x3]  ;;  %v21_v2 = vld [vmem:[%s2440_s0 + $0x8] sm:$0xff]  ;;  %v22_v6 = vld [vmem:[%s2440_s0 + $0x10] sm:$0xff] }
   0x2   :  { %v20_v1 = vld [vmem:[%s2440_s0] sm:$0xff]  ;;  %1700 = vmatprep.subr.msk.bf16.mxu0 %vm420_vm0, %v322_v0  ;;  %v422_v3 = vsel %vm420_vm0, %v322_v0, 0  ;;  %1701 = vmatprep.subr.msk.bf16.mxu1 %vm420_vm0, %v322_v0  ;;  %v23_v9 = vld [vmem:[%s2440_s0 + $0x18] sm:$0xff]  ;;  %v25_v12 = vld [vmem:[%s2440_s0 + $0x28] sm:$0xff] }
   0x3   :  { %v1744_v4 = vld [vmem:[%s2441_s1] ss:$0 sm:$0xff]  ;;  %1633 = vmatpush3.bf16.msra.mxu0 %v422_v3  ;;  %1699 = vmatpush3.bf16.msra.mxu1 %v422_v3  ;;  %v26_v16 = vld [vmem:[%s2440_s0 + $0x30] sm:$0xff]  ;;  %v27_v17 = vld [vmem:[%s2440_s0 + $0x38] sm:$0xff] }
   0x4   :  { %v1749_v5 = vld [vmem:[%s2442_s2] ss:$0 sm:$0xff]  ;;  %v91_v7 = vmul.f32 %v1744_v4, %v20_v1  ;;  %v92_v8 = vmul.f32 %v1744_v4, %v21_v2  ;;  %v93_v10 = vmul.f32 %v1744_v4, %v22_v6  ;;  %v94_v13 = vmul.f32 %v1744_v4, %v23_v9  ;;  %v29_v27 = vld [vmem:[%s2440_s0 + $0x48] sm:$0xff]  ;;  %v30_v32 = vld [vmem:[%s2440_s0 + $0x50] sm:$0xff] }
   0x5   :  { %v24_v11 = vld [vmem:[%s2440_s0 + $0x20] sm:$0xff]  ;;  %v96_v15 = vmul.f32 %v1744_v4, %v25_v12  ;;  %v97_v21 = vmul.f32 %v1744_v4, %v26_v16  ;;  %v98_v25 = vmul.f32 %v1744_v4, %v27_v17  ;;  %v31_v37 = vld [vmem:[%s2440_s0 + $0x58] sm:$0xff]  ;;  %v100_v41 = vmul.f32 %v1744_v4, %v29_v27  ;;  %v33_v42 = vld [vmem:[%s2440_s0 + $0x68] sm:$0xff] }
   0x6   :  { %v95_v14 = vmul.f32 %v1744_v4, %v24_v11  ;;  %v162_v18 = vadd.f32 %v1749_v5, %v91_v7  ;;  %v163_v19 = vadd.f32 %v1749_v5, %v92_v8  ;;  %v164_v20 = vadd.f32 %v1749_v5, %v93_v10  ;;  %v28_v26 = vld [vmem:[%s2440_s0 + $0x40] sm:$0xff]  ;;  %v34_v46 = vld [vmem:[%s2440_s0 + $0x70] sm:$0xff]  ;;  %v35_v55 = vld [vmem:[%s2440_s0 + $0x78] sm:$0xff] }
   0x7   :  { %v165_v22 = vadd.f32 %v1749_v5, %v94_v13  ;;  %v167_v24 = vadd.f32 %v1749_v5, %v96_v15  ;;  %v168_v31 = vadd.f32 %v1749_v5, %v97_v21  ;;  %v169_v36 = vadd.f32 %v1749_v5, %v98_v25  ;;  %v32_v38 = vld [vmem:[%s2440_s0 + $0x60] sm:$0xff]  ;;  %v37_v60 = vld [vmem:[%s2440_s0 + $0x88] sm:$0xff]  ;;  %v38_v0 = vld [vmem:[%s2440_s0 + $0x90] sm:$0xff] }
   0x8   :  { %v166_v23 = vadd.f32 %v1749_v5, %v95_v14  ;;  %v226_v28 = vmax.f32 %v162_v18, 0.0  ;;  %v227_v29 = vmax.f32 %v163_v19, 0.0  ;;  %v228_v30 = vmax.f32 %v164_v20, 0.0  ;;  %v36_v56 = vld [vmem:[%s2440_s0 + $0x80] sm:$0xff]  ;;  %v39_v1 = vld [vmem:[%s2440_s0 + $0x98] sm:$0xff]  ;;  %v41_v10 = vld [vmem:[%s2440_s0 + $0xa8] sm:$0xff] }
   0x9   :  { %v229_v33 = vmax.f32 %v165_v22, 0.0  ;;  %v231_v35 = vmax.f32 %v167_v24, 0.0  ;;  %v99_v40 = vmul.f32 %v1744_v4, %v28_v26  ;;  %v101_v45 = vmul.f32 %v1744_v4, %v30_v32  ;;  %v40_v6 = vld [vmem:[%s2440_s0 + $0xa0] sm:$0xff]  ;;  %v42_v15 = vld [vmem:[%s2440_s0 + $0xb0] sm:$0xff]  ;;  %v43_v20 = vld [vmem:[%s2440_s0 + $0xb8] sm:$0xff] }
   0xa   :  { %v230_v34 = vmax.f32 %v166_v23, 0.0  ;;  %v290_v39 = vpack.c.bf16 %v227_v29, %v226_v28  ;;  %v171_v48 = vadd.f32 %v1749_v5, %v100_v41  ;;  %v102_v49 = vmul.f32 %v1744_v4, %v31_v37  ;;  %v44_v25 = vld [vmem:[%s2440_s0 + $0xc0] sm:$0xff]  ;;  %v45_v29 = vld [vmem:[%s2440_s0 + $0xc8] sm:$0xff] }
   0xb   :  { %v291_v43 = vpack.c.bf16 %v229_v33, %v228_v30  ;;  %v170_v47 = vadd.f32 %v1749_v5, %v99_v40  ;;  %v103_v50 = vmul.f32 %v1744_v4, %v32_v38  ;;  %v232_v51 = vmax.f32 %v168_v31, 0.0  ;;  %v46_v33 = vld [vmem:[%s2440_s0 + $0xd0] sm:$0xff] }
   0xc   :  { %v292_v44 = vpack.c.bf16 %v231_v35, %v230_v34  ;;  %1634 = vmatprep.mubr.msk.bf16.mxu0 %vm323_vm1, %v290_v39  ;;  %v233_v52 = vmax.f32 %v169_v36, 0.0  ;;  %v172_v53 = vadd.f32 %v1749_v5, %v101_v45  ;;  %v104_v54 = vmul.f32 %v1744_v4, %v33_v42  ;;  %v47_v42 = vld [vmem:[%s2440_s0 + $0xd8] sm:$0xff] }
   0xd   :  { %1635 = vmatmul.mubr.msk.bf16.vlgmr.msra.gmra.mrb[0].mxu0 %vm323_vm1, %v291_v43  ;;  %v234_v57 = vmax.f32 %v170_v47, 0.0  ;;  %v235_v58 = vmax.f32 %v171_v48, 0.0  ;;  %v105_v59 = vmul.f32 %v1744_v4, %v34_v46  ;;  %v173_v61 = vadd.f32 %v1749_v5, %v102_v49  ;;  %v48_v47 = vld [vmem:[%s2440_s0 + $0xe0] sm:$0xff] }
   0xe   :  { %1638 = vmatprep.mubr.msk.bf16.mxu0 %vm323_vm1, %v292_v44  ;;  %v174_v62 = vadd.f32 %v1749_v5, %v103_v50  ;;  %v175_v63 = vadd.f32 %v1749_v5, %v104_v54  ;;  %v106_v2 = vmul.f32 %v1744_v4, %v35_v55  ;;  %v107_v3 = vmul.f32 %v1744_v4, %v36_v56  ;;  %v52_v54 = vld [vmem:[%s2440_s0 + $0x100] sm:$0xff]  ;;  %v49_v56 = vld [vmem:[%s2440_s0 + $0xe8] sm:$0xff] }
   0xf   :  { %v293_v7 = vpack.c.bf16 %v233_v52, %v232_v51  ;;  %v236_v8 = vmax.f32 %v172_v53, 0.0  ;;  %v108_v9 = vmul.f32 %v1744_v4, %v37_v60  ;;  %v294_v11 = vpack.c.bf16 %v235_v58, %v234_v57  ;;  %v53_v58 = vld [vmem:[%s2440_s0 + $0x108] sm:$0xff] }
  0x10   :  { %v176_v12 = vadd.f32 %v1749_v5, %v105_v59  ;;  %v109_v13 = vmul.f32 %v1744_v4, %v38_v0  ;;  %v110_v14 = vmul.f32 %v1744_v4, %v39_v1  ;;  %v237_v16 = vmax.f32 %v173_v61, 0.0  ;;  %v55_v0 = vld [vmem:[%s2440_s0 + $0x118] sm:$0xff] }
  0x11   :  { %v238_v17 = vmax.f32 %v174_v62, 0.0  ;;  %v239_v18 = vmax.f32 %v175_v63, 0.0  ;;  %v111_v19 = vmul.f32 %v1744_v4, %v40_v6  ;;  %v177_v21 = vadd.f32 %v1749_v5, %v106_v2  ;;  %v54_v63 = vld [vmem:[%s2440_s0 + $0x110] sm:$0xff] }
  0x12   :  { %v178_v22 = vadd.f32 %v1749_v5, %v107_v3  ;;  %v179_v23 = vadd.f32 %v1749_v5, %v108_v9  ;;  %v112_v24 = vmul.f32 %v1744_v4, %v41_v10  ;;  %v180_v26 = vadd.f32 %v1749_v5, %v109_v13  ;;  %v50_v6 = vld [vmem:[%s2440_s0 + $0xf0] sm:$0xff]  ;;  %v57_v13 = vld [vmem:[%s2440_s0 + $0x128] sm:$0xff] }
  0x13   :  { %v181_v27 = vadd.f32 %v1749_v5, %v110_v14  ;;  %v113_v28 = vmul.f32 %v1744_v4, %v42_v15  ;;  %v182_v30 = vadd.f32 %v1749_v5, %v111_v19  ;;  %v114_v32 = vmul.f32 %v1744_v4, %v43_v20 }
  0x14   :  { %v183_v31 = vadd.f32 %v1749_v5, %v112_v24  ;;  %v295_v34 = vpack.c.bf16 %v237_v16, %v236_v8  ;;  %v296_v35 = vpack.c.bf16 %v239_v18, %v238_v17  ;;  %v240_v36 = vmax.f32 %v176_v12, 0.0  ;;  %v56_v8 = vld [vmem:[%s2440_s0 + $0x120] sm:$0xff]  ;;  %v58_v18 = vld [vmem:[%s2440_s0 + $0x130] sm:$0xff] }
  0x15   :  { %1639 = vmatmul.mubr.msk.bf16.gmra.mrb[4].mxu0 %vm323_vm1, %v293_v7  ;;  %v115_v37 = vmul.f32 %v1744_v4, %v44_v25  ;;  %v241_v38 = vmax.f32 %v177_v21, 0.0  ;;  %v242_v39 = vmax.f32 %v178_v22, 0.0  ;;  %v243_v40 = vmax.f32 %v179_v23, 0.0  ;;  %v59_v23 = vld [vmem:[%s2440_s0 + $0x138] sm:$0xff] }
  0x16   :  { %1642 = vmatprep.mubr.msk.bf16.mxu0 %vm323_vm1, %v294_v11  ;;  %v116_v41 = vmul.f32 %v1744_v4, %v45_v29  ;;  %v244_v43 = vmax.f32 %v180_v26, 0.0  ;;  %v245_v44 = vmax.f32 %v181_v27, 0.0  ;;  %v1883_v45 = vadd.f32 %v1749_v5, %v113_v28  ;;  %v60_v28 = vld [vmem:[%s2440_s0 + $0x140] sm:$0xff] }
  0x17   :  { %v117_v46 = vmul.f32 %v1744_v4, %v46_v33  ;;  %v246_v48 = vmax.f32 %v182_v30, 0.0  ;;  %v247_v49 = vmax.f32 %v183_v31, 0.0  ;;  %v1890_v50 = vadd.f32 %v1749_v5, %v114_v32  ;;  %v61_v33 = vld [vmem:[%s2440_s0 + $0x148] sm:$0xff] }
  0x18   :  { %v1893_v51 = vadd.f32 %v1749_v5, %v115_v37  ;;  %v1896_v52 = vadd.f32 %v1749_v5, %v116_v41  ;;  %v118_v53 = vmul.f32 %v1744_v4, %v47_v42  ;;  %v297_v55 = vpack.c.bf16 %v241_v38, %v240_v36  ;;  %v62_v38 = vld [vmem:[%s2440_s0 + $0x150] sm:$0xff] }
  0x19   :  { %v119_v57 = vmul.f32 %v1744_v4, %v48_v47  ;;  %v298_v59 = vpack.c.bf16 %v243_v40, %v242_v39  ;;  %v1910_v60 = vpack.c.bf16 %v245_v44, %v244_v43  ;;  %v248_v61 = vmax.f32 %v1883_v45, 0.0  ;;  %v63_v39 = vld [vmem:[%s2440_s0 + $0x158] sm:$0xff]  ;;  %v64_v44 = vld [vmem:[%s2440_s0 + $0x160] sm:$0xff] }
  0x1a   :  { %v1914_v62 = vadd.f32 %v1749_v5, %v117_v46  ;;  %v1923_v1 = vpack.c.bf16 %v247_v49, %v246_v48  ;;  %v249_v2 = vmax.f32 %v1890_v50, 0.0  ;;  %v250_v3 = vmax.f32 %v1893_v51, 0.0  ;;  %v75_v45 = vld [vmem:[%s2440_s0 + $0x1b8] sm:$0xff] }
  0x1b   :  { %v123_v7 = vmul.f32 %v1744_v4, %v52_v54  ;;  %v251_v9 = vmax.f32 %v1896_v52, 0.0  ;;  %v1936_v10 = vadd.f32 %v1749_v5, %v118_v53  ;;  %v120_v11 = vmul.f32 %v1744_v4, %v49_v56  ;;  %v65_v53 = vld [vmem:[%s2440_s0 + $0x168] sm:$0xff] }
  0x1c   :  { %v124_v12 = vmul.f32 %v1744_v4, %v53_v58  ;;  %v1944_v14 = vadd.f32 %v1749_v5, %v119_v57  ;;  %v125_v16 = vmul.f32 %v1744_v4, %v54_v63  ;;  %v126_v17 = vmul.f32 %v1744_v4, %v55_v0  ;;  %v66_v58 = vld [vmem:[%s2440_s0 + $0x170] sm:$0xff] }
  0x1d   :  { %1643 = vmatmul.mubr.msk.bf16.gmra.mrb[8].mxu0 %vm323_vm1, %v295_v34  ;;  %v194_v15 = vadd.f32 %v1749_v5, %v123_v7  ;;  %v252_v19 = vmax.f32 %v1914_v62, 0.0  ;;  %v121_v20 = vmul.f32 %v1744_v4, %v50_v6  ;;  %v127_v22 = vmul.f32 %v1744_v4, %v56_v8  ;;  %v67_v8 = vld [vmem:[%s2440_s0 + $0x178] sm:$0xff]  ;;  %v72_v62 = vld [vmem:[%s2440_s0 + $0x1a0] sm:$0xff] }
  0x1e   :  { %1646 = vmatprep.mubr.msk.bf16.mxu0 %vm323_vm1, %v296_v35  ;;  %v195_v21 = vadd.f32 %v1749_v5, %v124_v12  ;;  %v196_v25 = vadd.f32 %v1749_v5, %v125_v16  ;;  %v197_v26 = vadd.f32 %v1749_v5, %v126_v17  ;;  %v128_v27 = vmul.f32 %v1744_v4, %v57_v13  ;;  %v68_v16 = vld [vmem:[%s2440_s0 + $0x180] sm:$0xff] }
  0x1f   :  { %v258_v24 = vmax.f32 %v194_v15, 0.0  ;;  %v1966_v29 = vadd.f32 %v1749_v5, %v120_v11  ;;  %v198_v31 = vadd.f32 %v1749_v5, %v127_v22  ;;  %v129_v32 = vmul.f32 %v1744_v4, %v58_v18 }
  0x20   :  { %v259_v30 = vmax.f32 %v195_v21, 0.0  ;;  %v260_v34 = vmax.f32 %v196_v25, 0.0  ;;  %v261_v35 = vmax.f32 %v197_v26, 0.0  ;;  %v199_v36 = vadd.f32 %v1749_v5, %v128_v27  ;;  %v69_v27 = vld [vmem:[%s2440_s0 + $0x188] sm:$0xff] }
  0x21   :  { %v130_v37 = vmul.f32 %v1744_v4, %v59_v23  ;;  %v262_v41 = vmax.f32 %v198_v31, 0.0  ;;  %v200_v42 = vadd.f32 %v1749_v5, %v129_v32  ;;  %v131_v43 = vmul.f32 %v1744_v4, %v60_v28 }
  0x22   :  { %v306_v40 = vpack.c.bf16 %v259_v30, %v258_v24  ;;  %v307_v46 = vpack.c.bf16 %v261_v35, %v260_v34  ;;  %v263_v47 = vmax.f32 %v199_v36, 0.0  ;;  %v132_v49 = vmul.f32 %v1744_v4, %v61_v33  ;;  %v70_v36 = vld [vmem:[%s2440_s0 + $0x190] sm:$0xff] }
  0x23   :  { %v201_v48 = vadd.f32 %v1749_v5, %v130_v37  ;;  %v264_v54 = vmax.f32 %v200_v42, 0.0  ;;  %v133_v56 = vmul.f32 %v1744_v4, %v62_v38  ;;  %v134_v57 = vmul.f32 %v1744_v4, %v63_v39 }
  0x24   :  { %1666 = vmatprep.mubr.msk.bf16.mxu1 %vm323_vm1, %v306_v40  ;;  %v308_v63 = vpack.c.bf16 %v263_v47, %v262_v41  ;;  %v203_v6 = vadd.f32 %v1749_v5, %v132_v49  ;;  %v135_v7 = vmul.f32 %v1744_v4, %v64_v44  ;;  %v136_v15 = vmul.f32 %v1744_v4, %v65_v53  ;;  %v71_v40 = vld [vmem:[%s2440_s0 + $0x198] sm:$0xff]  ;;  %v73_v41 = vld [vmem:[%s2440_s0 + $0x1a8] sm:$0xff]  ;;  %v78_v49 = vld [vmem:[%s2440_s0 + $0x1d0] sm:$0xff] }
  0x25   :  { %1647 = vmatmul.mubr.msk.bf16.gmra.mrb[12].mxu0 %vm323_vm1, %v297_v55  ;;  %v202_v55 = vadd.f32 %v1749_v5, %v131_v43  ;;  %1667 = vmatmul.mubr.msk.bf16.vlgmr.msra.gmra.mrb[0].mxu1 %vm323_vm1, %v307_v46  ;;  %v265_v0 = vmax.f32 %v201_v48, 0.0  ;;  %v204_v12 = vadd.f32 %v1749_v5, %v133_v56  ;;  %v205_v13 = vadd.f32 %v1749_v5, %v134_v57  ;;  %v77_v43 = vld [vmem:[%s2440_s0 + $0x1c8] sm:$0xff]  ;;  %v79_v53 = vld [vmem:[%s2440_s0 + $0x1d8] sm:$0xff] }
  0x26   :  { %1650 = vmatprep.mubr.msk.bf16.mxu0 %vm323_vm1, %v298_v59  ;;  %v51_v59 = vld [vmem:[%s2440_s0 + $0xf8] sm:$0xff]  ;;  %v253_v17 = vmax.f32 %v1936_v10, 0.0  ;;  %1670 = vmatprep.mubr.msk.bf16.mxu1 %vm323_vm1, %v308_v63  ;;  %v267_v18 = vmax.f32 %v203_v6, 0.0  ;;  %v206_v21 = vadd.f32 %v1749_v5, %v135_v7  ;;  %v137_v22 = vmul.f32 %v1744_v4, %v66_v58  ;;  %v80_v58 = vld [vmem:[%s2440_s0 + $0x1e0] sm:$0xff]  ;;  %v81_v7 = vld [vmem:[%s2440_s0 + $0x1e8] sm:$0xff] }
  0x27   :  { %v266_v11 = vmax.f32 %v202_v55, 0.0  ;;  %v254_v23 = vmax.f32 %v1944_v14, 0.0  ;;  %v122_v24 = vmul.f32 %v1744_v4, %v51_v59  ;;  %v207_v25 = vadd.f32 %v1749_v5, %v136_v15  ;;  %v82_v15 = vld [vmem:[%s2440_s0 + $0x1f0] sm:$0xff] }
  0x28   :  { %v138_v26 = vmul.f32 %v1744_v4, %v67_v8  ;;  %v255_v10 = vmax.f32 %v1966_v29, 0.0  ;;  %v2028_v28 = vadd.f32 %v1749_v5, %v121_v20  ;;  %v309_v30 = vpack.c.bf16 %v265_v0, %v264_v54 }
  0x29   :  { %v139_v31 = vmul.f32 %v1744_v4, %v68_v16  ;;  %v310_v14 = vpack.c.bf16 %v267_v18, %v266_v11  ;;  %v268_v32 = vmax.f32 %v204_v12, 0.0  ;;  %v269_v33 = vmax.f32 %v205_v13, 0.0 }
  0x2a   :  { %v2034_v34 = vadd.f32 %v1749_v5, %v137_v22  ;;  %v270_v35 = vmax.f32 %v206_v21, 0.0  ;;  %v271_v29 = vmax.f32 %v207_v25, 0.0  ;;  %v140_v20 = vmul.f32 %v1744_v4, %v69_v27  ;;  %v83_v22 = vld [vmem:[%s2440_s0 + $0x1f8] sm:$0xff] }
  0x2b   :  { %v301_v37 = vpack.c.bf16 %v249_v2, %v248_v61  ;;  %v2055_v38 = vpack.c.bf16 %v253_v17, %v252_v19  ;;  %v2058_v39 = vadd.f32 %v1749_v5, %v138_v26  ;;  %v2066_v50 = vpack.c.bf16 %v255_v10, %v254_v23  ;;  %v76_v2 = vld [vmem:[%s2440_s0 + $0x1c0] sm:$0xff] }
  0x2c   :  { %v2069_v51 = vadd.f32 %v1749_v5, %v122_v24  ;;  %v256_v52 = vmax.f32 %v2028_v28, 0.0  ;;  %v2074_v61 = vadd.f32 %v1749_v5, %v139_v31  ;;  %v141_v19 = vmul.f32 %v1744_v4, %v70_v36 }
  0x2d   :  { %1651 = vmatmul.mubr.msk.bf16.gmra.mrb[16].mxu0 %vm323_vm1, %v1910_v60  ;;  %v74_v60 = vld [vmem:[%s2440_s0 + $0x1b0] sm:$0xff]  ;;  %1671 = vmatmul.mubr.msk.bf16.gmra.mrb[4].mxu1 %vm323_vm1, %v309_v30  ;;  %v312_v44 = vpack.c.bf16 %v271_v29, %v270_v35  ;;  %v211_v46 = vadd.f32 %v1749_v5, %v140_v20  ;;  %v142_v47 = vmul.f32 %v1744_v4, %v71_v40  ;;  %v273_v54 = vmax.f32 %v2058_v39, 0.0 }
  0x2e   :  { %1654 = vmatprep.mubr.msk.bf16.mxu0 %vm323_vm1, %v1923_v1  ;;  %v302_v1 = vpack.c.bf16 %v251_v9, %v250_v3  ;;  %1674 = vmatprep.mubr.msk.bf16.mxu1 %vm323_vm1, %v310_v14  ;;  %v311_v3 = vpack.c.bf16 %v269_v33, %v268_v32  ;;  %v272_v9 = vmax.f32 %v2034_v34, 0.0  ;;  %v145_v42 = vmul.f32 %v1744_v4, %v74_v60 }
  0x2f   :  { %v146_v48 = vmul.f32 %v1744_v4, %v75_v45  ;;  %v143_v55 = vmul.f32 %v1744_v4, %v72_v62  ;;  %v147_v57 = vmul.f32 %v1744_v4, %v76_v2  ;;  %v274_v59 = vmax.f32 %v2074_v61, 0.0 }
  0x30   :  { %v216_v56 = vadd.f32 %v1749_v5, %v145_v42  ;;  %v144_v63 = vmul.f32 %v1744_v4, %v73_v41  ;;  %v148_v6 = vmul.f32 %v1744_v4, %v77_v43  ;;  %v149_v12 = vmul.f32 %v1744_v4, %v78_v49 }
  0x31   :  { %v217_v0 = vadd.f32 %v1749_v5, %v146_v48  ;;  %v218_v11 = vadd.f32 %v1749_v5, %v147_v57  ;;  %v150_v13 = vmul.f32 %v1744_v4, %v79_v53  ;;  %v275_v16 = vmax.f32 %v211_v46, 0.0 }
  0x32   :  { %v280_v8 = vmax.f32 %v216_v56, 0.0  ;;  %v219_v18 = vadd.f32 %v1749_v5, %v148_v6  ;;  %v151_v21 = vmul.f32 %v1744_v4, %v80_v58  ;;  %v220_v24 = vadd.f32 %v1749_v5, %v149_v12 }
  0x33   :  { %v281_v17 = vmax.f32 %v217_v0, 0.0  ;;  %v282_v23 = vmax.f32 %v218_v11, 0.0  ;;  %v221_v25 = vadd.f32 %v1749_v5, %v150_v13  ;;  %v152_v26 = vmul.f32 %v1744_v4, %v81_v7 }
  0x34   :  { %v283_v10 = vmax.f32 %v219_v18, 0.0  ;;  %v222_v30 = vadd.f32 %v1749_v5, %v151_v21  ;;  %v153_v31 = vmul.f32 %v1744_v4, %v82_v15  ;;  %v284_v14 = vmax.f32 %v220_v24, 0.0 }
  0x35   :  { %1655 = vmatmul.mubr.msk.bf16.gmra.mrb[20].mxu0 %vm323_vm1, %v301_v37  ;;  %1675 = vmatmul.mubr.msk.bf16.gmra.mrb[8].mxu1 %vm323_vm1, %v311_v3  ;;  %v317_v27 = vpack.c.bf16 %v281_v17, %v280_v8  ;;  %v285_v32 = vmax.f32 %v221_v25, 0.0  ;;  %v223_v33 = vadd.f32 %v1749_v5, %v152_v26  ;;  %v154_v34 = vmul.f32 %v1744_v4, %v83_v22 }
  0x36   :  { %1658 = vmatprep.mubr.msk.bf16.mxu0 %vm323_vm1, %v302_v1  ;;  %1678 = vmatprep.mubr.msk.bf16.mxu1 %vm323_vm1, %v312_v44  ;;  %v257_v35 = vmax.f32 %v2069_v51, 0.0  ;;  %v318_v29 = vpack.c.bf16 %v283_v10, %v282_v23  ;;  %v286_v20 = vmax.f32 %v222_v30, 0.0  ;;  %v224_v36 = vadd.f32 %v1749_v5, %v153_v31 }
  0x37   :  { %v212_v60 = vadd.f32 %v1749_v5, %v141_v19  ;;  %v319_v37 = vpack.c.bf16 %v285_v32, %v284_v14  ;;  %v287_v1 = vmax.f32 %v223_v33, 0.0  ;;  %v225_v39 = vadd.f32 %v1749_v5, %v154_v34 }
  0x38   :  { %v313_v40 = vpack.c.bf16 %v273_v54, %v272_v9  ;;  %v213_v45 = vadd.f32 %v1749_v5, %v142_v47  ;;  %v214_v61 = vadd.f32 %v1749_v5, %v143_v55  ;;  %v288_v62 = vmax.f32 %v224_v36, 0.0 }
  0x39   :  { %v314_v4 = vpack.c.bf16 %v275_v16, %v274_v59  ;;  %v215_v51 = vadd.f32 %v1749_v5, %v144_v63  ;;  %v320_v2 = vpack.c.bf16 %v287_v1, %v286_v20  ;;  %v289_v3 = vmax.f32 %v225_v39, 0.0 }
  0x3a   :  { %v276_v9 = vmax.f32 %v212_v60, 0.0  ;;  %v277_v41 = vmax.f32 %v213_v45, 0.0  ;;  %v305_v42 = vpack.c.bf16 %v257_v35, %v256_v52  ;;  %v278_v43 = vmax.f32 %v214_v61, 0.0 }
  0x3b   :  { %v321_v19 = vpack.c.bf16 %v289_v3, %v288_v62 }
  0x3c   :  { %v315_v44 = vpack.c.bf16 %v277_v41, %v276_v9 }
  0x3d   :  { %1659 = vmatmul.mubr.msk.bf16.gmra.mrb[24].mxu0 %vm323_vm1, %v2055_v38  ;;  %1679 = vmatmul.mubr.msk.bf16.gmra.mrb[12].mxu1 %vm323_vm1, %v313_v40  ;;  %v279_v38 = vmax.f32 %v215_v51, 0.0 }
  0x3e   :  { %1662 = vmatprep.mubr.msk.bf16.mxu0 %vm323_vm1, %v2066_v50  ;;  %1682 = vmatprep.mubr.msk.bf16.mxu1 %vm323_vm1, %v314_v4 }
  0x3f   :  { %v316_v5 = vpack.c.bf16 %v279_v38, %v278_v43 }
  0x45   :  { %1663 = vmatmul.mubr.msk.bf16.gmra.mrb[28].mxu0 %vm323_vm1, %v305_v42  ;;  %1683 = vmatmul.mubr.msk.bf16.gmra.mrb[16].mxu1 %vm323_vm1, %v315_v44 }
  0x46   :  { %1686 = vmatprep.mubr.msk.bf16.mxu1 %vm323_vm1, %v316_v5 }
  0x4d   :  { %1687 = vmatmul.mubr.msk.bf16.gmra.mrb[20].mxu1 %vm323_vm1, %v317_v27 }
  0x4e   :  { %1690 = vmatprep.mubr.msk.bf16.mxu1 %vm323_vm1, %v318_v29 }
  0x55   :  { %1691 = vmatmul.mubr.msk.bf16.gmra.mrb[24].mxu1 %vm323_vm1, %v319_v37 }
  0x56   :  { %1694 = vmatprep.mubr.msk.bf16.mxu1 %vm323_vm1, %v320_v2 }
  0x5d   :  { %1695 = vmatmul.mubr.msk.bf16.gmra.mrb[28].mxu1 %vm323_vm1, %v321_v19 }
  0xe0   :  { %v1636_v28 = vpop.f32.mrb[0].mxu0 }
  0xe1   :  { %v458_v50 = vpop.f32.mrb[1].mxu0  ;;  %v1104_v55 = vmul.f32 %v1636_v28, %v1636_v28 }
  0xe2   :  { %v1637_v52 = vpop.f32.mrb[2].mxu0  ;;  %v1102_v48 = vmul.f32 %v458_v50, %v458_v50 }
  0xe3   :  { %v1416_v46 = vpack.c.bf16 %v1637_v52, %v1636_v28  ;;  %v461_v47 = vpop.f32.mrb[3].mxu0  ;;  %v1105_v58 = vmul.f32 %v1637_v52, %v1637_v52 }
  0xe4   :  { %v1411_v49 = vpack.c.bf16 %v461_v47, %v458_v50  ;;  %v1033_v53 = vadd.f32 %v461_v47, %v458_v50  ;;  %v1103_v54 = vmul.f32 %v461_v47, %v461_v47 }
  0xe5   :  { %1568 = vst [vmem:[%s2443_s4 + $0x8] sm:$0xff] %v1416_v46  }
  0xe6   :  { %1412 = vst [vmem:[%s2443_s4] sm:$0xff] %v1411_v49   ;;  %v1034_v56 = vadd.f32 %v1636_v28, %v1033_v53  ;;  %v1166_v57 = vadd.f32 %v1103_v54, %v1102_v48 }
  0xe8   :  { %v1167_v59 = vadd.f32 %v1166_v57, %v1104_v55  ;;  %v1640_v63 = vpop.f32.mrb[4].mxu0  ;;  %v1035_v0 = vadd.f32 %v1637_v52, %v1034_v56 }
  0xe9   :  { %v474_v6 = vpop.f32.mrb[5].mxu0  ;;  %v1108_v22 = vmul.f32 %v1640_v63, %v1640_v63 }
  0xea   :  { %v1036_v7 = vadd.f32 %v1035_v0, %v474_v6  ;;  %v1106_v8 = vmul.f32 %v474_v6, %v474_v6  ;;  %v1168_v11 = vadd.f32 %v1167_v59, %v1105_v58  ;;  %v1641_v12 = vpop.f32.mrb[6].mxu0 }
  0xeb   :  { %v1426_v13 = vpack.c.bf16 %v1641_v12, %v1640_v63  ;;  %v477_v15 = vpop.f32.mrb[7].mxu0  ;;  %v1109_v25 = vmul.f32 %v1641_v12, %v1641_v12 }
  0xec   :  { %v1169_v16 = vadd.f32 %v1168_v11, %v1106_v8  ;;  %v1421_v17 = vpack.c.bf16 %v477_v15, %v474_v6  ;;  %v1037_v18 = vadd.f32 %v1036_v7, %v477_v15  ;;  %v1107_v21 = vmul.f32 %v477_v15, %v477_v15 }
  0xed   :  { %1570 = vst [vmem:[%s2443_s4 + $0x18] sm:$0xff] %v1426_v13  }
  0xee   :  { %1569 = vst [vmem:[%s2443_s4 + $0x10] sm:$0xff] %v1421_v17   ;;  %v1038_v23 = vadd.f32 %v1640_v63, %v1037_v18  ;;  %v1170_v24 = vadd.f32 %v1169_v16, %v1107_v21 }
  0xf0   :  { %v1171_v26 = vadd.f32 %v1170_v24, %v1108_v22  ;;  %v1644_v27 = vpop.f32.mrb[8].mxu0  ;;  %v1039_v10 = vadd.f32 %v1641_v12, %v1038_v23 }
  0xf1   :  { %v490_v30 = vpop.f32.mrb[9].mxu0  ;;  %v1112_v37 = vmul.f32 %v1644_v27, %v1644_v27 }
  0xf2   :  { %v1040_v31 = vadd.f32 %v1039_v10, %v490_v30  ;;  %v1110_v14 = vmul.f32 %v490_v30, %v490_v30  ;;  %v1172_v32 = vadd.f32 %v1171_v26, %v1109_v25  ;;  %v1645_v33 = vpop.f32.mrb[10].mxu0 }
  0xf3   :  { %v1436_v34 = vpack.c.bf16 %v1645_v33, %v1644_v27  ;;  %v493_v35 = vpop.f32.mrb[11].mxu0  ;;  %v1113_v40 = vmul.f32 %v1645_v33, %v1645_v33 }
  0xf4   :  { %v1173_v29 = vadd.f32 %v1172_v32, %v1110_v14  ;;  %v1431_v20 = vpack.c.bf16 %v493_v35, %v490_v30  ;;  %v1041_v36 = vadd.f32 %v1040_v31, %v493_v35  ;;  %v1111_v60 = vmul.f32 %v493_v35, %v493_v35 }
  0xf5   :  { %1572 = vst [vmem:[%s2443_s4 + $0x28] sm:$0xff] %v1436_v34  }
  0xf6   :  { %1571 = vst [vmem:[%s2443_s4 + $0x20] sm:$0xff] %v1431_v20   ;;  %v1042_v1 = vadd.f32 %v1644_v27, %v1041_v36  ;;  %v1174_v39 = vadd.f32 %v1173_v29, %v1111_v60 }
  0xf8   :  { %v1175_v45 = vadd.f32 %v1174_v39, %v1112_v37  ;;  %v1648_v61 = vpop.f32.mrb[12].mxu0  ;;  %v1043_v62 = vadd.f32 %v1645_v33, %v1042_v1  ;;  %v2178_v42 = vpop.f32.mrb[0].mxu1 }
  0xf9   :  { %v506_v4 = vpop.f32.mrb[13].mxu0  ;;  %v2180_v28 = vpop.f32.mrb[1].mxu1  ;;  %v1116_v52 = vmul.f32 %v1648_v61, %v1648_v61 }
  0xfa   :  { %v1044_v51 = vadd.f32 %v1043_v62, %v506_v4  ;;  %v1114_v2 = vmul.f32 %v506_v4, %v506_v4  ;;  %v1176_v3 = vadd.f32 %v1175_v45, %v1113_v40  ;;  %v1649_v19 = vpop.f32.mrb[14].mxu0  ;;  %v2185_v50 = vpop.f32.mrb[2].mxu1 }
  0xfb   :  { %v1446_v9 = vpack.c.bf16 %v1649_v19, %v1648_v61  ;;  %v509_v41 = vpop.f32.mrb[15].mxu0  ;;  %v1496_v48 = vpack.c.bf16 %v2185_v50, %v2178_v42  ;;  %v2192_v49 = vpop.f32.mrb[3].mxu1  ;;  %v1117_v54 = vmul.f32 %v1649_v19, %v1649_v19 }
  0xfc   :  { %v1177_v43 = vadd.f32 %v1176_v3, %v1114_v2  ;;  %v1441_v38 = vpack.c.bf16 %v509_v41, %v506_v4  ;;  %v1045_v44 = vadd.f32 %v1044_v51, %v509_v41  ;;  %v1115_v5 = vmul.f32 %v509_v41, %v509_v41 }
  0xfd   :  { %1574 = vst [vmem:[%s2443_s4 + $0x38] sm:$0xff] %v1446_v9   ;;  %v1491_v53 = vpack.c.bf16 %v2192_v49, %v2180_v28  ;;  %1584 = vst [vmem:[%s2443_s4 + $0x88] sm:$0xff] %v1496_v48  }
  0xfe   :  { %1573 = vst [vmem:[%s2443_s4 + $0x30] sm:$0xff] %v1441_v38   ;;  %v1046_v46 = vadd.f32 %v1648_v61, %v1045_v44  ;;  %v1178_v47 = vadd.f32 %v1177_v43, %v1115_v5 }
  0xff   :  { %1583 = vst [vmem:[%s2443_s4 + $0x80] sm:$0xff] %v1491_v53  }
 0x100   :  { %v1179_v55 = vadd.f32 %v1178_v47, %v1116_v52  ;;  %v1652_v56 = vpop.f32.mrb[16].mxu0  ;;  %v1047_v57 = vadd.f32 %v1649_v19, %v1046_v46  ;;  %v2202_v11 = vpop.f32.mrb[4].mxu1 }
 0x101   :  { %v522_v58 = vpop.f32.mrb[17].mxu0  ;;  %v2204_v17 = vpop.f32.mrb[5].mxu1  ;;  %v1120_v21 = vmul.f32 %v1652_v56, %v1652_v56 }
 0x102   :  { %v1048_v59 = vadd.f32 %v1047_v57, %v522_v58  ;;  %v1118_v63 = vmul.f32 %v522_v58, %v522_v58  ;;  %v1180_v0 = vadd.f32 %v1179_v55, %v1117_v54  ;;  %v1653_v6 = vpop.f32.mrb[18].mxu0  ;;  %v2209_v18 = vpop.f32.mrb[6].mxu1 }
 0x103   :  { %v1456_v7 = vpack.c.bf16 %v1653_v6, %v1652_v56  ;;  %v525_v8 = vpop.f32.mrb[19].mxu0  ;;  %v1506_v24 = vpack.c.bf16 %v2209_v18, %v2202_v11  ;;  %v2216_v25 = vpop.f32.mrb[7].mxu1  ;;  %v1121_v27 = vmul.f32 %v1653_v6, %v1653_v6 }
 0x104   :  { %v1181_v12 = vadd.f32 %v1180_v0, %v1118_v63  ;;  %v1451_v13 = vpack.c.bf16 %v525_v8, %v522_v58  ;;  %v1049_v15 = vadd.f32 %v1048_v59, %v525_v8  ;;  %v1119_v16 = vmul.f32 %v525_v8, %v525_v8 }
 0x105   :  { %1576 = vst [vmem:[%s2443_s4 + $0x48] sm:$0xff] %v1456_v7   ;;  %v1501_v26 = vpack.c.bf16 %v2216_v25, %v2204_v17  ;;  %1586 = vst [vmem:[%s2443_s4 + $0x98] sm:$0xff] %v1506_v24  }
 0x106   :  { %1575 = vst [vmem:[%s2443_s4 + $0x40] sm:$0xff] %v1451_v13   ;;  %v1050_v22 = vadd.f32 %v1652_v56, %v1049_v15  ;;  %v1182_v23 = vadd.f32 %v1181_v12, %v1119_v16 }
 0x107   :  { %1585 = vst [vmem:[%s2443_s4 + $0x90] sm:$0xff] %v1501_v26  }
 0x108   :  { %v1183_v10 = vadd.f32 %v1182_v23, %v1120_v21  ;;  %v1656_v30 = vpop.f32.mrb[20].mxu0  ;;  %v1051_v31 = vadd.f32 %v1653_v6, %v1050_v22  ;;  %v2226_v36 = vpop.f32.mrb[8].mxu1 }
 0x109   :  { %v538_v14 = vpop.f32.mrb[21].mxu0  ;;  %v2228_v40 = vpop.f32.mrb[9].mxu1  ;;  %v1124_v61 = vmul.f32 %v1656_v30, %v1656_v30 }
 0x10a   :  { %v1052_v32 = vadd.f32 %v1051_v31, %v538_v14  ;;  %v1122_v33 = vmul.f32 %v538_v14, %v538_v14  ;;  %v1184_v34 = vadd.f32 %v1183_v10, %v1121_v27  ;;  %v1657_v35 = vpop.f32.mrb[22].mxu0  ;;  %v2233_v45 = vpop.f32.mrb[10].mxu1 }
 0x10b   :  { %v1466_v29 = vpack.c.bf16 %v1657_v35, %v1656_v30  ;;  %v541_v20 = vpop.f32.mrb[23].mxu0  ;;  %v1516_v51 = vpack.c.bf16 %v2233_v45, %v2226_v36  ;;  %v2240_v2 = vpop.f32.mrb[11].mxu1  ;;  %v1125_v19 = vmul.f32 %v1657_v35, %v1657_v35 }
 0x10c   :  { %v1185_v60 = vadd.f32 %v1184_v34, %v1122_v33  ;;  %v1461_v37 = vpack.c.bf16 %v541_v20, %v538_v14  ;;  %v1053_v1 = vadd.f32 %v1052_v32, %v541_v20  ;;  %v1123_v39 = vmul.f32 %v541_v20, %v541_v20 }
 0x10d   :  { %1578 = vst [vmem:[%s2443_s4 + $0x58] sm:$0xff] %v1466_v29   ;;  %v1511_v3 = vpack.c.bf16 %v2240_v2, %v2228_v40  ;;  %1588 = vst [vmem:[%s2443_s4 + $0xa8] sm:$0xff] %v1516_v51  }
 0x10e   :  { %1577 = vst [vmem:[%s2443_s4 + $0x50] sm:$0xff] %v1461_v37   ;;  %v1054_v62 = vadd.f32 %v1656_v30, %v1053_v1  ;;  %v1186_v4 = vadd.f32 %v1185_v60, %v1123_v39 }
 0x10f   :  { %1587 = vst [vmem:[%s2443_s4 + $0xa0] sm:$0xff] %v1511_v3   ;;  %v1134_v3 = vmul.f32 %v2180_v28, %v2180_v28 }
 0x110   :  { %v1187_v9 = vadd.f32 %v1186_v4, %v1124_v61  ;;  %v1660_v41 = vpop.f32.mrb[24].mxu0  ;;  %v1055_v43 = vadd.f32 %v1657_v35, %v1054_v62  ;;  %v2250_v53 = vpop.f32.mrb[12].mxu1 }
 0x111   :  { %v554_v38 = vpop.f32.mrb[25].mxu0  ;;  %v2252_v58 = vpop.f32.mrb[13].mxu1  ;;  %v1128_v63 = vmul.f32 %v1660_v41, %v1660_v41 }
 0x112   :  { %v1056_v44 = vadd.f32 %v1055_v43, %v554_v38  ;;  %v1126_v5 = vmul.f32 %v554_v38, %v554_v38  ;;  %v1188_v52 = vadd.f32 %v1187_v9, %v1125_v19  ;;  %v1661_v46 = vpop.f32.mrb[26].mxu0  ;;  %v2257_v59 = vpop.f32.mrb[14].mxu1 }
 0x113   :  { %v1476_v47 = vpack.c.bf16 %v1661_v46, %v1660_v41  ;;  %v557_v48 = vpop.f32.mrb[27].mxu0  ;;  %v1526_v7 = vpack.c.bf16 %v2257_v59, %v2250_v53  ;;  %v2264_v8 = vpop.f32.mrb[15].mxu1  ;;  %v1129_v13 = vmul.f32 %v1661_v46, %v1661_v46 }
 0x114   :  { %v1189_v54 = vadd.f32 %v1188_v52, %v1126_v5  ;;  %v1471_v55 = vpack.c.bf16 %v557_v48, %v554_v38  ;;  %v1057_v56 = vadd.f32 %v1056_v44, %v557_v48  ;;  %v1127_v57 = vmul.f32 %v557_v48, %v557_v48 }
 0x115   :  { %1580 = vst [vmem:[%s2443_s4 + $0x68] sm:$0xff] %v1476_v47   ;;  %v1521_v12 = vpack.c.bf16 %v2264_v8, %v2252_v58  ;;  %1590 = vst [vmem:[%s2443_s4 + $0xb8] sm:$0xff] %v1526_v7   ;;  %v1135_v44 = vmul.f32 %v2192_v49, %v2192_v49 }
 0x116   :  { %1579 = vst [vmem:[%s2443_s4 + $0x60] sm:$0xff] %v1471_v55   ;;  %v1058_v0 = vadd.f32 %v1660_v41, %v1057_v56  ;;  %v1190_v6 = vadd.f32 %v1189_v54, %v1127_v57 }
 0x117   :  { %1589 = vst [vmem:[%s2443_s4 + $0xb0] sm:$0xff] %v1521_v12  }
 0x118   :  { %v1191_v15 = vadd.f32 %v1190_v6, %v1128_v63  ;;  %v1664_v16 = vpop.f32.mrb[28].mxu0  ;;  %v1059_v21 = vadd.f32 %v1661_v46, %v1058_v0  ;;  %v2274_v31 = vpop.f32.mrb[16].mxu1  ;;  %v1136_v46 = vmul.f32 %v2178_v42, %v2178_v42  ;;  %v1138_v63 = vmul.f32 %v2204_v17, %v2204_v17 }
 0x119   :  { %v570_v22 = vpop.f32.mrb[29].mxu0  ;;  %v2276_v35 = vpop.f32.mrb[17].mxu1  ;;  %v1132_v20 = vmul.f32 %v1664_v16, %v1664_v16 }
 0x11a   :  { %v1060_v23 = vadd.f32 %v1059_v21, %v570_v22  ;;  %v1130_v24 = vmul.f32 %v570_v22, %v570_v22  ;;  %v1192_v26 = vadd.f32 %v1191_v15, %v1129_v13  ;;  %v1665_v27 = vpop.f32.mrb[30].mxu0  ;;  %v2281_v29 = vpop.f32.mrb[18].mxu1 }
 0x11b   :  { %v1486_v10 = vpack.c.bf16 %v1665_v27, %v1664_v16  ;;  %v573_v30 = vpop.f32.mrb[31].mxu0  ;;  %v1536_v1 = vpack.c.bf16 %v2281_v29, %v2274_v31  ;;  %v2288_v39 = vpop.f32.mrb[19].mxu1  ;;  %v1133_v62 = vmul.f32 %v1665_v27, %v1665_v27 }
 0x11c   :  { %v1193_v14 = vadd.f32 %v1192_v26, %v1130_v24  ;;  %v1481_v32 = vpack.c.bf16 %v573_v30, %v570_v22  ;;  %v1061_v33 = vadd.f32 %v1060_v23, %v573_v30  ;;  %v1131_v34 = vmul.f32 %v573_v30, %v573_v30 }
 0x11d   :  { %1582 = vst [vmem:[%s2443_s4 + $0x78] sm:$0xff] %v1486_v10   ;;  %v1531_v61 = vpack.c.bf16 %v2288_v39, %v2276_v35  ;;  %1592 = vst [vmem:[%s2443_s4 + $0xc8] sm:$0xff] %v1536_v1   ;;  %v1142_v10 = vmul.f32 %v2228_v40, %v2228_v40 }
 0x11e   :  { %1581 = vst [vmem:[%s2443_s4 + $0x70] sm:$0xff] %v1481_v32   ;;  %v1062_v60 = vadd.f32 %v1664_v16, %v1061_v33  ;;  %v1194_v37 = vadd.f32 %v1193_v14, %v1131_v34  ;;  %v1140_v16 = vmul.f32 %v2202_v11, %v2202_v11 }
 0x11f   :  { %1591 = vst [vmem:[%s2443_s4 + $0xc0] sm:$0xff] %v1531_v61  }
 0x120   :  { %v1195_v4 = vadd.f32 %v1194_v37, %v1132_v20  ;;  %v1063_v51 = vadd.f32 %v1665_v27, %v1062_v60  ;;  %v2301_v41 = vpop.f32.mrb[20].mxu1  ;;  %v1144_v60 = vmul.f32 %v2226_v36, %v2226_v36 }
 0x121   :  { %v2306_v5 = vpop.f32.mrb[21].mxu1 }
 0x122   :  { %v1064_v19 = vadd.f32 %v1063_v51, %v2180_v28  ;;  %v1196_v9 = vadd.f32 %v1195_v4, %v1133_v62  ;;  %v2308_v52 = vpop.f32.mrb[22].mxu1  ;;  %v1145_v4 = vmul.f32 %v2233_v45, %v2233_v45 }
 0x123   :  { %v1546_v28 = vpack.c.bf16 %v2308_v52, %v2301_v41  ;;  %v2315_v54 = vpop.f32.mrb[23].mxu1 }
 0x124   :  { %v1197_v43 = vadd.f32 %v1196_v9, %v1134_v3  ;;  %v1065_v38 = vadd.f32 %v1064_v19, %v2192_v49  ;;  %v1541_v55 = vpack.c.bf16 %v2315_v54, %v2306_v5  ;;  %v1137_v49 = vmul.f32 %v2185_v50, %v2185_v50 }
 0x125   :  { %1594 = vst [vmem:[%s2443_s4 + $0xd8] sm:$0xff] %v1546_v28   ;;  %v1146_v3 = vmul.f32 %v2252_v58, %v2252_v58 }
 0x126   :  { %v1066_v47 = vadd.f32 %v2178_v42, %v1065_v38  ;;  %v1198_v48 = vadd.f32 %v1197_v43, %v1135_v44  ;;  %1593 = vst [vmem:[%s2443_s4 + $0xd0] sm:$0xff] %v1541_v55   ;;  %v1148_v38 = vmul.f32 %v2250_v53, %v2250_v53 }
 0x128   :  { %v1199_v56 = vadd.f32 %v1198_v48, %v1136_v46  ;;  %v1067_v57 = vadd.f32 %v2185_v50, %v1066_v47  ;;  %v2331_v6 = vpop.f32.mrb[24].mxu1  ;;  %v1139_v50 = vmul.f32 %v2216_v25, %v2216_v25  ;;  %v1149_v47 = vmul.f32 %v2257_v59, %v2257_v59 }
 0x129   :  { %v2336_v13 = vpop.f32.mrb[25].mxu1 }
 0x12a   :  { %v1068_v42 = vadd.f32 %v1067_v57, %v2204_v17  ;;  %v1200_v0 = vadd.f32 %v1199_v56, %v1137_v49  ;;  %v2338_v15 = vpop.f32.mrb[26].mxu1  ;;  %v1151_v57 = vmul.f32 %v2288_v39, %v2288_v39 }
 0x12b   :  { %v1556_v17 = vpack.c.bf16 %v2338_v15, %v2331_v6  ;;  %v2345_v23 = vpop.f32.mrb[27].mxu1 }
 0x12c   :  { %v1201_v7 = vadd.f32 %v1200_v0, %v1138_v63  ;;  %v1069_v12 = vadd.f32 %v1068_v42, %v2216_v25  ;;  %v1551_v24 = vpack.c.bf16 %v2345_v23, %v2336_v13  ;;  %v1141_v25 = vmul.f32 %v2209_v18, %v2209_v18 }
 0x12d   :  { %1596 = vst [vmem:[%s2443_s4 + $0xe8] sm:$0xff] %v1556_v17  }
 0x12e   :  { %v1070_v21 = vadd.f32 %v2202_v11, %v1069_v12  ;;  %v1202_v22 = vadd.f32 %v1201_v7, %v1139_v50  ;;  %1595 = vst [vmem:[%s2443_s4 + $0xe0] sm:$0xff] %v1551_v24  }
 0x130   :  { %v1203_v26 = vadd.f32 %v1202_v22, %v1140_v16  ;;  %v1071_v27 = vadd.f32 %v2209_v18, %v1070_v21  ;;  %v2361_v14 = vpop.f32.mrb[28].mxu1  ;;  %v1143_v18 = vmul.f32 %v2240_v2, %v2240_v2  ;;  %v1155_v21 = vmul.f32 %v2315_v54, %v2315_v54 }
 0x131   :  { %v698_v34 = vpop.f32.mrb[29].mxu1 }
 0x132   :  { %v1072_v11 = vadd.f32 %v1071_v27, %v2228_v40  ;;  %v1204_v30 = vadd.f32 %v1203_v26, %v1141_v25  ;;  %v2366_v20 = vpop.f32.mrb[30].mxu1 }
 0x133   :  { %v1566_v40 = vpack.c.bf16 %v2366_v20, %v2361_v14  ;;  %v701_v61 = vpop.f32.mrb[31].mxu1 }
 0x134   :  { %v1205_v32 = vadd.f32 %v1204_v30, %v1142_v10  ;;  %v1073_v33 = vadd.f32 %v1072_v11, %v2240_v2  ;;  %v1561_v62 = vpack.c.bf16 %v701_v61, %v698_v34  ;;  %v1159_v11 = vmul.f32 %v2345_v23, %v2345_v23 }
 0x135   :  { %1598 = vst [vmem:[%s2443_s4 + $0xf8] sm:$0xff] %v1566_v40  }
 0x136   :  { %v1074_v37 = vadd.f32 %v2226_v36, %v1073_v33  ;;  %v1206_v1 = vadd.f32 %v1205_v32, %v1143_v18  ;;  %1597 = vst [vmem:[%s2443_s4 + $0xf0] sm:$0xff] %v1561_v62   ;;  %v1163_v62 = vmul.f32 %v701_v61, %v701_v61 }
 0x138   :  { %v1207_v51 = vadd.f32 %v1206_v1, %v1144_v60  ;;  %v1075_v2 = vadd.f32 %v2233_v45, %v1074_v37  ;;  %v1147_v45 = vmul.f32 %v2264_v8, %v2264_v8 }
 0x13a   :  { %v1076_v36 = vadd.f32 %v1075_v2, %v2252_v58  ;;  %v1208_v19 = vadd.f32 %v1207_v51, %v1145_v4  ;;  %v1150_v58 = vmul.f32 %v2276_v35, %v2276_v35 }
 0x13c   :  { %v1209_v9 = vadd.f32 %v1208_v19, %v1146_v3  ;;  %v1077_v43 = vadd.f32 %v1076_v36, %v2264_v8 }
 0x13e   :  { %v1078_v44 = vadd.f32 %v2250_v53, %v1077_v43  ;;  %v1210_v46 = vadd.f32 %v1209_v9, %v1147_v45  ;;  %v1152_v53 = vmul.f32 %v2274_v31, %v2274_v31 }
 0x140   :  { %v1211_v48 = vadd.f32 %v1210_v46, %v1148_v38  ;;  %v1079_v28 = vadd.f32 %v2257_v59, %v1078_v44  ;;  %v1153_v59 = vmul.f32 %v2281_v29, %v2281_v29 }
 0x142   :  { %v1080_v55 = vadd.f32 %v1079_v28, %v2276_v35  ;;  %v1212_v49 = vadd.f32 %v1211_v48, %v1149_v47  ;;  %v1154_v35 = vmul.f32 %v2306_v5, %v2306_v5 }
 0x144   :  { %v1213_v56 = vadd.f32 %v1212_v49, %v1150_v58  ;;  %v1081_v8 = vadd.f32 %v1080_v55, %v2288_v39 }
 0x146   :  { %v1082_v63 = vadd.f32 %v2274_v31, %v1081_v8  ;;  %v1214_v42 = vadd.f32 %v1213_v56, %v1151_v57  ;;  %v1156_v31 = vmul.f32 %v2301_v41, %v2301_v41 }
 0x148   :  { %v1215_v0 = vadd.f32 %v1214_v42, %v1152_v53  ;;  %v1083_v7 = vadd.f32 %v2281_v29, %v1082_v63  ;;  %v1157_v29 = vmul.f32 %v2308_v52, %v2308_v52 }
 0x14a   :  { %v1084_v12 = vadd.f32 %v1083_v7, %v2306_v5  ;;  %v1216_v50 = vadd.f32 %v1215_v0, %v1153_v59  ;;  %v1158_v5 = vmul.f32 %v2336_v13, %v2336_v13 }
 0x14c   :  { %v1217_v16 = vadd.f32 %v1216_v50, %v1154_v35  ;;  %v1085_v39 = vadd.f32 %v1084_v12, %v2315_v54 }
 0x14e   :  { %v1086_v22 = vadd.f32 %v2301_v41, %v1085_v39  ;;  %v1218_v17 = vadd.f32 %v1217_v16, %v1155_v21  ;;  %v1160_v41 = vmul.f32 %v2331_v6, %v2331_v6 }
 0x150   :  { %v1219_v24 = vadd.f32 %v1218_v17, %v1156_v31  ;;  %v1087_v25 = vadd.f32 %v2308_v52, %v1086_v22  ;;  %v1161_v52 = vmul.f32 %v2338_v15, %v2338_v15 }
 0x152   :  { %v1088_v26 = vadd.f32 %v1087_v25, %v2336_v13  ;;  %v1220_v27 = vadd.f32 %v1219_v24, %v1157_v29  ;;  %v1162_v13 = vmul.f32 %v698_v34, %v698_v34 }
 0x154   :  { %v1221_v10 = vadd.f32 %v1220_v27, %v1158_v5  ;;  %v1089_v54 = vadd.f32 %v1088_v26, %v2345_v23  ;;  %v1164_v23 = vmul.f32 %v2361_v14, %v2361_v14 }
 0x156   :  { %v1090_v30 = vadd.f32 %v2331_v6, %v1089_v54  ;;  %v1222_v32 = vadd.f32 %v1221_v10, %v1159_v11  ;;  %v1165_v6 = vmul.f32 %v2366_v20, %v2366_v20 }
 0x158   :  { %v1223_v33 = vadd.f32 %v1222_v32, %v1160_v41  ;;  %v1091_v18 = vadd.f32 %v2338_v15, %v1090_v30 }
 0x15a   :  { %v1092_v60 = vadd.f32 %v1091_v18, %v698_v34  ;;  %v1224_v37 = vadd.f32 %v1223_v33, %v1161_v52 }
 0x15c   :  { %v1225_v1 = vadd.f32 %v1224_v37, %v1162_v13  ;;  %v1093_v40 = vadd.f32 %v1092_v60, %v701_v61 }
 0x15e   :  { %v1094_v4 = vadd.f32 %v2361_v14, %v1093_v40  ;;  %v1226_v51 = vadd.f32 %v1225_v1, %v1163_v62 }
 0x160   :  { %v1095_v2 = vadd.f32 %v2366_v20, %v1094_v4  ;;  %v1227_v3 = vadd.f32 %v1226_v51, %v1164_v23 }
 0x162   :  { %v1096_v36 = vrot.slane %v1095_v2, 4  ;;  %v1228_v15 = vadd.f32 %v1227_v3, %v1165_v6 }
 0x164   :  { %v1097_v19 = vadd.f32 %v1096_v36, %v1095_v2  ;;  %v1229_v34 = vrot.slane %v1228_v15, 4 }
 0x166   :  { %v1098_v9 = vrot.slane %v1097_v19, 2  ;;  %v1230_v43 = vadd.f32 %v1229_v34, %v1228_v15 }
 0x168   :  { %v1099_v45 = vadd.f32 %v1098_v9, %v1097_v19  ;;  %v1231_v61 = vrot.slane %v1230_v43, 2 }
 0x16a   :  { %v1100_v38 = vrot.slane %v1099_v45, 1  ;;  %v1232_v44 = vadd.f32 %v1231_v61, %v1230_v43 }
 0x16c   :  { %v1233_v46 = vrot.slane %v1232_v44, 1  ;;  %v1101_v14 = vadd.f32 %v1100_v38, %v1099_v45 }
 0x16e   :  { %v1234_v47 = vadd.f32 %v1233_v46, %v1232_v44 }
 0x170   :  { %v1236_v48 = vsel %vm1235_vm2, %v1101_v14, %v1234_v47 }
 0x171   :  { %1237 = vst [vmem:[%s2444_s5] sm:$0x3] %v1236_v48 }

// kernel: preact_bottleneck_forward.9
= control target key start
LH: loop header
LB: loop body
LE: loop exit
PB: predicated region body
PF: predicated region fallthrough
CT: control target
= control target key end

     0   :  { %vm804_vm0 = vcmask 130048   ;;  %s1931_s3 = inlined_call_operand.vmem [shape: bf16[128,16], index: 3, kind: input, shape index: {}]   ;;  %s1932_s0 = inlined_call_operand.vmem [shape: bf16[512,128], index: 0, kind: input, shape index: {}]   ;;  %s1933_s1 = inlined_call_operand.vmem [shape: f32[1,128], index: 1, kind: input, shape index: {}]   ;;  %s1934_s2 = inlined_call_operand.vmem [shape: f32[1,128], index: 2, kind: input, shape index: {}]   ;;  %s1935_s4 = inlined_call_operand.vmem [shape: f32[512,16], index: 4, kind: input, shape index: {}]   ;;  %s1936_s5 = inlined_call_operand.vmem [shape: f32[512,16], index: 5, kind: output, shape index: {}]  }
   0x1   :  { %v1178_v0 = vld [vmem:[%s1931_s3] sm:$0xff]   ;;  %v1179_v1 = vld [vmem:[%s1931_s3 + $0x8] sm:$0xff]   ;;  %v1180_v2 = vld [vmem:[%s1931_s3 + $0x10] sm:$0xff]  }
   0x2   :  { %1082 = vmatprep.subr.bf16.mxu0 %v1178_v0  ;;  %1162 = vmatprep.subr.bf16.mxu1 %v1178_v0  ;;  %v1181_v3 = vld [vmem:[%s1931_s3 + $0x18] sm:$0xff]   ;;  %v884_v4 = vld [vmem:[%s1932_s0] sm:$0xff]   ;;  %v1011_v9 = vld [vmem:[%s1932_s0 + $0x8] sm:$0xff]  }
   0x3   :  { %1083 = vmatpush3.bf16.msra.mxu0 %v1178_v0  ;;  %1170 = vmatpush3.bf16.msra.mxu1 %v1178_v0  ;;  %v1234_v5 = vld [vmem:[%s1933_s1] ss:$0 sm:$0xff]  ;;  %v885_v6 = vunpack.c.l.bf16 %v884_v4  ;;  %v886_v7 = vunpack.c.h.bf16 %v884_v4  ;;  %v1027_v10 = vld [vmem:[%s1932_s0 + $0x88] sm:$0xff]   ;;  %v889_v14 = vunpack.c.l.bf16 %v1011_v9  ;;  %v890_v15 = vunpack.c.h.bf16 %v1011_v9  ;;  %v1012_v16 = vld [vmem:[%s1932_s0 + $0x10] sm:$0xff]  }
   0x4   :  { %1084 = vmatprep.subr.bf16.mxu0 %v1179_v1  ;;  %1163 = vmatprep.subr.bf16.mxu1 %v1179_v1  ;;  %v1026_v8 = vld [vmem:[%s1932_s0 + $0x80] sm:$0xff]   ;;  %v953_v19 = vunpack.c.l.bf16 %v1027_v10  ;;  %v954_v20 = vunpack.c.h.bf16 %v1027_v10  ;;  %v893_v25 = vunpack.c.l.bf16 %v1012_v16  ;;  %v1028_v38 = vld [vmem:[%s1932_s0 + $0x90] sm:$0xff]   ;;  %v1183_v39 = vld [vmem:[%s1931_s3 + $0x28] sm:$0xff]   ;;  %v894_v48 = vunpack.c.h.bf16 %v1012_v16 }
   0x5   :  { %v1248_v11 = vld [vmem:[%s1934_s2] ss:$0 sm:$0xff]  ;;  %v949_v12 = vunpack.c.l.bf16 %v1026_v8  ;;  %v950_v13 = vunpack.c.h.bf16 %v1026_v8  ;;  %v156_v17 = vmul.f32 %v885_v6, %v1234_v5  ;;  %v157_v18 = vmul.f32 %v886_v7, %v1234_v5  ;;  %v1013_v44 = vld [vmem:[%s1932_s0 + $0x18] sm:$0xff]   ;;  %v1184_v58 = vld [vmem:[%s1931_s3 + $0x30] sm:$0xff]  }
   0x6   :  { %v1182_v21 = vld [vmem:[%s1931_s3 + $0x20] sm:$0xff]   ;;  %v158_v24 = vmul.f32 %v889_v14, %v1234_v5  ;;  %v159_v28 = vmul.f32 %v890_v15, %v1234_v5  ;;  %v190_v29 = vmul.f32 %v953_v19, %v1234_v5  ;;  %v191_v33 = vmul.f32 %v954_v20, %v1234_v5  ;;  %v1029_v53 = vld [vmem:[%s1932_s0 + $0x98] sm:$0xff]  }
   0x7   :  { %1085 = vmatpush3.bf16.msra.mxu0 %v1179_v1  ;;  %1171 = vmatpush3.bf16.msra.mxu1 %v1179_v1  ;;  %v188_v22 = vmul.f32 %v949_v12, %v1234_v5  ;;  %v189_v23 = vmul.f32 %v950_v13, %v1234_v5  ;;  %v227_v26 = vadd.f32 %v1248_v11, %v156_v17  ;;  %v957_v52 = vunpack.c.l.bf16 %v1028_v38  ;;  %v1185_v14 = vld [vmem:[%s1931_s3 + $0x38] sm:$0xff]   ;;  %v1030_v19 = vld [vmem:[%s1932_s0 + $0xa0] sm:$0xff]  }
   0x8   :  { %1086 = vmatprep.subr.bf16.mxu0 %v1180_v2  ;;  %1164 = vmatprep.subr.bf16.mxu1 %v1180_v2  ;;  %v228_v27 = vadd.f32 %v1248_v11, %v157_v18  ;;  %v229_v32 = vadd.f32 %v1248_v11, %v158_v24  ;;  %v230_v36 = vadd.f32 %v1248_v11, %v159_v28  ;;  %v958_v56 = vunpack.c.h.bf16 %v1028_v38  ;;  %v1015_v28 = vld [vmem:[%s1932_s0 + $0x28] sm:$0xff]  }
   0x9   :  { %v259_v30 = vadd.f32 %v1248_v11, %v188_v22  ;;  %v260_v31 = vadd.f32 %v1248_v11, %v189_v23  ;;  %v291_v34 = vmax.f32 %v227_v26, 0.0  ;;  %v261_v37 = vadd.f32 %v1248_v11, %v190_v29 }
   0xa   :  { %v292_v35 = vmax.f32 %v228_v27, 0.0  ;;  %v293_v42 = vmax.f32 %v229_v32, 0.0  ;;  %v262_v43 = vadd.f32 %v1248_v11, %v191_v33  ;;  %v294_v46 = vmax.f32 %v230_v36, 0.0  ;;  %v1031_v33 = vld [vmem:[%s1932_s0 + $0xa8] sm:$0xff]  }
   0xb   :  { %1087 = vmatpush3.bf16.msra.mxu0 %v1180_v2  ;;  %1172 = vmatpush3.bf16.msra.mxu1 %v1180_v2  ;;  %v323_v40 = vmax.f32 %v259_v30, 0.0  ;;  %v324_v41 = vmax.f32 %v260_v31, 0.0  ;;  %v325_v47 = vmax.f32 %v261_v37, 0.0  ;;  %v160_v51 = vmul.f32 %v893_v25, %v1234_v5 }
   0xc   :  { %1088 = vmatprep.subr.bf16.mxu0 %v1181_v3  ;;  %1165 = vmatprep.subr.bf16.mxu1 %v1181_v3  ;;  %v355_v45 = vpack.c.bf16 %v292_v35, %v291_v34  ;;  %v326_v50 = vmax.f32 %v262_v43, 0.0  ;;  %v1285_v54 = vpack.c.bf16 %v294_v46, %v293_v42  ;;  %v161_v55 = vmul.f32 %v894_v48, %v1234_v5  ;;  %v1016_v42 = vld [vmem:[%s1932_s0 + $0x30] sm:$0xff]  }
   0xd   :  { %v371_v49 = vpack.c.bf16 %v324_v41, %v323_v40  ;;  %v897_v57 = vunpack.c.l.bf16 %v1013_v44  ;;  %v231_v60 = vadd.f32 %v1248_v11, %v160_v51  ;;  %v192_v61 = vmul.f32 %v957_v52, %v1234_v5 }
   0xe   :  { %v1291_v59 = vpack.c.bf16 %v326_v50, %v325_v47  ;;  %v898_v62 = vunpack.c.h.bf16 %v1013_v44  ;;  %1098 = vmatprep.mubr.bf16.mxu0 %v355_v45  ;;  %v232_v63 = vadd.f32 %v1248_v11, %v161_v55  ;;  %v193_v0 = vmul.f32 %v958_v56, %v1234_v5 }
   0xf   :  { %1089 = vmatpush3.bf16.msra.mxu0 %v1181_v3  ;;  %1173 = vmatpush3.bf16.msra.mxu1 %v1181_v3  ;;  %v162_v1 = vmul.f32 %v897_v57, %v1234_v5  ;;  %v961_v2 = vunpack.c.l.bf16 %v1029_v53  ;;  %v1014_v3 = vld [vmem:[%s1932_s0 + $0x20] sm:$0xff]   ;;  %v295_v4 = vmax.f32 %v231_v60, 0.0  ;;  %v263_v6 = vadd.f32 %v1248_v11, %v192_v61  ;;  %v1032_v61 = vld [vmem:[%s1932_s0 + $0xb0] sm:$0xff]  }
  0x10   :  { %1090 = vmatprep.subr.bf16.mxu0 %v1182_v21  ;;  %1166 = vmatprep.subr.bf16.mxu1 %v1182_v21  ;;  %v163_v7 = vmul.f32 %v898_v62, %v1234_v5  ;;  %v962_v8 = vunpack.c.h.bf16 %v1029_v53  ;;  %v296_v9 = vmax.f32 %v232_v63, 0.0  ;;  %v264_v10 = vadd.f32 %v1248_v11, %v193_v0 }
  0x11   :  { %1130 = vmatprep.mubr.bf16.mxu1 %v371_v49  ;;  %v233_v12 = vadd.f32 %v1248_v11, %v162_v1  ;;  %v194_v13 = vmul.f32 %v961_v2, %v1234_v5  ;;  %v327_v15 = vmax.f32 %v263_v6, 0.0  ;;  %v901_v18 = vunpack.c.l.bf16 %v1014_v3  ;;  %v1017_v2 = vld [vmem:[%s1932_s0 + $0x38] sm:$0xff]  }
  0x12   :  { %v234_v16 = vadd.f32 %v1248_v11, %v163_v7  ;;  %v195_v17 = vmul.f32 %v962_v8, %v1234_v5  ;;  %v357_v20 = vpack.c.bf16 %v296_v9, %v295_v4  ;;  %v902_v26 = vunpack.c.h.bf16 %v1014_v3 }
  0x13   :  { %1091 = vmatpush3.bf16.msra.mxu0 %v1182_v21  ;;  %1174 = vmatpush3.bf16.msra.mxu1 %v1182_v21  ;;  %v328_v21 = vmax.f32 %v264_v10, 0.0  ;;  %v297_v22 = vmax.f32 %v233_v12, 0.0  ;;  %v265_v23 = vadd.f32 %v1248_v11, %v194_v13  ;;  %v164_v27 = vmul.f32 %v901_v18, %v1234_v5 }
  0x14   :  { %1092 = vmatprep.subr.bf16.mxu0 %v1183_v39  ;;  %1167 = vmatprep.subr.bf16.mxu1 %v1183_v39  ;;  %v298_v24 = vmax.f32 %v234_v16, 0.0  ;;  %v266_v25 = vadd.f32 %v1248_v11, %v195_v17  ;;  %v965_v31 = vunpack.c.l.bf16 %v1030_v19  ;;  %v966_v32 = vunpack.c.h.bf16 %v1030_v19 }
  0x15   :  { %v373_v29 = vpack.c.bf16 %v328_v21, %v327_v15  ;;  %v329_v30 = vmax.f32 %v265_v23, 0.0  ;;  %v165_v36 = vmul.f32 %v902_v26, %v1234_v5  ;;  %v235_v37 = vadd.f32 %v1248_v11, %v164_v27  ;;  %v1033_v15 = vld [vmem:[%s1932_s0 + $0xb8] sm:$0xff]  }
  0x16   :  { %v1323_v34 = vpack.c.bf16 %v298_v24, %v297_v22  ;;  %v330_v35 = vmax.f32 %v266_v25, 0.0  ;;  %v196_v38 = vmul.f32 %v965_v31, %v1234_v5  ;;  %v905_v40 = vunpack.c.l.bf16 %v1015_v28 }
  0x17   :  { %1093 = vmatpush3.bf16.msra.mxu0 %v1183_v39  ;;  %1175 = vmatpush3.bf16.msra.mxu1 %v1183_v39  ;;  %v197_v39 = vmul.f32 %v966_v32, %v1234_v5  ;;  %v906_v41 = vunpack.c.h.bf16 %v1015_v28  ;;  %v236_v44 = vadd.f32 %v1248_v11, %v165_v36  ;;  %v299_v45 = vmax.f32 %v235_v37, 0.0 }
  0x18   :  { %1094 = vmatprep.subr.bf16.mxu0 %v1184_v58  ;;  %1168 = vmatprep.subr.bf16.mxu1 %v1184_v58  ;;  %v374_v43 = vpack.c.bf16 %v330_v35, %v329_v30  ;;  %v969_v46 = vunpack.c.l.bf16 %v1031_v33  ;;  %v267_v47 = vadd.f32 %v1248_v11, %v196_v38  ;;  %v166_v49 = vmul.f32 %v905_v40, %v1234_v5 }
  0x19   :  { %v268_v48 = vadd.f32 %v1248_v11, %v197_v39  ;;  %v970_v50 = vunpack.c.h.bf16 %v1031_v33  ;;  %v300_v51 = vmax.f32 %v236_v44, 0.0  ;;  %v167_v52 = vmul.f32 %v906_v41, %v1234_v5  ;;  %v1034_v33 = vld [vmem:[%s1932_s0 + $0xc0] sm:$0xff]  }
  0x1a   :  { %v198_v53 = vmul.f32 %v969_v46, %v1234_v5  ;;  %v909_v55 = vunpack.c.l.bf16 %v1016_v42  ;;  %v331_v56 = vmax.f32 %v267_v47, 0.0  ;;  %v910_v1 = vunpack.c.h.bf16 %v1016_v42 }
  0x1b   :  { %1095 = vmatpush3.bf16.msra.mxu0 %v1184_v58  ;;  %1176 = vmatpush3.bf16.msra.mxu1 %v1184_v58  ;;  %v332_v57 = vmax.f32 %v268_v48, 0.0  ;;  %v237_v58 = vadd.f32 %v1248_v11, %v166_v49  ;;  %v199_v60 = vmul.f32 %v970_v50, %v1234_v5  ;;  %v359_v62 = vpack.c.bf16 %v300_v51, %v299_v45  ;;  %v1035_v51 = vld [vmem:[%s1932_s0 + $0xc8] sm:$0xff]  }
  0x1c   :  { %1096 = vmatprep.subr.bf16.mxu0 %v1185_v14  ;;  %1169 = vmatprep.subr.bf16.mxu1 %v1185_v14  ;;  %v238_v63 = vadd.f32 %v1248_v11, %v167_v52  ;;  %v269_v0 = vadd.f32 %v1248_v11, %v198_v53  ;;  %v169_v8 = vmul.f32 %v910_v1, %v1234_v5  ;;  %v973_v9 = vunpack.c.l.bf16 %v1032_v61 }
  0x1d   :  { %v375_v3 = vpack.c.bf16 %v332_v57, %v331_v56  ;;  %v301_v4 = vmax.f32 %v237_v58, 0.0  ;;  %v270_v6 = vadd.f32 %v1248_v11, %v199_v60  ;;  %v974_v13 = vunpack.c.h.bf16 %v1032_v61 }
  0x1e   :  { %v302_v7 = vmax.f32 %v238_v63, 0.0  ;;  %v240_v17 = vadd.f32 %v1248_v11, %v169_v8  ;;  %v200_v18 = vmul.f32 %v973_v9, %v1234_v5  ;;  %v914_v19 = vunpack.c.h.bf16 %v1017_v2 }
  0x1f   :  { %1097 = vmatpush3.bf16.msra.mxu0 %v1185_v14  ;;  %1177 = vmatpush3.bf16.msra.mxu1 %v1185_v14  ;;  %v334_v10 = vmax.f32 %v270_v6, 0.0  ;;  %v913_v14 = vunpack.c.l.bf16 %v1017_v2  ;;  %v201_v23 = vmul.f32 %v974_v13, %v1234_v5  ;;  %v977_v28 = vunpack.c.l.bf16 %v1033_v15  ;;  %v1020_v2 = vld [vmem:[%s1932_s0 + $0x50] sm:$0xff]  }
  0x20   :  { %v360_v16 = vpack.c.bf16 %v302_v7, %v301_v4  ;;  %v304_v25 = vmax.f32 %v240_v17, 0.0  ;;  %v271_v26 = vadd.f32 %v1248_v11, %v200_v18  ;;  %v171_v27 = vmul.f32 %v914_v19, %v1234_v5 }
  0x21   :  { %v170_v24 = vmul.f32 %v913_v14, %v1234_v5  ;;  %v978_v31 = vunpack.c.h.bf16 %v1033_v15  ;;  %v202_v38 = vmul.f32 %v977_v28, %v1234_v5  ;;  %v982_v50 = vunpack.c.h.bf16 %v1034_v33 }
  0x22   :  { %1099 = vmatmul.mubr.bf16.vlgmr.msra.gmra.mrb[0].mxu0 %v1285_v54  ;;  %1131 = vmatmul.mubr.bf16.vlgmr.msra.gmra.mrb[0].mxu1 %v1291_v59  ;;  %v168_v54 = vmul.f32 %v909_v55, %v1234_v5  ;;  %v333_v59 = vmax.f32 %v269_v0, 0.0  ;;  %v335_v36 = vmax.f32 %v271_v26, 0.0  ;;  %v242_v37 = vadd.f32 %v1248_v11, %v171_v27 }
  0x23   :  { %1102 = vmatprep.mubr.bf16.mxu0 %v357_v20  ;;  %1134 = vmatprep.mubr.bf16.mxu1 %v373_v29  ;;  %v1018_v20 = vld [vmem:[%s1932_s0 + $0x40] sm:$0xff]   ;;  %v272_v29 = vadd.f32 %v1248_v11, %v201_v23  ;;  %v241_v30 = vadd.f32 %v1248_v11, %v170_v24  ;;  %v203_v41 = vmul.f32 %v978_v31, %v1234_v5  ;;  %v985_v1 = vunpack.c.l.bf16 %v1035_v51 }
  0x24   :  { %v239_v12 = vadd.f32 %v1248_v11, %v168_v54  ;;  %v376_v21 = vpack.c.bf16 %v334_v10, %v333_v59  ;;  %v917_v32 = vunpack.c.l.bf16 %v1018_v20  ;;  %v918_v42 = vunpack.c.h.bf16 %v1018_v20  ;;  %v1036_v10 = vld [vmem:[%s1932_s0 + $0xd0] sm:$0xff]   ;;  %v1021_v20 = vld [vmem:[%s1932_s0 + $0x58] sm:$0xff]  }
  0x25   :  { %v336_v39 = vmax.f32 %v272_v29, 0.0  ;;  %v305_v40 = vmax.f32 %v241_v30, 0.0  ;;  %v306_v44 = vmax.f32 %v242_v37, 0.0  ;;  %v273_v45 = vadd.f32 %v1248_v11, %v202_v38 }
  0x26   :  { %v303_v22 = vmax.f32 %v239_v12, 0.0  ;;  %v172_v46 = vmul.f32 %v917_v32, %v1234_v5  ;;  %v274_v48 = vadd.f32 %v1248_v11, %v203_v41  ;;  %v173_v49 = vmul.f32 %v918_v42, %v1234_v5 }
  0x27   :  { %v377_v47 = vpack.c.bf16 %v336_v39, %v335_v36  ;;  %v362_v52 = vpack.c.bf16 %v306_v44, %v305_v40  ;;  %v337_v53 = vmax.f32 %v273_v45, 0.0  ;;  %v205_v60 = vmul.f32 %v982_v50, %v1234_v5  ;;  %v1022_v44 = vld [vmem:[%s1932_s0 + $0x60] sm:$0xff]  }
  0x28   :  { %v361_v35 = vpack.c.bf16 %v304_v25, %v303_v22  ;;  %v243_v55 = vadd.f32 %v1248_v11, %v172_v46  ;;  %v338_v57 = vmax.f32 %v274_v48, 0.0  ;;  %v244_v58 = vadd.f32 %v1248_v11, %v173_v49 }
  0x29   :  { %v276_v6 = vadd.f32 %v1248_v11, %v205_v60  ;;  %v986_v8 = vunpack.c.h.bf16 %v1035_v51  ;;  %v206_v9 = vmul.f32 %v985_v1, %v1234_v5  ;;  %v925_v15 = vunpack.c.l.bf16 %v1020_v2  ;;  %v1038_v51 = vld [vmem:[%s1932_s0 + $0xe0] sm:$0xff]  }
  0x2a   :  { %1103 = vmatmul.mubr.bf16.gmra.mrb[4].mxu0 %v1323_v34  ;;  %1135 = vmatmul.mubr.bf16.gmra.mrb[4].mxu1 %v374_v43  ;;  %v981_v34 = vunpack.c.l.bf16 %v1034_v33  ;;  %v1019_v43 = vld [vmem:[%s1932_s0 + $0x48] sm:$0xff]   ;;  %v308_v4 = vmax.f32 %v244_v58, 0.0  ;;  %v926_v19 = vunpack.c.h.bf16 %v1020_v2  ;;  %v989_v24 = vunpack.c.l.bf16 %v1036_v10  ;;  %v1037_v33 = vld [vmem:[%s1932_s0 + $0xd8] sm:$0xff]  }
  0x2b   :  { %1106 = vmatprep.mubr.bf16.mxu0 %v359_v62  ;;  %1138 = vmatprep.mubr.bf16.mxu1 %v375_v3  ;;  %v921_v61 = vunpack.c.l.bf16 %v1019_v43  ;;  %v307_v62 = vmax.f32 %v243_v55, 0.0  ;;  %v922_v0 = vunpack.c.h.bf16 %v1019_v43  ;;  %v378_v3 = vpack.c.bf16 %v338_v57, %v337_v53  ;;  %v1023_v2 = vld [vmem:[%s1932_s0 + $0x68] sm:$0xff]  }
  0x2c   :  { %v204_v56 = vmul.f32 %v981_v34, %v1234_v5  ;;  %v340_v13 = vmax.f32 %v276_v6, 0.0  ;;  %v207_v17 = vmul.f32 %v986_v8, %v1234_v5  ;;  %v277_v18 = vadd.f32 %v1248_v11, %v206_v9 }
  0x2d   :  { %v174_v54 = vmul.f32 %v921_v61, %v1234_v5  ;;  %v175_v59 = vmul.f32 %v922_v0, %v1234_v5  ;;  %v363_v12 = vpack.c.bf16 %v308_v4, %v307_v62  ;;  %v176_v23 = vmul.f32 %v925_v15, %v1234_v5 }
  0x2e   :  { %v275_v63 = vadd.f32 %v1248_v11, %v204_v56  ;;  %v278_v26 = vadd.f32 %v1248_v11, %v207_v17  ;;  %v341_v27 = vmax.f32 %v277_v18, 0.0  ;;  %v177_v28 = vmul.f32 %v926_v19, %v1234_v5  ;;  %v1024_v19 = vld [vmem:[%s1932_s0 + $0x70] sm:$0xff]  }
  0x2f   :  { %v245_v14 = vadd.f32 %v1248_v11, %v174_v54  ;;  %v247_v29 = vadd.f32 %v1248_v11, %v176_v23  ;;  %v990_v30 = vunpack.c.h.bf16 %v1036_v10  ;;  %v208_v31 = vmul.f32 %v989_v24, %v1234_v5 }
  0x30   :  { %v339_v7 = vmax.f32 %v275_v63, 0.0  ;;  %v929_v32 = vunpack.c.l.bf16 %v1021_v20  ;;  %v342_v36 = vmax.f32 %v278_v26, 0.0  ;;  %v248_v37 = vadd.f32 %v1248_v11, %v177_v28  ;;  %v1040_v28 = vld [vmem:[%s1932_s0 + $0xf0] sm:$0xff]  }
  0x31   :  { %v309_v22 = vmax.f32 %v245_v14, 0.0  ;;  %v930_v38 = vunpack.c.h.bf16 %v1021_v20  ;;  %v311_v39 = vmax.f32 %v247_v29, 0.0  ;;  %v209_v40 = vmul.f32 %v990_v30, %v1234_v5 }
  0x32   :  { %1107 = vmatmul.mubr.bf16.gmra.mrb[8].mxu0 %v360_v16  ;;  %1139 = vmatmul.mubr.bf16.gmra.mrb[8].mxu1 %v376_v21  ;;  %v246_v16 = vadd.f32 %v1248_v11, %v175_v59  ;;  %v379_v21 = vpack.c.bf16 %v340_v13, %v339_v7  ;;  %v279_v41 = vadd.f32 %v1248_v11, %v208_v31  ;;  %v312_v46 = vmax.f32 %v248_v37, 0.0  ;;  %v1039_v7 = vld [vmem:[%s1932_s0 + $0xe8] sm:$0xff]  }
  0x33   :  { %1110 = vmatprep.mubr.bf16.mxu0 %v361_v35  ;;  %1142 = vmatprep.mubr.bf16.mxu1 %v377_v47  ;;  %v178_v42 = vmul.f32 %v929_v32, %v1234_v5  ;;  %v380_v45 = vpack.c.bf16 %v342_v36, %v341_v27  ;;  %v179_v34 = vmul.f32 %v930_v38, %v1234_v5  ;;  %v993_v43 = vunpack.c.l.bf16 %v1037_v33  ;;  %v1025_v38 = vld [vmem:[%s1932_s0 + $0x78] sm:$0xff]  }
  0x34   :  { %v310_v25 = vmax.f32 %v246_v16, 0.0  ;;  %v280_v47 = vadd.f32 %v1248_v11, %v209_v40  ;;  %v343_v48 = vmax.f32 %v279_v41, 0.0  ;;  %v994_v50 = vunpack.c.h.bf16 %v1037_v33 }
  0x35   :  { %v249_v49 = vadd.f32 %v1248_v11, %v178_v42  ;;  %v365_v53 = vpack.c.bf16 %v312_v46, %v311_v39  ;;  %v210_v55 = vmul.f32 %v993_v43, %v1234_v5  ;;  %v933_v56 = vunpack.c.l.bf16 %v1022_v44 }
  0x36   :  { %v364_v35 = vpack.c.bf16 %v310_v25, %v309_v22  ;;  %v344_v57 = vmax.f32 %v280_v47, 0.0  ;;  %v211_v60 = vmul.f32 %v994_v50, %v1234_v5  ;;  %v934_v61 = vunpack.c.h.bf16 %v1022_v44  ;;  %v1041_v50 = vld [vmem:[%s1932_s0 + $0xf8] sm:$0xff]  }
  0x37   :  { %v313_v58 = vmax.f32 %v249_v49, 0.0  ;;  %v281_v63 = vadd.f32 %v1248_v11, %v210_v55  ;;  %v180_v0 = vmul.f32 %v933_v56, %v1234_v5  ;;  %v997_v1 = vunpack.c.l.bf16 %v1038_v51 }
  0x38   :  { %v282_v4 = vadd.f32 %v1248_v11, %v211_v60  ;;  %v181_v6 = vmul.f32 %v934_v61, %v1234_v5  ;;  %v998_v54 = vunpack.c.h.bf16 %v1038_v51  ;;  %v937_v14 = vunpack.c.l.bf16 %v1023_v2 }
  0x39   :  { %v345_v59 = vmax.f32 %v281_v63, 0.0  ;;  %v251_v8 = vadd.f32 %v1248_v11, %v180_v0  ;;  %v212_v9 = vmul.f32 %v997_v1, %v1234_v5  ;;  %v938_v17 = vunpack.c.h.bf16 %v1023_v2 }
  0x3a   :  { %1111 = vmatmul.mubr.bf16.gmra.mrb[12].mxu0 %v362_v52  ;;  %1143 = vmatmul.mubr.bf16.gmra.mrb[12].mxu1 %v378_v3  ;;  %v250_v52 = vadd.f32 %v1248_v11, %v179_v34  ;;  %v381_v3 = vpack.c.bf16 %v344_v57, %v343_v48  ;;  %v346_v10 = vmax.f32 %v282_v4, 0.0  ;;  %v213_v13 = vmul.f32 %v998_v54, %v1234_v5 }
  0x3b   :  { %1114 = vmatprep.mubr.bf16.mxu0 %v363_v12  ;;  %1146 = vmatprep.mubr.bf16.mxu1 %v379_v21  ;;  %v252_v12 = vadd.f32 %v1248_v11, %v181_v6  ;;  %v283_v16 = vadd.f32 %v1248_v11, %v212_v9  ;;  %v1001_v18 = vunpack.c.l.bf16 %v1039_v7  ;;  %v315_v20 = vmax.f32 %v251_v8, 0.0 }
  0x3c   :  { %v314_v62 = vmax.f32 %v250_v52, 0.0  ;;  %v284_v22 = vadd.f32 %v1248_v11, %v213_v13  ;;  %v182_v23 = vmul.f32 %v937_v14, %v1234_v5  ;;  %v183_v25 = vmul.f32 %v938_v17, %v1234_v5 }
  0x3d   :  { %v316_v21 = vmax.f32 %v252_v12, 0.0  ;;  %v347_v24 = vmax.f32 %v283_v16, 0.0  ;;  %v1002_v26 = vunpack.c.h.bf16 %v1039_v7  ;;  %v214_v27 = vmul.f32 %v1001_v18, %v1234_v5 }
  0x3e   :  { %v366_v15 = vpack.c.bf16 %v314_v62, %v313_v58  ;;  %v382_v29 = vpack.c.bf16 %v346_v10, %v345_v59  ;;  %v348_v30 = vmax.f32 %v284_v22, 0.0  ;;  %v253_v31 = vadd.f32 %v1248_v11, %v182_v23 }
  0x3f   :  { %v941_v32 = vunpack.c.l.bf16 %v1024_v19  ;;  %v254_v33 = vadd.f32 %v1248_v11, %v183_v25  ;;  %v285_v36 = vadd.f32 %v1248_v11, %v214_v27  ;;  %v942_v37 = vunpack.c.h.bf16 %v1024_v19  ;;  %v438_v25 = vld [vmem:[%s1935_s4 + $0x118] sm:$0xff] }
  0x40   :  { %v367_v39 = vpack.c.bf16 %v316_v21, %v315_v20  ;;  %v383_v40 = vpack.c.bf16 %v348_v30, %v347_v24  ;;  %v1005_v42 = vunpack.c.l.bf16 %v1040_v28  ;;  %v317_v44 = vmax.f32 %v253_v31, 0.0  ;;  %v403_v20 = vld [vmem:[%s1935_s4] sm:$0xff]  ;;  %v406_v24 = vld [vmem:[%s1935_s4 + $0x18] sm:$0xff]  ;;  %v404_v30 = vld [vmem:[%s1935_s4 + $0x8] sm:$0xff] }
  0x41   :  { %v184_v41 = vmul.f32 %v941_v32, %v1234_v5  ;;  %v185_v34 = vmul.f32 %v942_v37, %v1234_v5  ;;  %v1006_v47 = vunpack.c.h.bf16 %v1040_v28  ;;  %v945_v49 = vunpack.c.l.bf16 %v1025_v38  ;;  %v435_v21 = vld [vmem:[%s1935_s4 + $0x100] sm:$0xff]  ;;  %v436_v31 = vld [vmem:[%s1935_s4 + $0x108] sm:$0xff] }
  0x42   :  { %1115 = vmatmul.mubr.bf16.gmra.mrb[16].mxu0 %v364_v35  ;;  %1147 = vmatmul.mubr.bf16.gmra.mrb[16].mxu1 %v380_v45  ;;  %v215_v35 = vmul.f32 %v1002_v26, %v1234_v5  ;;  %v318_v45 = vmax.f32 %v254_v33, 0.0  ;;  %v216_v48 = vmul.f32 %v1005_v42, %v1234_v5  ;;  %v349_v51 = vmax.f32 %v285_v36, 0.0 }
  0x43   :  { %1118 = vmatprep.mubr.bf16.mxu0 %v365_v53  ;;  %1150 = vmatprep.mubr.bf16.mxu1 %v381_v3  ;;  %v255_v43 = vadd.f32 %v1248_v11, %v184_v41  ;;  %v256_v52 = vadd.f32 %v1248_v11, %v185_v34  ;;  %v946_v55 = vunpack.c.h.bf16 %v1025_v38  ;;  %v217_v57 = vmul.f32 %v1006_v47, %v1234_v5  ;;  %v439_v34 = vld [vmem:[%s1935_s4 + $0x120] sm:$0xff] }
  0x44   :  { %v286_v46 = vadd.f32 %v1248_v11, %v215_v35  ;;  %v287_v58 = vadd.f32 %v1248_v11, %v216_v48  ;;  %v186_v60 = vmul.f32 %v945_v49, %v1234_v5  ;;  %v1009_v63 = vunpack.c.l.bf16 %v1041_v50  ;;  %v410_v48 = vld [vmem:[%s1935_s4 + $0x38] sm:$0xff] }
  0x45   :  { %v319_v56 = vmax.f32 %v255_v43, 0.0  ;;  %v320_v61 = vmax.f32 %v256_v52, 0.0  ;;  %v187_v62 = vmul.f32 %v946_v55, %v1234_v5  ;;  %v368_v0 = vpack.c.bf16 %v318_v45, %v317_v44  ;;  %v409_v44 = vld [vmem:[%s1935_s4 + $0x30] sm:$0xff]  ;;  %v442_v49 = vld [vmem:[%s1935_s4 + $0x138] sm:$0xff]  ;;  %v408_v55 = vld [vmem:[%s1935_s4 + $0x28] sm:$0xff] }
  0x46   :  { %v350_v53 = vmax.f32 %v286_v46, 0.0  ;;  %v288_v1 = vadd.f32 %v1248_v11, %v217_v57  ;;  %v351_v2 = vmax.f32 %v287_v58, 0.0  ;;  %v1010_v3 = vunpack.c.h.bf16 %v1041_v50  ;;  %v441_v45 = vld [vmem:[%s1935_s4 + $0x130] sm:$0xff]  ;;  %v407_v46 = vld [vmem:[%s1935_s4 + $0x20] sm:$0xff] }
  0x47   :  { %v257_v6 = vadd.f32 %v1248_v11, %v186_v60  ;;  %v258_v54 = vadd.f32 %v1248_v11, %v187_v62  ;;  %v218_v7 = vmul.f32 %v1009_v63, %v1234_v5  ;;  %v369_v59 = vpack.c.bf16 %v320_v61, %v319_v56  ;;  %v440_v56 = vld [vmem:[%s1935_s4 + $0x128] sm:$0xff] }
  0x48   :  { %v384_v4 = vpack.c.bf16 %v350_v53, %v349_v51  ;;  %v352_v8 = vmax.f32 %v288_v1, 0.0  ;;  %v219_v9 = vmul.f32 %v1010_v3, %v1234_v5  ;;  %v405_v5 = vld [vmem:[%s1935_s4 + $0x10] sm:$0xff] }
  0x49   :  { %v289_v10 = vadd.f32 %v1248_v11, %v218_v7  ;;  %v321_v14 = vmax.f32 %v257_v6, 0.0  ;;  %v445_v6 = vld [vmem:[%s1935_s4 + $0x150] sm:$0xff]  ;;  %v443_v7 = vld [vmem:[%s1935_s4 + $0x140] sm:$0xff] }
  0x4a   :  { %1119 = vmatmul.mubr.bf16.gmra.mrb[20].mxu0 %v366_v15  ;;  %1151 = vmatmul.mubr.bf16.gmra.mrb[20].mxu1 %v382_v29  ;;  %v385_v12 = vpack.c.bf16 %v352_v8, %v351_v2  ;;  %v290_v13 = vadd.f32 %v1248_v11, %v219_v9  ;;  %v322_v15 = vmax.f32 %v258_v54, 0.0  ;;  %v437_v11 = vld [vmem:[%s1935_s4 + $0x110] sm:$0xff]  ;;  %v411_v54 = vld [vmem:[%s1935_s4 + $0x40] sm:$0xff]  ;;  %v414_v9 = vld [vmem:[%s1935_s4 + $0x58] sm:$0xff] }
  0x4b   :  { %1122 = vmatprep.mubr.bf16.mxu0 %v367_v39  ;;  %1154 = vmatprep.mubr.bf16.mxu1 %v383_v40  ;;  %v353_v16 = vmax.f32 %v289_v10, 0.0  ;;  %v446_v10 = vld [vmem:[%s1935_s4 + $0x158] sm:$0xff] }
  0x4c   :  { %v354_v17 = vmax.f32 %v290_v13, 0.0  ;;  %v370_v18 = vpack.c.bf16 %v322_v15, %v321_v14 }
  0x4e   :  { %v386_v19 = vpack.c.bf16 %v354_v17, %v353_v16  ;;  %v412_v16 = vld [vmem:[%s1935_s4 + $0x48] sm:$0xff] }
  0x4f   :  { %v444_v17 = vld [vmem:[%s1935_s4 + $0x148] sm:$0xff] }
  0x52   :  { %1123 = vmatmul.mubr.bf16.gmra.mrb[24].mxu0 %v368_v0  ;;  %1155 = vmatmul.mubr.bf16.gmra.mrb[24].mxu1 %v384_v4  ;;  %v413_v4 = vld [vmem:[%s1935_s4 + $0x50] sm:$0xff] }
  0x53   :  { %1126 = vmatprep.mubr.bf16.mxu0 %v369_v59  ;;  %1158 = vmatprep.mubr.bf16.mxu1 %v385_v12 }
  0x5a   :  { %1127 = vmatmul.mubr.bf16.gmra.mrb[28].mxu0 %v370_v18  ;;  %1159 = vmatmul.mubr.bf16.gmra.mrb[28].mxu1 %v386_v19 }
  0xf5   :  { %v1100_v22 = vpop.f32.mrb[0].mxu0  ;;  %v1132_v23 = vpop.f32.mrb[0].mxu1 }
  0xf6   :  { %v558_v26 = vadd.f32 %v1100_v22, %v405_v5  ;;  %v686_v27 = vadd.f32 %v1132_v23, %v437_v11  ;;  %v549_v28 = vpop.f32.mrb[1].mxu0  ;;  %v677_v29 = vpop.f32.mrb[1].mxu1 }
  0xf7   :  { %v550_v32 = vadd.f32 %v549_v28, %v403_v20  ;;  %v678_v33 = vadd.f32 %v677_v29, %v435_v21  ;;  %v1101_v35 = vpop.f32.mrb[2].mxu0  ;;  %v1133_v36 = vpop.f32.mrb[2].mxu1  ;;  %v415_v28 = vld [vmem:[%s1935_s4 + $0x60] sm:$0xff] }
  0xf8   :  { %807 = vst.msk [vmem:[%s1936_s5 + $0x10] sm:$0xff] %vm804_vm0, %v558_v26  ;;  %839 = vst.msk [vmem:[%s1936_s5 + $0x110] sm:$0xff] %vm804_vm0, %v686_v27  ;;  %v561_v37 = vadd.f32 %v1101_v35, %v406_v24  ;;  %v689_v38 = vadd.f32 %v1133_v36, %v438_v25  ;;  %v552_v39 = vpop.f32.mrb[3].mxu0  ;;  %v680_v40 = vpop.f32.mrb[3].mxu1  ;;  %v417_v26 = vld [vmem:[%s1935_s4 + $0x70] sm:$0xff]  ;;  %v447_v29 = vld [vmem:[%s1935_s4 + $0x160] sm:$0xff] }
  0xf9   :  { %805 = vst.msk [vmem:[%s1936_s5] sm:$0xff] %vm804_vm0, %v550_v32  ;;  %837 = vst.msk [vmem:[%s1936_s5 + $0x100] sm:$0xff] %vm804_vm0, %v678_v33  ;;  %v553_v41 = vadd.f32 %v552_v39, %v404_v30  ;;  %v681_v42 = vadd.f32 %v680_v40, %v436_v31  ;;  %v449_v27 = vld [vmem:[%s1935_s4 + $0x170] sm:$0xff]  ;;  %v418_v32 = vld [vmem:[%s1935_s4 + $0x78] sm:$0xff] }
  0xfa   :  { %808 = vst.msk [vmem:[%s1936_s5 + $0x18] sm:$0xff] %vm804_vm0, %v561_v37  ;;  %840 = vst.msk [vmem:[%s1936_s5 + $0x118] sm:$0xff] %vm804_vm0, %v689_v38  ;;  %v450_v33 = vld [vmem:[%s1935_s4 + $0x178] sm:$0xff]  ;;  %v416_v39 = vld [vmem:[%s1935_s4 + $0x68] sm:$0xff] }
  0xfb   :  { %806 = vst.msk [vmem:[%s1936_s5 + $0x8] sm:$0xff] %vm804_vm0, %v553_v41  ;;  %838 = vst.msk [vmem:[%s1936_s5 + $0x108] sm:$0xff] %vm804_vm0, %v681_v42  ;;  %v448_v40 = vld [vmem:[%s1935_s4 + $0x168] sm:$0xff] }
  0xfd   :  { %v1104_v43 = vpop.f32.mrb[4].mxu0  ;;  %v1136_v47 = vpop.f32.mrb[4].mxu1 }
  0xfe   :  { %v574_v50 = vadd.f32 %v1104_v43, %v409_v44  ;;  %v702_v51 = vadd.f32 %v1136_v47, %v441_v45  ;;  %v565_v53 = vpop.f32.mrb[5].mxu0  ;;  %v693_v52 = vpop.f32.mrb[5].mxu1 }
  0xff   :  { %v566_v57 = vadd.f32 %v565_v53, %v407_v46  ;;  %v694_v58 = vadd.f32 %v693_v52, %v439_v34  ;;  %v1105_v60 = vpop.f32.mrb[6].mxu0  ;;  %v1137_v61 = vpop.f32.mrb[6].mxu1  ;;  %v419_v53 = vld [vmem:[%s1935_s4 + $0x80] sm:$0xff] }
 0x100   :  { %811 = vst.msk [vmem:[%s1936_s5 + $0x30] sm:$0xff] %vm804_vm0, %v574_v50  ;;  %843 = vst.msk [vmem:[%s1936_s5 + $0x130] sm:$0xff] %vm804_vm0, %v702_v51  ;;  %v577_v62 = vadd.f32 %v1105_v60, %v410_v48  ;;  %v705_v63 = vadd.f32 %v1137_v61, %v442_v49  ;;  %v568_v0 = vpop.f32.mrb[7].mxu0  ;;  %v696_v1 = vpop.f32.mrb[7].mxu1  ;;  %v421_v50 = vld [vmem:[%s1935_s4 + $0x90] sm:$0xff]  ;;  %v451_v52 = vld [vmem:[%s1935_s4 + $0x180] sm:$0xff] }
 0x101   :  { %809 = vst.msk [vmem:[%s1936_s5 + $0x20] sm:$0xff] %vm804_vm0, %v566_v57  ;;  %841 = vst.msk [vmem:[%s1936_s5 + $0x120] sm:$0xff] %vm804_vm0, %v694_v58  ;;  %v569_v2 = vadd.f32 %v568_v0, %v408_v55  ;;  %v697_v3 = vadd.f32 %v696_v1, %v440_v56  ;;  %v453_v51 = vld [vmem:[%s1935_s4 + $0x190] sm:$0xff]  ;;  %v422_v57 = vld [vmem:[%s1935_s4 + $0x98] sm:$0xff] }
 0x102   :  { %812 = vst.msk [vmem:[%s1936_s5 + $0x38] sm:$0xff] %vm804_vm0, %v577_v62  ;;  %844 = vst.msk [vmem:[%s1936_s5 + $0x138] sm:$0xff] %vm804_vm0, %v705_v63  ;;  %v454_v58 = vld [vmem:[%s1935_s4 + $0x198] sm:$0xff]  ;;  %v420_v0 = vld [vmem:[%s1935_s4 + $0x88] sm:$0xff] }
 0x103   :  { %810 = vst.msk [vmem:[%s1936_s5 + $0x28] sm:$0xff] %vm804_vm0, %v569_v2  ;;  %842 = vst.msk [vmem:[%s1936_s5 + $0x128] sm:$0xff] %vm804_vm0, %v697_v3  ;;  %v452_v1 = vld [vmem:[%s1935_s4 + $0x188] sm:$0xff] }
 0x105   :  { %v1108_v59 = vpop.f32.mrb[8].mxu0  ;;  %v1140_v8 = vpop.f32.mrb[8].mxu1 }
 0x106   :  { %v590_v12 = vadd.f32 %v1108_v59, %v413_v4  ;;  %v718_v13 = vadd.f32 %v1140_v8, %v445_v6  ;;  %v581_v14 = vpop.f32.mrb[9].mxu0  ;;  %v709_v15 = vpop.f32.mrb[9].mxu1 }
 0x107   :  { %v582_v18 = vadd.f32 %v581_v14, %v411_v54  ;;  %v710_v19 = vadd.f32 %v709_v15, %v443_v7  ;;  %v1109_v5 = vpop.f32.mrb[10].mxu0  ;;  %v1141_v11 = vpop.f32.mrb[10].mxu1  ;;  %v423_v14 = vld [vmem:[%s1935_s4 + $0xa0] sm:$0xff] }
 0x108   :  { %815 = vst.msk [vmem:[%s1936_s5 + $0x50] sm:$0xff] %vm804_vm0, %v590_v12  ;;  %847 = vst.msk [vmem:[%s1936_s5 + $0x150] sm:$0xff] %vm804_vm0, %v718_v13  ;;  %v593_v20 = vadd.f32 %v1109_v5, %v414_v9  ;;  %v721_v21 = vadd.f32 %v1141_v11, %v446_v10  ;;  %v584_v22 = vpop.f32.mrb[11].mxu0  ;;  %v712_v23 = vpop.f32.mrb[11].mxu1  ;;  %v425_v12 = vld [vmem:[%s1935_s4 + $0xb0] sm:$0xff]  ;;  %v455_v15 = vld [vmem:[%s1935_s4 + $0x1a0] sm:$0xff] }
 0x109   :  { %813 = vst.msk [vmem:[%s1936_s5 + $0x40] sm:$0xff] %vm804_vm0, %v582_v18  ;;  %845 = vst.msk [vmem:[%s1936_s5 + $0x140] sm:$0xff] %vm804_vm0, %v710_v19  ;;  %v585_v24 = vadd.f32 %v584_v22, %v412_v16  ;;  %v713_v25 = vadd.f32 %v712_v23, %v444_v17  ;;  %v457_v13 = vld [vmem:[%s1935_s4 + $0x1b0] sm:$0xff]  ;;  %v426_v18 = vld [vmem:[%s1935_s4 + $0xb8] sm:$0xff] }
 0x10a   :  { %816 = vst.msk [vmem:[%s1936_s5 + $0x58] sm:$0xff] %vm804_vm0, %v593_v20  ;;  %848 = vst.msk [vmem:[%s1936_s5 + $0x158] sm:$0xff] %vm804_vm0, %v721_v21  ;;  %v458_v19 = vld [vmem:[%s1935_s4 + $0x1b8] sm:$0xff]  ;;  %v424_v22 = vld [vmem:[%s1935_s4 + $0xa8] sm:$0xff] }
 0x10b   :  { %814 = vst.msk [vmem:[%s1936_s5 + $0x48] sm:$0xff] %vm804_vm0, %v585_v24  ;;  %846 = vst.msk [vmem:[%s1936_s5 + $0x148] sm:$0xff] %vm804_vm0, %v713_v25  ;;  %v456_v23 = vld [vmem:[%s1935_s4 + $0x1a8] sm:$0xff] }
 0x10d   :  { %v1112_v30 = vpop.f32.mrb[12].mxu0  ;;  %v1144_v31 = vpop.f32.mrb[12].mxu1 }
 0x10e   :  { %v606_v35 = vadd.f32 %v1112_v30, %v417_v26  ;;  %v734_v36 = vadd.f32 %v1144_v31, %v449_v27  ;;  %v597_v37 = vpop.f32.mrb[13].mxu0  ;;  %v725_v38 = vpop.f32.mrb[13].mxu1 }
 0x10f   :  { %v598_v41 = vadd.f32 %v597_v37, %v415_v28  ;;  %v726_v42 = vadd.f32 %v725_v38, %v447_v29  ;;  %v1113_v44 = vpop.f32.mrb[14].mxu0  ;;  %v1145_v45 = vpop.f32.mrb[14].mxu1  ;;  %v427_v37 = vld [vmem:[%s1935_s4 + $0xc0] sm:$0xff] }
 0x110   :  { %819 = vst.msk [vmem:[%s1936_s5 + $0x70] sm:$0xff] %vm804_vm0, %v606_v35  ;;  %851 = vst.msk [vmem:[%s1936_s5 + $0x170] sm:$0xff] %vm804_vm0, %v734_v36  ;;  %v609_v46 = vadd.f32 %v1113_v44, %v418_v32  ;;  %v737_v34 = vadd.f32 %v1145_v45, %v450_v33  ;;  %v600_v43 = vpop.f32.mrb[15].mxu0  ;;  %v728_v47 = vpop.f32.mrb[15].mxu1  ;;  %v429_v35 = vld [vmem:[%s1935_s4 + $0xd0] sm:$0xff]  ;;  %v459_v38 = vld [vmem:[%s1935_s4 + $0x1c0] sm:$0xff] }
 0x111   :  { %817 = vst.msk [vmem:[%s1936_s5 + $0x60] sm:$0xff] %vm804_vm0, %v598_v41  ;;  %849 = vst.msk [vmem:[%s1936_s5 + $0x160] sm:$0xff] %vm804_vm0, %v726_v42  ;;  %v601_v48 = vadd.f32 %v600_v43, %v416_v39  ;;  %v729_v49 = vadd.f32 %v728_v47, %v448_v40  ;;  %v461_v36 = vld [vmem:[%s1935_s4 + $0x1d0] sm:$0xff]  ;;  %v430_v41 = vld [vmem:[%s1935_s4 + $0xd8] sm:$0xff] }
 0x112   :  { %820 = vst.msk [vmem:[%s1936_s5 + $0x78] sm:$0xff] %vm804_vm0, %v609_v46  ;;  %852 = vst.msk [vmem:[%s1936_s5 + $0x178] sm:$0xff] %vm804_vm0, %v737_v34  ;;  %v462_v42 = vld [vmem:[%s1935_s4 + $0x1d8] sm:$0xff]  ;;  %v428_v43 = vld [vmem:[%s1935_s4 + $0xc8] sm:$0xff] }
 0x113   :  { %818 = vst.msk [vmem:[%s1936_s5 + $0x68] sm:$0xff] %vm804_vm0, %v601_v48  ;;  %850 = vst.msk [vmem:[%s1936_s5 + $0x168] sm:$0xff] %vm804_vm0, %v729_v49  ;;  %v460_v47 = vld [vmem:[%s1935_s4 + $0x1c8] sm:$0xff] }
 0x115   :  { %v1116_v55 = vpop.f32.mrb[16].mxu0  ;;  %v1148_v56 = vpop.f32.mrb[16].mxu1 }
 0x116   :  { %v622_v60 = vadd.f32 %v1116_v55, %v421_v50  ;;  %v750_v61 = vadd.f32 %v1148_v56, %v453_v51  ;;  %v613_v62 = vpop.f32.mrb[17].mxu0  ;;  %v741_v63 = vpop.f32.mrb[17].mxu1 }
 0x117   :  { %v614_v2 = vadd.f32 %v613_v62, %v419_v53  ;;  %v742_v3 = vadd.f32 %v741_v63, %v451_v52  ;;  %v1117_v4 = vpop.f32.mrb[18].mxu0  ;;  %v1149_v6 = vpop.f32.mrb[18].mxu1  ;;  %v431_v62 = vld [vmem:[%s1935_s4 + $0xe0] sm:$0xff] }
 0x118   :  { %823 = vst.msk [vmem:[%s1936_s5 + $0x90] sm:$0xff] %vm804_vm0, %v622_v60  ;;  %855 = vst.msk [vmem:[%s1936_s5 + $0x190] sm:$0xff] %vm804_vm0, %v750_v61  ;;  %v625_v54 = vadd.f32 %v1117_v4, %v422_v57  ;;  %v753_v7 = vadd.f32 %v1149_v6, %v454_v58  ;;  %v616_v59 = vpop.f32.mrb[19].mxu0  ;;  %v744_v8 = vpop.f32.mrb[19].mxu1  ;;  %v433_v60 = vld [vmem:[%s1935_s4 + $0xf0] sm:$0xff]  ;;  %v463_v63 = vld [vmem:[%s1935_s4 + $0x1e0] sm:$0xff] }
 0x119   :  { %821 = vst.msk [vmem:[%s1936_s5 + $0x80] sm:$0xff] %vm804_vm0, %v614_v2  ;;  %853 = vst.msk [vmem:[%s1936_s5 + $0x180] sm:$0xff] %vm804_vm0, %v742_v3  ;;  %v617_v9 = vadd.f32 %v616_v59, %v420_v0  ;;  %v745_v10 = vadd.f32 %v744_v8, %v452_v1  ;;  %v465_v61 = vld [vmem:[%s1935_s4 + $0x1f0] sm:$0xff]  ;;  %v434_v2 = vld [vmem:[%s1935_s4 + $0xf8] sm:$0xff] }
 0x11a   :  { %824 = vst.msk [vmem:[%s1936_s5 + $0x98] sm:$0xff] %vm804_vm0, %v625_v54  ;;  %856 = vst.msk [vmem:[%s1936_s5 + $0x198] sm:$0xff] %vm804_vm0, %v753_v7  ;;  %v466_v3 = vld [vmem:[%s1935_s4 + $0x1f8] sm:$0xff]  ;;  %v432_v59 = vld [vmem:[%s1935_s4 + $0xe8] sm:$0xff] }
 0x11b   :  { %822 = vst.msk [vmem:[%s1936_s5 + $0x88] sm:$0xff] %vm804_vm0, %v617_v9  ;;  %854 = vst.msk [vmem:[%s1936_s5 + $0x188] sm:$0xff] %vm804_vm0, %v745_v10  ;;  %v464_v8 = vld [vmem:[%s1935_s4 + $0x1e8] sm:$0xff] }
 0x11d   :  { %v1120_v16 = vpop.f32.mrb[20].mxu0  ;;  %v1152_v17 = vpop.f32.mrb[20].mxu1 }
 0x11e   :  { %v638_v5 = vadd.f32 %v1120_v16, %v425_v12  ;;  %v766_v11 = vadd.f32 %v1152_v17, %v457_v13  ;;  %v629_v20 = vpop.f32.mrb[21].mxu0  ;;  %v757_v21 = vpop.f32.mrb[21].mxu1 }
 0x11f   :  { %v630_v24 = vadd.f32 %v629_v20, %v423_v14  ;;  %v758_v25 = vadd.f32 %v757_v21, %v455_v15  ;;  %v1121_v26 = vpop.f32.mrb[22].mxu0  ;;  %v1153_v27 = vpop.f32.mrb[22].mxu1 }
 0x120   :  { %827 = vst.msk [vmem:[%s1936_s5 + $0xb0] sm:$0xff] %vm804_vm0, %v638_v5  ;;  %859 = vst.msk [vmem:[%s1936_s5 + $0x1b0] sm:$0xff] %vm804_vm0, %v766_v11  ;;  %v641_v28 = vadd.f32 %v1121_v26, %v426_v18  ;;  %v769_v29 = vadd.f32 %v1153_v27, %v458_v19  ;;  %v632_v30 = vpop.f32.mrb[23].mxu0  ;;  %v760_v31 = vpop.f32.mrb[23].mxu1 }
 0x121   :  { %825 = vst.msk [vmem:[%s1936_s5 + $0xa0] sm:$0xff] %vm804_vm0, %v630_v24  ;;  %857 = vst.msk [vmem:[%s1936_s5 + $0x1a0] sm:$0xff] %vm804_vm0, %v758_v25  ;;  %v633_v32 = vadd.f32 %v632_v30, %v424_v22  ;;  %v761_v33 = vadd.f32 %v760_v31, %v456_v23 }
 0x122   :  { %828 = vst.msk [vmem:[%s1936_s5 + $0xb8] sm:$0xff] %vm804_vm0, %v641_v28  ;;  %860 = vst.msk [vmem:[%s1936_s5 + $0x1b8] sm:$0xff] %vm804_vm0, %v769_v29 }
 0x123   :  { %826 = vst.msk [vmem:[%s1936_s5 + $0xa8] sm:$0xff] %vm804_vm0, %v633_v32  ;;  %858 = vst.msk [vmem:[%s1936_s5 + $0x1a8] sm:$0xff] %vm804_vm0, %v761_v33 }
 0x125   :  { %v1124_v39 = vpop.f32.mrb[24].mxu0  ;;  %v1156_v40 = vpop.f32.mrb[24].mxu1 }
 0x126   :  { %v654_v44 = vadd.f32 %v1124_v39, %v429_v35  ;;  %v782_v45 = vadd.f32 %v1156_v40, %v461_v36  ;;  %v645_v46 = vpop.f32.mrb[25].mxu0  ;;  %v773_v34 = vpop.f32.mrb[25].mxu1 }
 0x127   :  { %v646_v48 = vadd.f32 %v645_v46, %v427_v37  ;;  %v774_v49 = vadd.f32 %v773_v34, %v459_v38  ;;  %v1125_v50 = vpop.f32.mrb[26].mxu0  ;;  %v1157_v51 = vpop.f32.mrb[26].mxu1 }
 0x128   :  { %831 = vst.msk [vmem:[%s1936_s5 + $0xd0] sm:$0xff] %vm804_vm0, %v654_v44  ;;  %863 = vst.msk [vmem:[%s1936_s5 + $0x1d0] sm:$0xff] %vm804_vm0, %v782_v45  ;;  %v657_v53 = vadd.f32 %v1125_v50, %v430_v41  ;;  %v785_v52 = vadd.f32 %v1157_v51, %v462_v42  ;;  %v648_v55 = vpop.f32.mrb[27].mxu0  ;;  %v776_v56 = vpop.f32.mrb[27].mxu1 }
 0x129   :  { %829 = vst.msk [vmem:[%s1936_s5 + $0xc0] sm:$0xff] %vm804_vm0, %v646_v48  ;;  %861 = vst.msk [vmem:[%s1936_s5 + $0x1c0] sm:$0xff] %vm804_vm0, %v774_v49  ;;  %v649_v57 = vadd.f32 %v648_v55, %v428_v43  ;;  %v777_v58 = vadd.f32 %v776_v56, %v460_v47 }
 0x12a   :  { %832 = vst.msk [vmem:[%s1936_s5 + $0xd8] sm:$0xff] %vm804_vm0, %v657_v53  ;;  %864 = vst.msk [vmem:[%s1936_s5 + $0x1d8] sm:$0xff] %vm804_vm0, %v785_v52 }
 0x12b   :  { %830 = vst.msk [vmem:[%s1936_s5 + $0xc8] sm:$0xff] %vm804_vm0, %v649_v57  ;;  %862 = vst.msk [vmem:[%s1936_s5 + $0x1c8] sm:$0xff] %vm804_vm0, %v777_v58 }
 0x12d   :  { %v1128_v0 = vpop.f32.mrb[28].mxu0  ;;  %v1160_v1 = vpop.f32.mrb[28].mxu1 }
 0x12e   :  { %v670_v4 = vadd.f32 %v1128_v0, %v433_v60  ;;  %v798_v6 = vadd.f32 %v1160_v1, %v465_v61  ;;  %v661_v54 = vpop.f32.mrb[29].mxu0  ;;  %v789_v7 = vpop.f32.mrb[29].mxu1 }
 0x12f   :  { %v662_v9 = vadd.f32 %v661_v54, %v431_v62  ;;  %v790_v10 = vadd.f32 %v789_v7, %v463_v63  ;;  %v1129_v12 = vpop.f32.mrb[30].mxu0  ;;  %v1161_v13 = vpop.f32.mrb[30].mxu1 }
 0x130   :  { %835 = vst.msk [vmem:[%s1936_s5 + $0xf0] sm:$0xff] %vm804_vm0, %v670_v4  ;;  %867 = vst.msk [vmem:[%s1936_s5 + $0x1f0] sm:$0xff] %vm804_vm0, %v798_v6  ;;  %v673_v14 = vadd.f32 %v1129_v12, %v434_v2  ;;  %v801_v15 = vadd.f32 %v1161_v13, %v466_v3  ;;  %v664_v16 = vpop.f32.mrb[31].mxu0  ;;  %v792_v17 = vpop.f32.mrb[31].mxu1 }
 0x131   :  { %833 = vst.msk [vmem:[%s1936_s5 + $0xe0] sm:$0xff] %vm804_vm0, %v662_v9  ;;  %865 = vst.msk [vmem:[%s1936_s5 + $0x1e0] sm:$0xff] %vm804_vm0, %v790_v10  ;;  %v665_v18 = vadd.f32 %v664_v16, %v432_v59  ;;  %v793_v19 = vadd.f32 %v792_v17, %v464_v8 }
 0x132   :  { %836 = vst.msk [vmem:[%s1936_s5 + $0xf8] sm:$0xff] %vm804_vm0, %v673_v14  ;;  %868 = vst.msk [vmem:[%s1936_s5 + $0x1f8] sm:$0xff] %vm804_vm0, %v801_v15 }
 0x133   :  { %834 = vst.msk [vmem:[%s1936_s5 + $0xe8] sm:$0xff] %vm804_vm0, %v665_v18  ;;  %866 = vst.msk [vmem:[%s1936_s5 + $0x1e8] sm:$0xff] %vm804_vm0, %v793_v19 }

// kernel: preact_bottleneck_forward.8
= control target key start
LH: loop header
LB: loop body
LE: loop exit
PB: predicated region body
PF: predicated region fallthrough
CT: control target
= control target key end

     0   :  { %s4463_s18 = smov 0   ;;  %s5746_s0 = inlined_call_operand.vmem [shape: bf16[2,16,16,128], index: 0, kind: input, shape index: {}]   ;;  %s5747_s1 = inlined_call_operand.vmem [shape: f32[1,128], index: 1, kind: input, shape index: {}]   ;;  %s5748_s2 = inlined_call_operand.vmem [shape: f32[1,128], index: 2, kind: input, shape index: {}]   ;;  %s5749_s3 = inlined_call_operand.vmem [shape: bf16[3,384,128], index: 3, kind: input, shape index: {}]   ;;  %s5750_s4 = inlined_call_operand.vmem [shape: bf16[2,256,128], index: 4, kind: output, shape index: {0}]   ;;  %s5751_s5 = inlined_call_operand.vmem [shape: f32[2,2,128], index: 5, kind: output, shape index: {1}]  }
   0x1 LB: > { %s2869_s19 = sadd.s32 4294967295, %s4429_s18   ;;  %p2873_p0 = scmp.ge.s32.totalorder %s4429_s18, 1  ;;  %s4429_s18 = sphi %s4463_s18, %s16_s18  }
   0x2   : > { %p190_p1 = scmp.lt.s32.totalorder %s4429_s18, 3 }
   0x4   : > { %p191_p2 = pnand %p2873_p0, %p190_p1 }
   0x6   : > { %194 = sbr.rel (%p191_p2) target bundleno = 569 (0x239), region = 36 }
   0xd   : > { %v4351_v0 = vld [vmem:[%s5749_s3 + $0x100] sm:$0xff]   ;;  %v4354_v3 = vld [vmem:[%s5749_s3 + $0x108] sm:$0xff]   ;;  %v4357_v6 = vld [vmem:[%s5749_s3 + $0x110] sm:$0xff]   ;;  %p222_p3 = scmp.lt.s32.totalorder %s2869_s19, 1  ;;  %vm497_vm0 = vcmask 1040384   ;;  %vm4432_vm2 = vmmov 1  }
   0xe   : > { %v4477_v1 = vld [vmem:[%s5749_s3 + $0x140] sm:$0xff]   ;;  %3613 = vmatprep.subr.bf16.mxu0 %v4351_v0  ;;  %v4490_v4 = vld [vmem:[%s5749_s3 + $0x148] sm:$0xff]   ;;  %v4502_v7 = vld [vmem:[%s5749_s3 + $0x150] sm:$0xff]   ;;  %vm594_vm4 = vcmask 1046528  }
   0xf   : > { %v4353_v2 = vld [vmem:[%s5749_s3 + $0xc0] sm:$0xff]   ;;  %4165 = vmatprep.subr.bf16.mxu1 %v4477_v1  ;;  %v4356_v5 = vld [vmem:[%s5749_s3 + $0xc8] sm:$0xff]   ;;  %v4359_v8 = vld [vmem:[%s5749_s3 + $0xd0] sm:$0xff]   ;;  %s5761_s19 = smov (!%p222_p3, %s2869_s19), 1 }
  0x10   : > { %3614 = vmatpush3.bf16.msra.mxu0 %v4353_v2  ;;  %4173 = vmatpush3.bf16.msra.mxu1 %v4477_v1  ;;  %v4360_v9 = vld [vmem:[%s5749_s3 + $0x118] sm:$0xff]   ;;  %v4363_v12 = vld [vmem:[%s5749_s3 + $0x120] sm:$0xff]   ;;  %v4366_v15 = vld [vmem:[%s5749_s3 + $0x128] sm:$0xff]   ;;  %s3083_s6 = sshll.u32 %s5761_s19, 7 }
  0x11   : > { %3615 = vmatprep.subr.bf16.mxu0 %v4354_v3  ;;  %4166 = vmatprep.subr.bf16.mxu1 %v4490_v4  ;;  %v4515_v10 = vld [vmem:[%s5749_s3 + $0x158] sm:$0xff]   ;;  %v4530_v13 = vld [vmem:[%s5749_s3 + $0x160] sm:$0xff]   ;;  %v4547_v16 = vld [vmem:[%s5749_s3 + $0x168] sm:$0xff]   ;;  %s4568_s15 = scalar_lea.vmem %s5746_s0, %s3083_s6  ;;  %s5676_s20 = scalar_lea.vmem %s5750_s4, %s3083_s6 }
  0x12   : > { %v4362_v11 = vld [vmem:[%s5749_s3 + $0xd8] sm:$0xff]   ;;  %v4365_v14 = vld [vmem:[%s5749_s3 + $0xe0] sm:$0xff]   ;;  %v4368_v17 = vld [vmem:[%s5749_s3 + $0xe8] sm:$0xff]   ;;  %s2878_s6 = sshll.u32 %s5761_s19, 1 }
  0x13   : > { %v4369_v18 = vld [vmem:[%s5749_s3 + $0x130] sm:$0xff]   ;;  %v4372_v21 = vld [vmem:[%s5749_s3 + $0x138] sm:$0xff]   ;;  %v3118_v23 = vld [vmem:[%s4568_s15] sm:$0xff]   ;;  %s235_s23 = scalar_lea.vmem %s5751_s5, %s2878_s6 }
  0x14   : > { %3616 = vmatpush3.bf16.msra.mxu0 %v4356_v5  ;;  %4174 = vmatpush3.bf16.msra.mxu1 %v4490_v4  ;;  %v4561_v19 = vld [vmem:[%s5749_s3 + $0x170] sm:$0xff]   ;;  %v4580_v22 = vld [vmem:[%s5749_s3 + $0x178] sm:$0xff]   ;;  %v4586_v24 = vld [vmem:[%s5747_s1] ss:$0 sm:$0xff]  ;;  %v3119_v25 = vunpack.c.l.bf16 %v3118_v23  ;;  %v3120_v26 = vunpack.c.h.bf16 %v3118_v23 }
  0x15   : > { %3617 = vmatprep.subr.bf16.mxu0 %v4357_v6  ;;  %4167 = vmatprep.subr.bf16.mxu1 %v4502_v7  ;;  %v4371_v20 = vld [vmem:[%s5749_s3 + $0xf0] sm:$0xff]   ;;  %v3269_v27 = vld [vmem:[%s4568_s15 + $0x48] sm:$0xff]   ;;  %v4594_v29 = vld [vmem:[%s5748_s2] ss:$0 sm:$0xff] }
  0x16   : > { %v3270_v28 = vld [vmem:[%s4568_s15 + $0x50] sm:$0xff]   ;;  %v3155_v30 = vunpack.c.l.bf16 %v3269_v27  ;;  %v3156_v31 = vunpack.c.h.bf16 %v3269_v27  ;;  %v362_v34 = vmul.f32 %v3119_v25, %v4586_v24  ;;  %v363_v35 = vmul.f32 %v3120_v26, %v4586_v24  ;;  %v4374_v36 = vld [vmem:[%s5749_s3 + $0xf8] sm:$0xff]   ;;  %v4375_v43 = vld [vmem:[%s5749_s3 + $0x40] sm:$0xff]  }
  0x17   : > { %v3159_v32 = vunpack.c.l.bf16 %v3270_v28  ;;  %v3160_v33 = vunpack.c.h.bf16 %v3270_v28  ;;  %v3261_v44 = vld [vmem:[%s4568_s15 + $0x8] sm:$0xff]   ;;  %v3271_v53 = vld [vmem:[%s4568_s15 + $0x58] sm:$0xff]   ;;  %v3272_v58 = vld [vmem:[%s4568_s15 + $0x60] sm:$0xff]  }
  0x18   : > { %3618 = vmatpush3.bf16.msra.mxu0 %v4359_v8  ;;  %4175 = vmatpush3.bf16.msra.mxu1 %v4502_v7  ;;  %v380_v37 = vmul.f32 %v3155_v30, %v4586_v24  ;;  %v381_v38 = vmul.f32 %v3156_v31, %v4586_v24  ;;  %v401_v40 = vadd.f32 %v4594_v29, %v362_v34  ;;  %v3123_v48 = vunpack.c.l.bf16 %v3261_v44  ;;  %v4376_v62 = vld [vmem:[%s5749_s3] sm:$0xff]   ;;  %v4377_v63 = vld [vmem:[%s5749_s3 + $0x48] sm:$0xff]   ;;  %vm4825_vm1 = vmneg %vm497_vm0 }
  0x19   : > { %3619 = vmatprep.subr.bf16.mxu0 %v4360_v9  ;;  %4168 = vmatprep.subr.bf16.mxu1 %v4515_v10  ;;  %v382_v39 = vmul.f32 %v3159_v32, %v4586_v24  ;;  %v402_v41 = vadd.f32 %v4594_v29, %v363_v35  ;;  %v383_v42 = vmul.f32 %v3160_v33, %v4586_v24  ;;  %v3124_v52 = vunpack.c.h.bf16 %v3261_v44  ;;  %v4378_v23 = vld [vmem:[%s5749_s3 + $0x8] sm:$0xff]   ;;  %vm4849_vm3 = vmpackc.low %vm4432_vm2, %vm4825_vm1 }
  0x1a   : > { %v419_v45 = vadd.f32 %v4594_v29, %v380_v37  ;;  %v420_v46 = vadd.f32 %v4594_v29, %v381_v38  ;;  %v4616_v49 = vmax.f32 %v401_v40, 0.0  ;;  %v364_v57 = vmul.f32 %v3123_v48, %v4586_v24  ;;  %v3274_v38 = vld [vmem:[%s4568_s15 + $0x70] sm:$0xff]   ;;  %v3263_v48 = vld [vmem:[%s4568_s15 + $0x18] sm:$0xff]   ;;  %vm5225_vm5 = vmpackc.low %vm594_vm4, %vm4432_vm2 }
  0x1b   : > { %v421_v47 = vadd.f32 %v4594_v29, %v382_v39  ;;  %v4618_v50 = vmax.f32 %v402_v41, 0.0  ;;  %v422_v51 = vadd.f32 %v4594_v29, %v383_v42  ;;  %v365_v2 = vmul.f32 %v3124_v52, %v4586_v24 }
  0x1c   : > { %3620 = vmatpush3.bf16.msra.mxu0 %v4362_v11  ;;  %4176 = vmatpush3.bf16.msra.mxu1 %v4515_v10  ;;  %v4623_v54 = vmax.f32 %v419_v45, 0.0  ;;  %v4625_v55 = vmax.f32 %v420_v46, 0.0  ;;  %v403_v3 = vadd.f32 %v4594_v29, %v364_v57  ;;  %v3163_v5 = vunpack.c.l.bf16 %v3271_v53  ;;  %v4380_v46 = vld [vmem:[%s5749_s3 + $0x10] sm:$0xff]  }
  0x1d   : > { %3621 = vmatprep.subr.bf16.mxu0 %v4363_v12  ;;  %4169 = vmatprep.subr.bf16.mxu1 %v4530_v13  ;;  %v4627_v56 = vmax.f32 %v421_v47, 0.0  ;;  %v499_v59 = vrot.slane %v4618_v50, 7  ;;  %v4634_v60 = vpack.c.bf16 %v4618_v50, %v4616_v49  ;;  %v4637_v61 = vmax.f32 %v422_v51, 0.0  ;;  %v3262_v12 = vld [vmem:[%s4568_s15 + $0x10] sm:$0xff]  }
  0x1e   : > { %v4647_v0 = vpack.c.bf16 %v4625_v55, %v4623_v54  ;;  %v3164_v8 = vunpack.c.h.bf16 %v3271_v53  ;;  %v3167_v9 = vunpack.c.l.bf16 %v3272_v58  ;;  %v3168_v11 = vunpack.c.h.bf16 %v3272_v58  ;;  %v3275_v58 = vld [vmem:[%s4568_s15 + $0x78] sm:$0xff]  }
  0x1f   : > { %1162 = vmatprep.mubr.bf16.mxu0 %v4634_v60  ;;  %v4654_v6 = vpack.c.bf16 %v4637_v61, %v4627_v56  ;;  %v3128_v28 = vunpack.c.h.bf16 %v3262_v12  ;;  %v3175_v57 = vunpack.c.l.bf16 %v3274_v38 }
  0x20   : > { %3622 = vmatpush3.bf16.msra.mxu0 %v4365_v14  ;;  %4177 = vmatpush3.bf16.msra.mxu1 %v4530_v13  ;;  %v3273_v14 = vld [vmem:[%s4568_s15 + $0x68] sm:$0xff]   ;;  %v385_v25 = vmul.f32 %v3164_v8, %v4586_v24  ;;  %v386_v26 = vmul.f32 %v3167_v9, %v4586_v24  ;;  %v387_v27 = vmul.f32 %v3168_v11, %v4586_v24  ;;  %v3131_v11 = vunpack.c.l.bf16 %v3263_v48 }
  0x21   : > { %3623 = vmatprep.subr.bf16.mxu0 %v4366_v15  ;;  %4170 = vmatprep.subr.bf16.mxu1 %v4547_v16  ;;  %v4431_v15 = vmov 0   ;;  %v3171_v33 = vunpack.c.l.bf16 %v3273_v14  ;;  %v367_v37 = vmul.f32 %v3128_v28, %v4586_v24  ;;  %v3172_v42 = vunpack.c.h.bf16 %v3273_v14 }
  0x22   : > { %4053 = vmatprep.mubr.bf16.mxu1 %v4647_v0  ;;  %v424_v34 = vadd.f32 %v4594_v29, %v385_v25  ;;  %v425_v35 = vadd.f32 %v4594_v29, %v386_v26  ;;  %v390_v9 = vmul.f32 %v3175_v57, %v4586_v24  ;;  %v368_v26 = vmul.f32 %v3131_v11, %v4586_v24 }
  0x23   : > { %v406_v47 = vadd.f32 %v4594_v29, %v367_v37  ;;  %v388_v52 = vmul.f32 %v3171_v33, %v4586_v24  ;;  %v389_v53 = vmul.f32 %v3172_v42, %v4586_v24 }
  0x24   : > { %3624 = vmatpush3.bf16.msra.mxu0 %v4368_v17  ;;  %4178 = vmatpush3.bf16.msra.mxu1 %v4547_v16  ;;  %v404_v17 = vadd.f32 %v4594_v29, %v365_v2  ;;  %v4694_v44 = vmax.f32 %v425_v35, 0.0  ;;  %v429_v25 = vadd.f32 %v4594_v29, %v390_v9  ;;  %v407_v35 = vadd.f32 %v4594_v29, %v368_v26 }
  0x25   : > { %3625 = vmatprep.subr.bf16.mxu0 %v4369_v18  ;;  %4171 = vmatprep.subr.bf16.mxu1 %v4561_v19  ;;  %v4661_v18 = vmax.f32 %v403_v3, 0.0  ;;  %v4721_v2 = vmax.f32 %v406_v47, 0.0  ;;  %v3176_v3 = vunpack.c.h.bf16 %v3274_v38  ;;  %v428_v8 = vadd.f32 %v4594_v29, %v389_v53 }
  0x26   : > { %v4672_v30 = vmax.f32 %v404_v17, 0.0  ;;  %v3132_v17 = vunpack.c.h.bf16 %v3263_v48  ;;  %v4755_v33 = vmax.f32 %v429_v25, 0.0  ;;  %v4769_v47 = vmax.f32 %v407_v35, 0.0 }
  0x27   : > { %v391_v14 = vmul.f32 %v3176_v3, %v4586_v24  ;;  %v498_v53 = vrot.slane %v4616_v49, 7 }
  0x28   : > { %3626 = vmatpush3.bf16.msra.mxu0 %v4371_v20  ;;  %4179 = vmatpush3.bf16.msra.mxu1 %v4561_v19  ;;  %v384_v20 = vmul.f32 %v3163_v5, %v4586_v24  ;;  %v4687_v39 = vpack.c.bf16 %v4672_v30, %v4661_v18  ;;  %v427_v5 = vadd.f32 %v4594_v29, %v388_v52 }
  0x29   : > { %3627 = vmatprep.subr.bf16.mxu0 %v4372_v21  ;;  %4172 = vmatprep.subr.bf16.mxu1 %v4580_v22  ;;  %v3127_v21 = vunpack.c.l.bf16 %v3262_v12  ;;  %v369_v28 = vmul.f32 %v3132_v17, %v4586_v24 }
  0x2a   : > { %v423_v31 = vadd.f32 %v4594_v29, %v384_v20  ;;  %v3179_v20 = vunpack.c.l.bf16 %v3275_v58 }
  0x2b   : > { %v366_v32 = vmul.f32 %v3127_v21, %v4586_v24  ;;  %v3264_v21 = vld [vmem:[%s4568_s15 + $0x20] sm:$0xff]   ;;  %v408_v38 = vadd.f32 %v4594_v29, %v369_v28 }
  0x2c   : > { %3628 = vmatpush3.bf16.msra.mxu0 %v4374_v36  ;;  %4180 = vmatpush3.bf16.msra.mxu1 %v4580_v22  ;;  %v426_v36 = vadd.f32 %v4594_v29, %v387_v27  ;;  %v4689_v40 = vmax.f32 %v423_v31, 0.0  ;;  %v4382_v27 = vld [vmem:[%s5749_s3 + $0x18] sm:$0xff]   ;;  %v3180_v31 = vunpack.c.h.bf16 %v3275_v58  ;;  %v3136_v48 = vunpack.c.h.bf16 %v3264_v21  ;;  %v4385_v58 = vld [vmem:[%s5749_s3 + $0x68] sm:$0xff]  }
  0x2d   : > { %4021 = vmatprep.subr.bf16.mxu0 %v4477_v1  ;;  %3749 = vmatprep.subr.bf16.mxu1 %v4375_v43  ;;  %v405_v41 = vadd.f32 %v4594_v29, %v366_v32  ;;  %v4692_v43 = vmax.f32 %v424_v34, 0.0  ;;  %v4383_v34 = vld [vmem:[%s5749_s3 + $0x60] sm:$0xff]  }
  0x2e   : > { %v4696_v45 = vmax.f32 %v426_v36, 0.0  ;;  %v3135_v36 = vunpack.c.l.bf16 %v3264_v21 }
  0x2f   : > { %1163 = vmatmul.mubr.bf16.vlgmr.msra.gmra.mrb[0].mxu0 %v4431_v15  ;;  %4054 = vmatmul.mubr.bf16.vlgmr.msra.gmra.mrb[0].mxu1 %v4654_v6  ;;  %v4705_v51 = vmax.f32 %v405_v41, 0.0  ;;  %v393_v41 = vmul.f32 %v3180_v31, %v4586_v24  ;;  %v4387_v31 = vld [vmem:[%s5749_s3 + $0x70] sm:$0xff]  }
  0x30   : > { %4022 = vmatpush3.bf16.msra.mxu0 %v4477_v1  ;;  %3750 = vmatpush3.bf16.msra.mxu1 %v4376_v62  ;;  %v4379_v1 = vld [vmem:[%s5749_s3 + $0x50] sm:$0xff]   ;;  %v4712_v62 = vpack.c.bf16 %v4692_v43, %v4689_v40  ;;  %v370_v52 = vmul.f32 %v3135_v36, %v4586_v24 }
  0x31   : > { %4023 = vmatprep.subr.bf16.mxu0 %v4490_v4  ;;  %3751 = vmatprep.subr.bf16.mxu1 %v4377_v63  ;;  %v4716_v63 = vpack.c.bf16 %v4696_v45, %v4694_v44  ;;  %v4731_v12 = vpack.c.bf16 %v4721_v2, %v4705_v51  ;;  %v432_v3 = vadd.f32 %v4594_v29, %v393_v41 }
  0x32   : > { %1170 = vmatprep.mubr.bf16.mxu0 %v4687_v39  ;;  %4057 = vmatprep.mubr.bf16.mxu1 %v4712_v62  ;;  %v409_v9 = vadd.f32 %v4594_v29, %v370_v52 }
  0x33   : > { %v4796_v17 = vmax.f32 %v432_v3, 0.0 }
  0x34   : > { %4024 = vmatpush3.bf16.msra.mxu0 %v4490_v4  ;;  %3752 = vmatpush3.bf16.msra.mxu1 %v4378_v23  ;;  %v4381_v4 = vld [vmem:[%s5749_s3 + $0x58] sm:$0xff]   ;;  %v4739_v23 = vmax.f32 %v428_v8, 0.0  ;;  %v371_v8 = vmul.f32 %v3136_v48, %v4586_v24  ;;  %v4801_v25 = vmax.f32 %v409_v9, 0.0 }
  0x35   : > { %3753 = vmatprep.subr.bf16.mxu1 %v4379_v1  ;;  %4025 = vmatprep.subr.bf16.mxu0 %v4502_v7  ;;  %v392_v1 = vmul.f32 %v3179_v20, %v4586_v24  ;;  %v4389_v48 = vld [vmem:[%s5749_s3 + $0x78] sm:$0xff]  }
  0x36   : > { %v410_v21 = vadd.f32 %v4594_v29, %v371_v8 }
  0x37   : > { %1171 = vmatmul.mubr.bf16.gmra.mrb[4].mxu0 %v4634_v60  ;;  %4058 = vmatmul.mubr.bf16.gmra.mrb[4].mxu1 %v4716_v63  ;;  %v4737_v60 = vmax.f32 %v427_v5, 0.0  ;;  %v431_v42 = vadd.f32 %v4594_v29, %v392_v1 }
  0x38   : > { %4026 = vmatpush3.bf16.msra.mxu0 %v4502_v7  ;;  %3754 = vmatpush3.bf16.msra.mxu1 %v4380_v46  ;;  %v430_v7 = vadd.f32 %v4594_v29, %v391_v14  ;;  %v3265_v46 = vld [vmem:[%s4568_s15 + $0x28] sm:$0xff]   ;;  %v4818_v1 = vmax.f32 %v410_v21, 0.0  ;;  %v4390_v21 = vld [vmem:[%s5749_s3 + $0x38] sm:$0xff]  }
  0x39   : > { %4027 = vmatprep.subr.bf16.mxu0 %v4515_v10  ;;  %1178 = vmatprep.mubr.bf16.mxu0 %v4731_v12  ;;  %v4753_v32 = vpack.c.bf16 %v4739_v23, %v4737_v60  ;;  %v4787_v5 = vmax.f32 %v431_v42, 0.0  ;;  %v3139_v11 = vunpack.c.l.bf16 %v3265_v46  ;;  %v3140_v20 = vunpack.c.h.bf16 %v3265_v46  ;;  %v4388_v46 = vld [vmem:[%s5749_s3 + $0x30] sm:$0xff]  }
  0x3a   : > { %3755 = vmatprep.subr.bf16.mxu1 %v4381_v4  ;;  %v4761_v37 = vmax.f32 %v430_v7, 0.0  ;;  %v4784_v4 = vmax.f32 %v408_v38, 0.0  ;;  %v4386_v7 = vld [vmem:[%s5749_s3 + $0x28] sm:$0xff]  }
  0x3b   : > { %4061 = vmatprep.mubr.bf16.mxu1 %v4753_v32  ;;  %v372_v26 = vmul.f32 %v3139_v11, %v4586_v24  ;;  %v373_v28 = vmul.f32 %v3140_v20, %v4586_v24  ;;  %v3267_v11 = vld [vmem:[%s4568_s15 + $0x38] sm:$0xff]   ;;  %v4398_v20 = vld [vmem:[%s5749_s3 + $0x1c0] sm:$0xff]  }
  0x3c   : > { %4028 = vmatpush3.bf16.msra.mxu0 %v4515_v10  ;;  %3756 = vmatpush3.bf16.msra.mxu1 %v4382_v27  ;;  %v4776_v57 = vpack.c.bf16 %v4761_v37, %v4755_v33  ;;  %v4384_v10 = vld [vmem:[%s5749_s3 + $0x20] sm:$0xff]   ;;  %v4794_v14 = vpack.c.bf16 %v4784_v4, %v4769_v47  ;;  %v3266_v27 = vld [vmem:[%s4568_s15 + $0x30] sm:$0xff]  }
  0x3d   : > { %4029 = vmatprep.subr.bf16.mxu0 %v4530_v13  ;;  %3757 = vmatprep.subr.bf16.mxu1 %v4383_v34  ;;  %v500_v34 = vsel %vm497_vm0, %v498_v53, %v499_v59  ;;  %v411_v36 = vadd.f32 %v4594_v29, %v372_v26  ;;  %v412_v38 = vadd.f32 %v4594_v29, %v373_v28  ;;  %v3143_v41 = vunpack.c.l.bf16 %v3266_v27 }
  0x3e   : > { %v3144_v42 = vunpack.c.h.bf16 %v3266_v27  ;;  %v4837_v59 = vpack.c.bf16 %v4818_v1, %v4801_v25  ;;  %v4843_v52 = vpack.c.bf16 %v500_v34, %v498_v53  ;;  %v3147_v27 = vunpack.c.l.bf16 %v3267_v11 }
  0x3f   : > { %1179 = vmatmul.mubr.bf16.gmra.mrb[8].mxu0 %v4687_v39  ;;  %4062 = vmatmul.mubr.bf16.gmra.mrb[8].mxu1 %v4776_v57  ;;  %v4856_v3 = vmax.f32 %v411_v36, 0.0  ;;  %v4858_v53 = vmax.f32 %v412_v38, 0.0  ;;  %v374_v8 = vmul.f32 %v3143_v41, %v4586_v24  ;;  %v3148_v34 = vunpack.c.h.bf16 %v3267_v11  ;;  %v4392_v36 = vld [vmem:[%s5749_s3 + $0x88] sm:$0xff]   ;;  %v3268_v38 = vld [vmem:[%s4568_s15 + $0x40] sm:$0xff]   ;;  %v4393_v11 = vld [vmem:[%s5749_s3 + $0x90] sm:$0xff]  }
  0x40   : > { %4030 = vmatpush3.bf16.msra.mxu0 %v4530_v13  ;;  %3758 = vmatpush3.bf16.msra.mxu1 %v4384_v10  ;;  %v4812_v13 = vpack.c.bf16 %v4796_v17, %v4787_v5  ;;  %v501_v10 = vrot.slane %v4661_v18, 7  ;;  %v375_v9 = vmul.f32 %v3144_v42, %v4586_v24  ;;  %v504_v41 = vrot.slane %v4705_v51, 7 }
  0x41   : > { %4031 = vmatprep.subr.bf16.mxu0 %v4547_v16  ;;  %1186 = vmatprep.mubr.bf16.mxu0 %v4794_v14  ;;  %v413_v28 = vadd.f32 %v4594_v29, %v374_v8  ;;  %v505_v42 = vrot.slane %v4721_v2, 7 }
  0x42   : > { %3759 = vmatprep.subr.bf16.mxu1 %v4385_v58  ;;  %4065 = vmatprep.mubr.bf16.mxu1 %v4812_v13  ;;  %v502_v58 = vrot.slane %v4672_v30, 7 }
  0x44   : > { %4032 = vmatpush3.bf16.msra.mxu0 %v4547_v16  ;;  %3760 = vmatpush3.bf16.msra.mxu1 %v4386_v7  ;;  %v503_v26 = vsel %vm497_vm0, %v501_v10, %v502_v58  ;;  %v4881_v7 = vpack.c.bf16 %v4858_v53, %v4856_v3  ;;  %v506_v58 = vsel %vm497_vm0, %v504_v41, %v505_v42 }
  0x45   : > { %4033 = vmatprep.subr.bf16.mxu0 %v4561_v19  ;;  %3761 = vmatprep.subr.bf16.mxu1 %v4387_v31  ;;  %v414_v31 = vadd.f32 %v4594_v29, %v375_v9  ;;  %v4886_v35 = vpack.c.bf16 %v503_v26, %v501_v10  ;;  %v377_v10 = vmul.f32 %v3148_v34, %v4586_v24  ;;  %v3151_v9 = vunpack.c.l.bf16 %v3268_v38 }
  0x46   : > { %v595_v26 = vrot.slane %v4616_v49, 1  ;;  %v508_v34 = vrot.slane %v4784_v4, 7 }
  0x47   : > { %1187 = vmatmul.mubr.bf16.gmra.mrb[12].mxu0 %v4731_v12  ;;  %4066 = vmatmul.mubr.bf16.gmra.mrb[12].mxu1 %v4431_v15  ;;  %v378_v42 = vmul.f32 %v3151_v9, %v4586_v24 }
  0x48   : > { %1194 = vmatprep.mubr.bf16.mxu0 %v4837_v59  ;;  %4034 = vmatpush3.bf16.msra.mxu0 %v4561_v19  ;;  %v4391_v19 = vld [vmem:[%s5749_s3 + $0x80] sm:$0xff]  }
  0x49   : > { %4035 = vmatprep.subr.bf16.mxu0 %v4580_v22  ;;  %3762 = vmatpush3.bf16.msra.mxu1 %v4388_v46  ;;  %v376_v46 = vmul.f32 %v3147_v27, %v4586_v24  ;;  %v4917_v27 = vpack.c.bf16 %v506_v58, %v504_v41  ;;  %v596_v41 = vrot.slane %v4618_v50, 1  ;;  %v4395_v50 = vld [vmem:[%s5749_s3 + $0xa0] sm:$0xff]  }
  0x4a   : > { %3294 = vmatprep.mubr.msk.bf16.mxu1 %vm4849_vm3, %v4843_v52  ;;  %3763 = vmatprep.subr.bf16.mxu1 %v4389_v48  ;;  %v4899_v48 = vmax.f32 %v414_v31, 0.0  ;;  %v507_v31 = vrot.slane %v4769_v47, 7 }
  0x4b   : > { %v415_v8 = vadd.f32 %v4594_v29, %v376_v46  ;;  %v598_v46 = vrot.slane %v4661_v18, 1  ;;  %v597_v58 = vsel %vm594_vm4, %v595_v26, %v596_v41 }
  0x4c   : > { %4036 = vmatpush3.bf16.msra.mxu0 %v4580_v22  ;;  %v4897_v22 = vmax.f32 %v413_v28, 0.0 }
  0x4d   : > { %3885 = vmatprep.subr.bf16.mxu0 %v4398_v20  ;;  %3764 = vmatpush3.bf16.msra.mxu1 %v4390_v21  ;;  %v416_v21 = vadd.f32 %v4594_v29, %v377_v10  ;;  %v4920_v28 = vmax.f32 %v415_v8, 0.0  ;;  %v599_v10 = vrot.slane %v4672_v30, 1  ;;  %v509_v8 = vsel %vm497_vm0, %v507_v31, %v508_v34 }
  0x4e   : > { %4069 = vmatprep.subr.bf16.mxu1 %v4391_v19  ;;  %v4913_v20 = vpack.c.bf16 %v4899_v48, %v4897_v22  ;;  %v602_v30 = vrot.slane %v4721_v2, 1  ;;  %v4960_v26 = vpack.c.bf16 %v509_v8, %v507_v31  ;;  %v510_v2 = vrot.slane %v4801_v25, 7 }
  0x4f   : > { %1195 = vmatmul.mubr.bf16.gmra.mrb[16].mxu0 %v4794_v14  ;;  %v4929_v49 = vmax.f32 %v416_v21, 0.0  ;;  %v600_v18 = vsel %vm594_vm4, %v598_v46, %v599_v10 }
  0x50   : > { %1202 = vmatprep.mubr.bf16.mxu0 %v4881_v7  ;;  %1629 = vmatmul.mubr.bf16.vlgmr.msra.gmra.mrb[16].mxu1 %v4431_v15  ;;  %v4957_v21 = vpack.c.bf16 %v599_v10, %v600_v18  ;;  %v4397_v10 = vld [vmem:[%s5749_s3 + $0xb0] sm:$0xff]   ;;  %v4406_v18 = vld [vmem:[%s5749_s3 + $0xb8] sm:$0xff]  }
  0x51   : > { %4070 = vmatpush3.bf16.msra.mxu1 %v4391_v19  ;;  %3298 = vmatprep.mubr.msk.bf16.mxu1 %vm4849_vm3, %v4886_v35  ;;  %v3152_v19 = vunpack.c.h.bf16 %v3268_v38  ;;  %v4394_v38 = vld [vmem:[%s5749_s3 + $0x98] sm:$0xff]   ;;  %v4953_v9 = vpack.c.bf16 %v4929_v49, %v4920_v28 }
  0x52   : > { %4071 = vmatprep.subr.bf16.mxu1 %v4392_v36 }
  0x55   : > { %4072 = vmatpush3.bf16.msra.mxu1 %v4392_v36  ;;  %v379_v36 = vmul.f32 %v3152_v19, %v4586_v24  ;;  %v601_v24 = vrot.slane %v4705_v51, 1 }
  0x56   : > { %4073 = vmatprep.subr.bf16.mxu1 %v4393_v11 }
  0x57   : > { %1203 = vmatmul.mubr.bf16.gmra.mrb[20].mxu0 %v4837_v59  ;;  %v418_v51 = vadd.f32 %v4594_v29, %v379_v36  ;;  %v603_v19 = vsel %vm594_vm4, %v601_v24, %v602_v30  ;;  %v605_v36 = vrot.slane %v4784_v4, 1  ;;  %v514_v4 = vrot.slane %v4858_v53, 7 }
  0x58   : > { %1210 = vmatprep.mubr.bf16.mxu0 %v4913_v20  ;;  %3302 = vmatmul.mubr.msk.bf16.gmra.mrb[20].mxu1 %vm4849_vm3, %v4843_v52  ;;  %v4947_v52 = vpack.c.bf16 %v596_v41, %v597_v58  ;;  %v4962_v34 = vpack.c.bf16 %v602_v30, %v603_v19  ;;  %v511_v41 = vrot.slane %v4818_v1, 7  ;;  %v607_v30 = vrot.slane %v4801_v25, 1  ;;  %v5015_v19 = vld [vmem:[%s5749_s3 + $0x200] sm:$0xff]  }
  0x59   : > { %3306 = vmatprep.mubr.msk.bf16.mxu1 %vm4849_vm3, %v4917_v27  ;;  %4074 = vmatpush3.bf16.msra.mxu1 %v4393_v11  ;;  %v417_v11 = vadd.f32 %v4594_v29, %v378_v42  ;;  %v4396_v29 = vld [vmem:[%s5749_s3 + $0xa8] sm:$0xff]   ;;  %v4973_v31 = vmax.f32 %v418_v51, 0.0  ;;  %v516_v25 = vrot.slane %v4897_v22, 7 }
  0x5a   : > { %4075 = vmatprep.subr.bf16.mxu1 %v4394_v38  ;;  %v512_v46 = vsel %vm497_vm0, %v510_v2, %v511_v41 }
  0x5b   : > { %v4971_v42 = vmax.f32 %v417_v11, 0.0  ;;  %v608_v11 = vrot.slane %v4818_v1, 1  ;;  %v517_v1 = vrot.slane %v4899_v48, 7 }
  0x5d   : > { %4076 = vmatpush3.bf16.msra.mxu1 %v4394_v38  ;;  %v604_v38 = vrot.slane %v4769_v47, 1  ;;  %v4989_v58 = vpack.c.bf16 %v4973_v31, %v4971_v42  ;;  %v513_v47 = vrot.slane %v4856_v3, 7 }
  0x5e   : > { %4077 = vmatprep.subr.bf16.mxu1 %v4395_v50 }
  0x5f   : > { %1211 = vmatmul.mubr.bf16.gmra.mrb[24].mxu0 %v4881_v7  ;;  %v606_v24 = vsel %vm594_vm4, %v604_v38, %v605_v36  ;;  %v515_v51 = vsel %vm497_vm0, %v513_v47, %v514_v4  ;;  %v610_v38 = vrot.slane %v4856_v3, 1  ;;  %v519_v4 = vrot.slane %v4920_v28, 7 }
  0x60   : > { %1218 = vmatprep.mubr.bf16.mxu0 %v4953_v9  ;;  %3310 = vmatmul.mubr.msk.bf16.gmra.mrb[24].mxu1 %vm4849_vm3, %v4886_v35  ;;  %v4992_v8 = vpack.c.bf16 %v605_v36, %v606_v24  ;;  %v611_v36 = vrot.slane %v4858_v53, 1  ;;  %v613_v3 = vrot.slane %v4897_v22, 1  ;;  %v614_v53 = vrot.slane %v4899_v48, 1 }
  0x61   : > { %3314 = vmatprep.mubr.msk.bf16.mxu1 %vm4849_vm3, %v4960_v26  ;;  %4078 = vmatpush3.bf16.msra.mxu1 %v4395_v50  ;;  %v4994_v50 = vpack.c.bf16 %v512_v46, %v510_v2  ;;  %v609_v2 = vsel %vm594_vm4, %v607_v30, %v608_v11  ;;  %v518_v46 = vsel %vm497_vm0, %v516_v25, %v517_v1  ;;  %v523_v1 = vrot.slane %v4973_v31, 7 }
  0x62   : > { %4079 = vmatprep.subr.bf16.mxu1 %v4396_v29  ;;  %v5018_v41 = vpack.c.bf16 %v608_v11, %v609_v2  ;;  %v615_v11 = vsel %vm594_vm4, %v613_v3, %v614_v53  ;;  %v616_v48 = vrot.slane %v4920_v28, 1 }
  0x65   : > { %4080 = vmatpush3.bf16.msra.mxu1 %v4396_v29  ;;  %v5020_v29 = vpack.c.bf16 %v515_v51, %v513_v47  ;;  %v5039_v47 = vpack.c.bf16 %v518_v46, %v516_v25  ;;  %v5055_v51 = vpack.c.bf16 %v614_v53, %v615_v11  ;;  %v522_v25 = vrot.slane %v4971_v42, 7 }
  0x66   : > { %4081 = vmatprep.subr.bf16.mxu1 %v4397_v10  ;;  %v529_v11 = vrot.slane %v4637_v61, 7 }
  0x67   : > { %1219 = vmatmul.mubr.bf16.gmra.mrb[28].mxu0 %v4913_v20  ;;  %v524_v22 = vsel %vm497_vm0, %v522_v25, %v523_v1 }
  0x68   : > { %1226 = vmatprep.mubr.bf16.mxu0 %v4989_v58  ;;  %3318 = vmatmul.mubr.msk.bf16.gmra.mrb[28].mxu1 %vm4849_vm3, %v4917_v27 }
  0x69   : > { %3322 = vmatprep.mubr.msk.bf16.mxu1 %vm4849_vm3, %v4994_v50  ;;  %4082 = vmatpush3.bf16.msra.mxu1 %v4397_v10  ;;  %v612_v10 = vsel %vm594_vm4, %v610_v38, %v611_v36 }
  0x6a   : > { %4083 = vmatprep.subr.bf16.mxu1 %v4406_v18  ;;  %v5037_v24 = vpack.c.bf16 %v611_v36, %v612_v10  ;;  %v5073_v36 = vpack.c.bf16 %v524_v22, %v522_v25  ;;  %v525_v10 = vrot.slane %v4623_v54, 7  ;;  %v532_v25 = vrot.slane %v4692_v43, 7 }
  0x6d   : > { %4084 = vmatpush3.bf16.msra.mxu1 %v4406_v18  ;;  %v520_v18 = vrot.slane %v4929_v49, 7 }
  0x6e   : > { %4117 = vmatprep.subr.bf16.mxu1 %v5015_v19 }
  0x6f   : > { %1227 = vmatmul.mubr.bf16.gmra.mrb[32].mxu0 %v4953_v9  ;;  %v521_v30 = vsel %vm497_vm0, %v519_v4, %v520_v18 }
  0x70   : > { %1234 = vmatprep.mubr.bf16.mxu0 %v4647_v0  ;;  %3326 = vmatmul.mubr.msk.bf16.gmra.mrb[32].mxu1 %vm4849_vm3, %v4960_v26  ;;  %v5057_v2 = vpack.c.bf16 %v521_v30, %v519_v4  ;;  %v526_v4 = vrot.slane %v4625_v55, 7  ;;  %v528_v30 = vrot.slane %v4627_v56, 7 }
  0x71   : > { %3330 = vmatprep.mubr.msk.bf16.mxu1 %vm4849_vm3, %v5020_v29 }
  0x72   : > { %v527_v28 = vsel %vm497_vm0, %v525_v10, %v526_v4  ;;  %v4400_v4 = vld [vmem:[%s5749_s3 + $0x1c8] sm:$0xff]  }
  0x73   : > { %v5091_v3 = vpack.c.bf16 %v527_v28, %v525_v10  ;;  %v538_v10 = vrot.slane %v4739_v23, 7 }
  0x77   : > { %1235 = vmatmul.mubr.bf16.gmra.mrb[36].mxu0 %v4989_v58 }
  0x78   : > { %1242 = vmatprep.mubr.bf16.mxu0 %v4654_v6  ;;  %3334 = vmatmul.mubr.msk.bf16.gmra.mrb[36].mxu1 %vm4849_vm3, %v4994_v50 }
  0x79   : > { %3338 = vmatprep.mubr.msk.bf16.mxu1 %vm4849_vm3, %v5039_v47 }
  0x7f   : > { %1243 = vmatmul.mubr.bf16.gmra.mrb[40].mxu0 %v4647_v0  ;;  %v617_v0 = vrot.slane %v4929_v49, 1  ;;  %v619_v49 = vrot.slane %v4971_v42, 1  ;;  %v530_v42 = vsel %vm497_vm0, %v528_v30, %v529_v11 }
  0x80   : > { %1250 = vmatprep.mubr.bf16.mxu0 %v4712_v62  ;;  %3342 = vmatmul.mubr.msk.bf16.gmra.mrb[40].mxu1 %vm4849_vm3, %v5020_v29 }
  0x81   : > { %3346 = vmatprep.mubr.msk.bf16.mxu1 %vm4849_vm3, %v5057_v2  ;;  %v618_v38 = vsel %vm594_vm4, %v616_v48, %v617_v0  ;;  %v535_v48 = vrot.slane %v4696_v45, 7 }
  0x82   : > { %v5075_v46 = vpack.c.bf16 %v617_v0, %v618_v38 }
  0x87   : > { %1251 = vmatmul.mubr.bf16.gmra.mrb[44].mxu0 %v4654_v6  ;;  %v620_v6 = vrot.slane %v4973_v31, 1  ;;  %v5106_v31 = vpack.c.bf16 %v530_v42, %v528_v30  ;;  %v4404_v30 = vld [vmem:[%s5749_s3 + $0x1d8] sm:$0xff]   ;;  %v543_v42 = vrot.slane %v4787_v5, 7 }
  0x88   : > { %1258 = vmatprep.mubr.bf16.mxu0 %v4716_v63  ;;  %3350 = vmatmul.mubr.msk.bf16.gmra.mrb[44].mxu1 %vm4849_vm3, %v5039_v47 }
  0x89   : > { %3354 = vmatprep.mubr.msk.bf16.mxu1 %vm4849_vm3, %v5073_v36  ;;  %v621_v18 = vsel %vm594_vm4, %v619_v49, %v620_v6  ;;  %v541_v49 = vrot.slane %v4761_v37, 7 }
  0x8a   : > { %v5093_v53 = vpack.c.bf16 %v620_v6, %v621_v18  ;;  %v4401_v6 = vld [vmem:[%s5749_s3 + $0x188] sm:$0xff]  }
  0x8f   : > { %1259 = vmatmul.mubr.bf16.gmra.mrb[48].mxu0 %v4712_v62  ;;  %v531_v62 = vrot.slane %v4689_v40, 7 }
  0x90   : > { %1266 = vmatprep.mubr.bf16.mxu0 %v4753_v32  ;;  %3358 = vmatmul.mubr.msk.bf16.gmra.mrb[48].mxu1 %vm4849_vm3, %v5057_v2 }
  0x91   : > { %3362 = vmatprep.mubr.msk.bf16.mxu1 %vm4849_vm3, %v5091_v3  ;;  %v533_v1 = vsel %vm497_vm0, %v531_v62, %v532_v25  ;;  %v4405_v25 = vld [vmem:[%s5749_s3 + $0x198] sm:$0xff]  }
  0x92   : > { %v5119_v22 = vpack.c.bf16 %v533_v1, %v531_v62  ;;  %v544_v62 = vrot.slane %v4796_v17, 7 }
  0x94   : > { %v545_v1 = vsel %vm497_vm0, %v543_v42, %v544_v62  ;;  %v629_v62 = vrot.slane %v4692_v43, 1 }
  0x97   : > { %1267 = vmatmul.mubr.bf16.gmra.mrb[52].mxu0 %v4716_v63  ;;  %v534_v63 = vrot.slane %v4694_v44, 7 }
  0x98   : > { %1274 = vmatprep.mubr.bf16.mxu0 %v4776_v57  ;;  %3366 = vmatmul.mubr.msk.bf16.gmra.mrb[52].mxu1 %vm4849_vm3, %v5073_v36 }
  0x99   : > { %3370 = vmatprep.mubr.msk.bf16.mxu1 %vm4849_vm3, %v5106_v31  ;;  %v536_v0 = vsel %vm497_vm0, %v534_v63, %v535_v48  ;;  %v5201_v48 = vpack.c.bf16 %v545_v1, %v543_v42  ;;  %v628_v42 = vrot.slane %v4689_v40, 1 }
  0x9a   : > { %v5132_v38 = vpack.c.bf16 %v536_v0, %v534_v63  ;;  %v4409_v63 = vld [vmem:[%s5749_s3 + $0x1e8] sm:$0xff]  }
  0x9b   : > { %v4410_v0 = vld [vmem:[%s5749_s3 + $0x1a8] sm:$0xff]  }
  0x9f   : > { %1275 = vmatmul.mubr.bf16.gmra.mrb[56].mxu0 %v4753_v32  ;;  %v537_v32 = vrot.slane %v4737_v60, 7 }
  0xa0   : > { %1282 = vmatprep.mubr.bf16.mxu0 %v4812_v13  ;;  %3374 = vmatmul.mubr.msk.bf16.gmra.mrb[56].mxu1 %vm4849_vm3, %v5091_v3 }
  0xa1   : > { %3378 = vmatprep.mubr.msk.bf16.mxu1 %vm4849_vm3, %v5119_v22  ;;  %v539_v13 = vsel %vm497_vm0, %v537_v32, %v538_v10 }
  0xa2   : > { %v5151_v28 = vpack.c.bf16 %v539_v13, %v537_v32  ;;  %v4411_v32 = vld [vmem:[%s5749_s3 + $0x1f0] sm:$0xff]   ;;  %v4414_v13 = vld [vmem:[%s5749_s3 + $0x1b8] sm:$0xff]  }
  0xa7   : > { %1283 = vmatmul.mubr.bf16.gmra.mrb[60].mxu0 %v4776_v57  ;;  %v4399_v57 = vld [vmem:[%s5749_s3 + $0x180] sm:$0xff]  }
  0xa8   : > { %4037 = vmatprep.mubr.bf16.mxu0 %v4687_v39  ;;  %3382 = vmatmul.mubr.msk.bf16.gmra.mrb[60].mxu1 %vm4849_vm3, %v5106_v31  ;;  %v540_v39 = vrot.slane %v4755_v33, 7 }
  0xa9   : > { %3386 = vmatprep.mubr.msk.bf16.mxu1 %vm4849_vm3, %v5132_v38 }
  0xaa   : > { %v542_v18 = vsel %vm497_vm0, %v540_v39, %v541_v49  ;;  %v625_v49 = vrot.slane %v4627_v56, 1 }
  0xab   : > { %v5176_v11 = vpack.c.bf16 %v542_v18, %v540_v39 }
  0xaf   : > { %4038 = vmatmul.mubr.bf16.vlgmr.msra.gmra.mrb[64].mxu0 %v4731_v12  ;;  %v4402_v12 = vld [vmem:[%s5749_s3 + $0x1d0] sm:$0xff]  }
  0xb0   : > { %3886 = vmatpush3.bf16.msra.mxu0 %v4399_v57  ;;  %4041 = vmatprep.mubr.bf16.mxu0 %v4794_v14  ;;  %v4403_v14 = vld [vmem:[%s5749_s3 + $0x190] sm:$0xff]  }
  0xb1   : > { %3390 = vmatmul.mubr.msk.bf16.gmra.mrb[64].mxu1 %vm4849_vm3, %v5119_v22  ;;  %3887 = vmatprep.subr.bf16.mxu0 %v4400_v4 }
  0xb2   : > { %3394 = vmatprep.mubr.msk.bf16.mxu1 %vm4849_vm3, %v5151_v28 }
  0xb4   : > { %3888 = vmatpush3.bf16.msra.mxu0 %v4401_v6  ;;  %v626_v6 = vrot.slane %v4637_v61, 1 }
  0xb5   : > { %3889 = vmatprep.subr.bf16.mxu0 %v4402_v12 }
  0xb7   : > { %4042 = vmatmul.mubr.bf16.gmra.mrb[68].mxu0 %v4837_v59  ;;  %v4407_v59 = vld [vmem:[%s5749_s3 + $0x1e0] sm:$0xff]  }
  0xb8   : > { %3890 = vmatpush3.bf16.msra.mxu0 %v4403_v14  ;;  %4045 = vmatprep.mubr.bf16.mxu0 %v4881_v7  ;;  %v4408_v7 = vld [vmem:[%s5749_s3 + $0x1a0] sm:$0xff]  }
  0xb9   : > { %3398 = vmatmul.mubr.msk.bf16.gmra.mrb[68].mxu1 %vm4849_vm3, %v5132_v38  ;;  %3891 = vmatprep.subr.bf16.mxu0 %v4404_v30 }
  0xba   : > { %3402 = vmatprep.mubr.msk.bf16.mxu1 %vm4849_vm3, %v5176_v11 }
  0xbc   : > { %3892 = vmatpush3.bf16.msra.mxu0 %v4405_v25 }
  0xbd   : > { %3893 = vmatprep.subr.bf16.mxu0 %v4407_v59 }
  0xbf   : > { %4046 = vmatmul.mubr.bf16.gmra.mrb[72].mxu0 %v4913_v20  ;;  %v4412_v20 = vld [vmem:[%s5749_s3 + $0x1b0] sm:$0xff]  }
  0xc0   : > { %3894 = vmatpush3.bf16.msra.mxu0 %v4408_v7  ;;  %4049 = vmatprep.mubr.bf16.mxu0 %v4953_v9  ;;  %v4413_v9 = vld [vmem:[%s5749_s3 + $0x1f8] sm:$0xff]  }
  0xc1   : > { %3406 = vmatmul.mubr.msk.bf16.gmra.mrb[72].mxu1 %vm4849_vm3, %v5151_v28  ;;  %3895 = vmatprep.subr.bf16.mxu0 %v4409_v63  ;;  %v631_v63 = vrot.slane %v4694_v44, 1 }
  0xc2   : > { %3410 = vmatprep.mubr.msk.bf16.mxu1 %vm4849_vm3, %v5201_v48 }
  0xc4   : > { %3896 = vmatpush3.bf16.msra.mxu0 %v4410_v0 }
  0xc5   : > { %3897 = vmatprep.subr.bf16.mxu0 %v4411_v32 }
  0xc7   : > { %4050 = vmatmul.mubr.bf16.gmra.mrb[76].mxu0 %v4989_v58  ;;  %v4416_v58 = vld [vmem:[%s5749_s3 + $0x208] sm:$0xff]  }
  0xc8   : > { %3898 = vmatpush3.bf16.msra.mxu0 %v4412_v20  ;;  %3477 = vmatprep.mubr.msk.bf16.mxu0 %vm5225_vm5, %v4947_v52 }
  0xc9   : > { %3414 = vmatmul.mubr.msk.bf16.gmra.mrb[76].mxu1 %vm4849_vm3, %v5176_v11  ;;  %3899 = vmatprep.subr.bf16.mxu0 %v4413_v9 }
  0xca   : > { %4085 = vmatprep.mubr.msk.bf16.mxu1 %vm4849_vm3, %v4886_v35  ;;  %v4417_v35 = vld [vmem:[%s5749_s3 + $0x210] sm:$0xff]  }
  0xcc   : > { %3900 = vmatpush3.bf16.msra.mxu0 %v4414_v13 }
  0xcf   : > { %2194 = vmatmul.mubr.bf16.vlgmr.msra.gmra.mrb[80].mxu0 %v4431_v15 }
  0xd0   : > { %3480 = vmatprep.mubr.msk.bf16.mxu0 %vm5225_vm5, %v4957_v21 }
  0xd1   : > { %4086 = vmatmul.mubr.msk.bf16.vlgmr.msra.gmra.mrb[80].mxu1 %vm4849_vm3, %v4917_v27  ;;  %v4418_v27 = vld [vmem:[%s5749_s3 + $0x218] sm:$0xff]  }
  0xd2   : > { %4118 = vmatpush3.bf16.msra.mxu1 %v5015_v19  ;;  %4089 = vmatprep.mubr.msk.bf16.mxu1 %vm4849_vm3, %v4960_v26  ;;  %v4420_v26 = vld [vmem:[%s5749_s3 + $0x228] sm:$0xff]   ;;  %v4422_v19 = vld [vmem:[%s5749_s3 + $0x238] sm:$0xff]  }
  0xd3   : > { %4119 = vmatprep.subr.bf16.mxu1 %v4416_v58 }
  0xd6   : > { %4120 = vmatpush3.bf16.msra.mxu1 %v4416_v58 }
  0xd7   : > { %3483 = vmatmul.mubr.msk.bf16.gmra.mrb[84].mxu0 %vm5225_vm5, %v4947_v52  ;;  %4121 = vmatprep.subr.bf16.mxu1 %v4417_v35  ;;  %v4419_v52 = vld [vmem:[%s5749_s3 + $0x220] sm:$0xff]  }
  0xd8   : > { %3486 = vmatprep.mubr.msk.bf16.mxu0 %vm5225_vm5, %v4962_v34 }
  0xd9   : > { %4090 = vmatmul.mubr.msk.bf16.gmra.mrb[84].mxu1 %vm4849_vm3, %v4994_v50  ;;  %v4421_v50 = vld [vmem:[%s5749_s3 + $0x230] sm:$0xff]  }
  0xda   : > { %4093 = vmatprep.mubr.msk.bf16.mxu1 %vm4849_vm3, %v5020_v29  ;;  %4122 = vmatpush3.bf16.msra.mxu1 %v4417_v35  ;;  %v634_v35 = vrot.slane %v4737_v60, 1 }
  0xdb   : > { %4123 = vmatprep.subr.bf16.mxu1 %v4418_v27 }
  0xde   : > { %4124 = vmatpush3.bf16.msra.mxu1 %v4418_v27  ;;  %v635_v27 = vrot.slane %v4739_v23, 1 }
  0xdf   : > { %3489 = vmatmul.mubr.msk.bf16.gmra.mrb[88].mxu0 %vm5225_vm5, %v4957_v21  ;;  %4125 = vmatprep.subr.bf16.mxu1 %v4419_v52 }
  0xe0   : > { %3492 = vmatprep.mubr.msk.bf16.mxu0 %vm5225_vm5, %v4992_v8  ;;  %v636_v60 = vsel %vm594_vm4, %v634_v35, %v635_v27 }
  0xe1   : > { %4094 = vmatmul.mubr.msk.bf16.gmra.mrb[88].mxu1 %vm4849_vm3, %v5039_v47 }
  0xe2   : > { %4097 = vmatprep.mubr.msk.bf16.mxu1 %vm4849_vm3, %v5057_v2  ;;  %4126 = vmatpush3.bf16.msra.mxu1 %v4419_v52 }
  0xe3   : > { %4127 = vmatprep.subr.bf16.mxu1 %v4420_v26 }
  0xe6   : > { %4128 = vmatpush3.bf16.msra.mxu1 %v4420_v26 }
  0xe7   : > { %3495 = vmatmul.mubr.msk.bf16.gmra.mrb[92].mxu0 %vm5225_vm5, %v4962_v34  ;;  %4129 = vmatprep.subr.bf16.mxu1 %v4421_v50 }
  0xe8   : > { %3498 = vmatprep.mubr.msk.bf16.mxu0 %vm5225_vm5, %v5018_v41 }
  0xe9   : > { %4098 = vmatmul.mubr.msk.bf16.gmra.mrb[92].mxu1 %vm4849_vm3, %v5073_v36 }
  0xea   : > { %4101 = vmatprep.mubr.msk.bf16.mxu1 %vm4849_vm3, %v5091_v3  ;;  %4130 = vmatpush3.bf16.msra.mxu1 %v4421_v50 }
  0xeb   : > { %4131 = vmatprep.subr.bf16.mxu1 %v4422_v19 }
  0xee   : > { %4132 = vmatpush3.bf16.msra.mxu1 %v4422_v19 }
  0xef   : > { %3501 = vmatmul.mubr.msk.bf16.gmra.mrb[96].mxu0 %vm5225_vm5, %v4992_v8 }
  0xf0   : > { %3504 = vmatprep.mubr.msk.bf16.mxu0 %vm5225_vm5, %v5037_v24 }
  0xf1   : > { %4102 = vmatmul.mubr.msk.bf16.gmra.mrb[0].mxu1 %vm4849_vm3, %v5106_v31  ;;  %v622_v31 = vrot.slane %v4623_v54, 1 }
  0xf2   : > { %4105 = vmatprep.mubr.msk.bf16.mxu1 %vm4849_vm3, %v5119_v22  ;;  %v623_v22 = vrot.slane %v4625_v55, 1 }
  0xf4   : > { %v624_v16 = vsel %vm594_vm4, %v622_v31, %v623_v22 }
  0xf7   : > { %3507 = vmatmul.mubr.msk.bf16.gmra.mrb[100].mxu0 %vm5225_vm5, %v5018_v41 }
  0xf8   : > { %3510 = vmatprep.mubr.msk.bf16.mxu0 %vm5225_vm5, %v5055_v51 }
  0xf9   : > { %4106 = vmatmul.mubr.msk.bf16.gmra.mrb[4].mxu1 %vm4849_vm3, %v5132_v38 }
  0xfa   : > { %4109 = vmatprep.mubr.msk.bf16.mxu1 %vm4849_vm3, %v5151_v28  ;;  %v3527_v28 = vpack.c.bf16 %v623_v22, %v624_v16  ;;  %v637_v16 = vrot.slane %v4755_v33, 1 }
  0xff   : > { %3513 = vmatmul.mubr.msk.bf16.gmra.mrb[104].mxu0 %vm5225_vm5, %v5037_v24 }
 0x100   : > { %3516 = vmatprep.mubr.msk.bf16.mxu0 %vm5225_vm5, %v5075_v46 }
 0x101   : > { %4110 = vmatmul.mubr.msk.bf16.gmra.mrb[8].mxu1 %vm4849_vm3, %v5176_v11 }
 0x102   : > { %v3629_v29 = vpop.f32.mrb[0].mxu0  ;;  %4113 = vmatprep.mubr.msk.bf16.mxu1 %vm4849_vm3, %v5201_v48  ;;  %v632_v48 = vrot.slane %v4696_v45, 1 }
 0x103   : > { %v3630_v47 = vpop.f32.mrb[1].mxu0 }
 0x104   : > { %v5346_v2 = vadd.f32 %v3630_v47, %v3629_v29  ;;  %v3632_v36 = vpop.f32.mrb[2].mxu0 }
 0x105   : > { %v3633_v3 = vpop.f32.mrb[3].mxu0 }
 0x106   : > { %v5350_v38 = vadd.f32 %v3633_v3, %v3632_v36  ;;  %v3551_v3 = vpack.c.bf16 %v635_v27, %v636_v60 }
 0x107   : > { %3519 = vmatmul.mubr.msk.bf16.gmra.mrb[108].mxu0 %vm5225_vm5, %v5055_v51 }
 0x108   : > { %3522 = vmatprep.mubr.msk.bf16.mxu0 %vm5225_vm5, %v5093_v53 }
 0x109   : > { %4114 = vmatmul.mubr.bf16.gmra.mrb[12].mxu1 %v4431_v15 }
 0x10a   : > { %v3635_v57 = vpop.f32.mrb[4].mxu0  ;;  %4133 = vmatprep.mubr.msk.bf16.mxu1 %vm5225_vm5, %v4957_v21  ;;  %v627_v21 = vsel %vm594_vm4, %v625_v49, %v626_v6 }
 0x10b   : > { %v3636_v54 = vpop.f32.mrb[5].mxu0  ;;  %v3533_v30 = vpack.c.bf16 %v626_v6, %v627_v21 }
 0x10c   : > { %v5363_v55 = vadd.f32 %v3636_v54, %v3635_v57  ;;  %v3638_v4 = vpop.f32.mrb[6].mxu0  ;;  %v638_v57 = vrot.slane %v4761_v37, 1 }
 0x10d   : > { %v3639_v39 = vpop.f32.mrb[7].mxu0 }
 0x10e   : > { %v5367_v12 = vadd.f32 %v3639_v39, %v3638_v4  ;;  %v639_v33 = vsel %vm594_vm4, %v637_v16, %v638_v57 }
 0x10f   : > { %3525 = vmatmul.mubr.msk.bf16.gmra.mrb[112].mxu0 %vm5225_vm5, %v5075_v46 }
 0x110   : > { %3528 = vmatprep.mubr.msk.bf16.mxu0 %vm5225_vm5, %v3527_v28 }
 0x111   : > { %4134 = vmatmul.mubr.msk.bf16.vlgmr.msra.gmra.mrb[80].mxu1 %vm5225_vm5, %v4962_v34  ;;  %v630_v34 = vsel %vm594_vm4, %v628_v42, %v629_v62  ;;  %v640_v42 = vrot.slane %v4787_v5, 1 }
 0x112   : > { %v3641_v18 = vpop.f32.mrb[8].mxu0  ;;  %4137 = vmatprep.mubr.msk.bf16.mxu1 %vm5225_vm5, %v4992_v8  ;;  %v3539_v1 = vpack.c.bf16 %v629_v62, %v630_v34  ;;  %v641_v62 = vrot.slane %v4796_v17, 1 }
 0x113   : > { %v3642_v56 = vpop.f32.mrb[9].mxu0 }
 0x114   : > { %v5381_v61 = vadd.f32 %v3642_v56, %v3641_v18  ;;  %v3644_v14 = vpop.f32.mrb[10].mxu0  ;;  %v3557_v56 = vpack.c.bf16 %v638_v57, %v639_v33  ;;  %v642_v5 = vsel %vm594_vm4, %v640_v42, %v641_v62 }
 0x115   : > { %v3645_v11 = vpop.f32.mrb[11].mxu0 }
 0x116   : > { %v5385_v25 = vadd.f32 %v3645_v11, %v3644_v14 }
 0x117   : > { %3531 = vmatmul.mubr.msk.bf16.gmra.mrb[116].mxu0 %vm5225_vm5, %v5093_v53 }
 0x118   : > { %3534 = vmatprep.mubr.msk.bf16.mxu0 %vm5225_vm5, %v3533_v30 }
 0x119   : > { %4138 = vmatmul.mubr.msk.bf16.gmra.mrb[84].mxu1 %vm5225_vm5, %v5018_v41  ;;  %v633_v41 = vsel %vm594_vm4, %v631_v63, %v632_v48 }
 0x11a   : > { %v3647_v8 = vpop.f32.mrb[12].mxu0  ;;  %4141 = vmatprep.mubr.msk.bf16.mxu1 %vm5225_vm5, %v5037_v24  ;;  %v3545_v9 = vpack.c.bf16 %v632_v48, %v633_v41  ;;  %v3563_v41 = vpack.c.bf16 %v641_v62, %v642_v5 }
 0x11b   : > { %v3648_v40 = vpop.f32.mrb[13].mxu0 }
 0x11c   : > { %v5399_v43 = vadd.f32 %v3648_v40, %v3647_v8  ;;  %v3650_v59 = vpop.f32.mrb[14].mxu0 }
 0x11d   : > { %v3651_v7 = vpop.f32.mrb[15].mxu0 }
 0x11e   : > { %v5403_v0 = vadd.f32 %v3651_v7, %v3650_v59 }
 0x11f   : > { %3537 = vmatmul.mubr.msk.bf16.gmra.mrb[120].mxu0 %vm5225_vm5, %v3527_v28 }
 0x120   : > { %3540 = vmatprep.mubr.msk.bf16.mxu0 %vm5225_vm5, %v3539_v1 }
 0x121   : > { %4142 = vmatmul.mubr.msk.bf16.gmra.mrb[88].mxu1 %vm5225_vm5, %v5055_v51 }
 0x122   : > { %v3653_v24 = vpop.f32.mrb[16].mxu0  ;;  %4145 = vmatprep.mubr.msk.bf16.mxu1 %vm5225_vm5, %v5075_v46 }
 0x123   : > { %v3654_v44 = vpop.f32.mrb[17].mxu0  ;;  %v3765_v45 = vpop.f32.mrb[16].mxu1 }
 0x124   : > { %v5416_v32 = vadd.f32 %v3654_v44, %v3653_v24  ;;  %v3656_v20 = vpop.f32.mrb[18].mxu0  ;;  %v3766_v13 = vpop.f32.mrb[17].mxu1 }
 0x125   : > { %v3657_v58 = vpop.f32.mrb[19].mxu0  ;;  %v5420_v51 = vadd.f32 %v3766_v13, %v3765_v45  ;;  %v3768_v52 = vpop.f32.mrb[18].mxu1 }
 0x126   : > { %v5422_v26 = vadd.f32 %v3657_v58, %v3656_v20  ;;  %v3769_v50 = vpop.f32.mrb[19].mxu1 }
 0x127   : > { %3543 = vmatmul.mubr.msk.bf16.gmra.mrb[124].mxu0 %vm5225_vm5, %v3533_v30  ;;  %v5426_v46 = vadd.f32 %v3769_v50, %v3768_v52 }
 0x128   : > { %3546 = vmatprep.mubr.msk.bf16.mxu0 %vm5225_vm5, %v3545_v9 }
 0x129   : > { %4146 = vmatmul.mubr.msk.bf16.gmra.mrb[92].mxu1 %vm5225_vm5, %v5093_v53 }
 0x12a   : > { %v3659_v23 = vpop.f32.mrb[20].mxu0  ;;  %4149 = vmatprep.mubr.msk.bf16.mxu1 %vm5225_vm5, %v3527_v28 }
 0x12b   : > { %v3660_v19 = vpop.f32.mrb[21].mxu0  ;;  %v3771_v29 = vpop.f32.mrb[20].mxu1 }
 0x12c   : > { %v5436_v47 = vadd.f32 %v3660_v19, %v3659_v23  ;;  %v3662_v36 = vpop.f32.mrb[22].mxu0  ;;  %v3772_v31 = vpop.f32.mrb[21].mxu1 }
 0x12d   : > { %v3663_v22 = vpop.f32.mrb[23].mxu0  ;;  %v5440_v54 = vadd.f32 %v3772_v31, %v3771_v29  ;;  %v3774_v53 = vpop.f32.mrb[22].mxu1 }
 0x12e   : > { %v5442_v4 = vadd.f32 %v3663_v22, %v3662_v36  ;;  %v3775_v39 = vpop.f32.mrb[23].mxu1 }
 0x12f   : > { %3549 = vmatmul.mubr.msk.bf16.gmra.mrb[128].mxu0 %vm5225_vm5, %v3539_v1  ;;  %v5446_v28 = vadd.f32 %v3775_v39, %v3774_v53 }
 0x130   : > { %3552 = vmatprep.mubr.msk.bf16.mxu0 %vm5225_vm5, %v3551_v3 }
 0x131   : > { %4150 = vmatmul.mubr.msk.bf16.gmra.mrb[0].mxu1 %vm5225_vm5, %v3533_v30 }
 0x132   : > { %v3665_v37 = vpop.f32.mrb[24].mxu0  ;;  %4153 = vmatprep.mubr.msk.bf16.mxu1 %vm5225_vm5, %v3539_v1 }
 0x133   : > { %v3666_v49 = vpop.f32.mrb[25].mxu0  ;;  %v3777_v6 = vpop.f32.mrb[24].mxu1 }
 0x134   : > { %v5455_v21 = vadd.f32 %v3666_v49, %v3665_v37  ;;  %v3668_v18 = vpop.f32.mrb[26].mxu0  ;;  %v3778_v14 = vpop.f32.mrb[25].mxu1 }
 0x135   : > { %v3669_v11 = vpop.f32.mrb[27].mxu0  ;;  %v5459_v34 = vadd.f32 %v3778_v14, %v3777_v6  ;;  %v3780_v30 = vpop.f32.mrb[26].mxu1 }
 0x136   : > { %v5461_v8 = vadd.f32 %v3669_v11, %v3668_v18  ;;  %v3781_v40 = vpop.f32.mrb[27].mxu1 }
 0x137   : > { %3555 = vmatmul.mubr.msk.bf16.gmra.mrb[132].mxu0 %vm5225_vm5, %v3545_v9  ;;  %v5465_v59 = vadd.f32 %v3781_v40, %v3780_v30 }
 0x138   : > { %3558 = vmatprep.mubr.msk.bf16.mxu0 %vm5225_vm5, %v3557_v56 }
 0x139   : > { %4154 = vmatmul.mubr.msk.bf16.gmra.mrb[4].mxu1 %vm5225_vm5, %v3545_v9 }
 0x13a   : > { %v3671_v17 = vpop.f32.mrb[28].mxu0  ;;  %4157 = vmatprep.mubr.msk.bf16.mxu1 %vm5225_vm5, %v3551_v3 }
 0x13b   : > { %v3672_v1 = vpop.f32.mrb[29].mxu0  ;;  %v3783_v7 = vpop.f32.mrb[28].mxu1 }
 0x13c   : > { %v5474_v63 = vadd.f32 %v3672_v1, %v3671_v17  ;;  %v3674_v48 = vpop.f32.mrb[30].mxu0  ;;  %v3784_v24 = vpop.f32.mrb[29].mxu1 }
 0x13d   : > { %v3675_v44 = vpop.f32.mrb[31].mxu0  ;;  %v5476_v45 = vadd.f32 %v3784_v24, %v3783_v7  ;;  %v3786_v20 = vpop.f32.mrb[30].mxu1 }
 0x13e   : > { %v5478_v13 = vadd.f32 %v3675_v44, %v3674_v48  ;;  %v3787_v9 = vpop.f32.mrb[31].mxu1 }
 0x13f   : > { %3561 = vmatmul.mubr.msk.bf16.gmra.mrb[136].mxu0 %vm5225_vm5, %v3551_v3  ;;  %v5482_v58 = vadd.f32 %v3787_v9, %v3786_v20 }
 0x140   : > { %3564 = vmatprep.mubr.msk.bf16.mxu0 %vm5225_vm5, %v3563_v41 }
 0x141   : > { %4158 = vmatmul.mubr.msk.bf16.gmra.mrb[8].mxu1 %vm5225_vm5, %v3557_v56 }
 0x142   : > { %v3677_v35 = vpop.f32.mrb[32].mxu0  ;;  %4161 = vmatprep.mubr.msk.bf16.mxu1 %vm5225_vm5, %v3563_v41 }
 0x143   : > { %v3678_v27 = vpop.f32.mrb[33].mxu0  ;;  %v3789_v52 = vpop.f32.mrb[32].mxu1 }
 0x144   : > { %v3679_v50 = vadd.f32 %v3678_v27, %v3677_v35  ;;  %v3680_v60 = vpop.f32.mrb[34].mxu0  ;;  %v3790_v23 = vpop.f32.mrb[33].mxu1 }
 0x145   : > { %v3681_v19 = vpop.f32.mrb[35].mxu0  ;;  %v5490_v29 = vadd.f32 %v3790_v23, %v3789_v52  ;;  %v3792_v36 = vpop.f32.mrb[34].mxu1 }
 0x146   : > { %v3682_v3 = vadd.f32 %v3681_v19, %v3680_v60  ;;  %v3793_v31 = vpop.f32.mrb[35].mxu1 }
 0x147   : > { %3567 = vmatmul.mubr.msk.bf16.gmra.mrb[140].mxu0 %vm5225_vm5, %v3557_v56  ;;  %v5494_v22 = vadd.f32 %v3793_v31, %v3792_v36 }
 0x149   : > { %4162 = vmatmul.mubr.bf16.gmra.mrb[12].mxu1 %v4431_v15 }
 0x14a   : > { %v3683_v16 = vpop.f32.mrb[36].mxu0 }
 0x14b   : > { %v3684_v57 = vpop.f32.mrb[37].mxu0  ;;  %v3795_v53 = vpop.f32.mrb[36].mxu1 }
 0x14c   : > { %v3685_v39 = vadd.f32 %v3684_v57, %v3683_v16  ;;  %v3686_v33 = vpop.f32.mrb[38].mxu0  ;;  %v3796_v37 = vpop.f32.mrb[37].mxu1 }
 0x14d   : > { %v3687_v49 = vpop.f32.mrb[39].mxu0  ;;  %v5497_v6 = vadd.f32 %v3796_v37, %v3795_v53  ;;  %v3798_v18 = vpop.f32.mrb[38].mxu1 }
 0x14e   : > { %v3688_v14 = vadd.f32 %v3687_v49, %v3686_v33  ;;  %v3799_v11 = vpop.f32.mrb[39].mxu1 }
 0x14f   : > { %v5499_v42 = vadd.f32 %v3799_v11, %v3798_v18 }
 0x152   : > { %v3689_v10 = vpop.f32.mrb[40].mxu0 }
 0x153   : > { %v3690_v56 = vpop.f32.mrb[41].mxu0  ;;  %v3801_v62 = vpop.f32.mrb[40].mxu1 }
 0x154   : > { %v3691_v30 = vadd.f32 %v3690_v56, %v3689_v10  ;;  %v3692_v40 = vpop.f32.mrb[42].mxu0  ;;  %v3802_v15 = vpop.f32.mrb[41].mxu1 }
 0x155   : > { %v3693_v5 = vpop.f32.mrb[43].mxu0  ;;  %v5501_v17 = vadd.f32 %v3802_v15, %v3801_v62  ;;  %v3804_v1 = vpop.f32.mrb[42].mxu1 }
 0x156   : > { %v3694_v7 = vadd.f32 %v3693_v5, %v3692_v40  ;;  %v3805_v48 = vpop.f32.mrb[43].mxu1 }
 0x157   : > { %v5503_v41 = vadd.f32 %v3805_v48, %v3804_v1 }
 0x15a   : > { %v3695_v24 = vpop.f32.mrb[44].mxu0 }
 0x15b   : > { %v3696_v44 = vpop.f32.mrb[45].mxu0  ;;  %v3807_v20 = vpop.f32.mrb[44].mxu1 }
 0x15c   : > { %v3697_v9 = vadd.f32 %v3696_v44, %v3695_v24  ;;  %v3698_v35 = vpop.f32.mrb[46].mxu0  ;;  %v3808_v27 = vpop.f32.mrb[45].mxu1 }
 0x15d   : > { %v3699_v52 = vpop.f32.mrb[47].mxu0  ;;  %v5505_v60 = vadd.f32 %v3808_v27, %v3807_v20  ;;  %v3810_v23 = vpop.f32.mrb[46].mxu1 }
 0x15e   : > { %v3700_v19 = vadd.f32 %v3699_v52, %v3698_v35  ;;  %v3811_v36 = vpop.f32.mrb[47].mxu1 }
 0x15f   : > { %v5507_v31 = vadd.f32 %v3811_v36, %v3810_v23 }
 0x162   : > { %v3701_v16 = vpop.f32.mrb[48].mxu0 }
 0x163   : > { %v3702_v57 = vpop.f32.mrb[49].mxu0  ;;  %v3813_v53 = vpop.f32.mrb[48].mxu1 }
 0x164   : > { %v5509_v33 = vadd.f32 %v3702_v57, %v3701_v16  ;;  %v3704_v37 = vpop.f32.mrb[50].mxu0  ;;  %v3814_v49 = vpop.f32.mrb[49].mxu1 }
 0x165   : > { %v3705_v18 = vpop.f32.mrb[51].mxu0  ;;  %v3815_v11 = vadd.f32 %v3814_v49, %v3813_v53  ;;  %v3816_v10 = vpop.f32.mrb[50].mxu1 }
 0x166   : > { %v5511_v56 = vadd.f32 %v3705_v18, %v3704_v37  ;;  %v3817_v62 = vpop.f32.mrb[51].mxu1 }
 0x167   : > { %v5513_v40 = vadd.f32 %v3815_v11, %v3679_v50  ;;  %v3818_v15 = vadd.f32 %v3817_v62, %v3816_v10 }
 0x169   : > { %v5515_v5 = vadd.f32 %v3818_v15, %v3682_v3 }
 0x16a   : > { %v3707_v1 = vpop.f32.mrb[52].mxu0 }
 0x16b   : > { %v3708_v48 = vpop.f32.mrb[53].mxu0  ;;  %v3819_v24 = vpop.f32.mrb[52].mxu1 }
 0x16c   : > { %v5517_v44 = vadd.f32 %v3708_v48, %v3707_v1  ;;  %v3710_v20 = vpop.f32.mrb[54].mxu0  ;;  %v3820_v35 = vpop.f32.mrb[53].mxu1 }
 0x16d   : > { %v3711_v27 = vpop.f32.mrb[55].mxu0  ;;  %v3821_v52 = vadd.f32 %v3820_v35, %v3819_v24  ;;  %v3822_v23 = vpop.f32.mrb[54].mxu1 }
 0x16e   : > { %v5519_v36 = vadd.f32 %v3711_v27, %v3710_v20  ;;  %v3823_v16 = vpop.f32.mrb[55].mxu1 }
 0x16f   : > { %v5521_v57 = vadd.f32 %v3821_v52, %v3685_v39  ;;  %v3824_v50 = vadd.f32 %v3823_v16, %v3822_v23 }
 0x171   : > { %v5523_v53 = vadd.f32 %v3824_v50, %v3688_v14 }
 0x172   : > { %v3713_v3 = vpop.f32.mrb[56].mxu0 }
 0x173   : > { %5758 = vst [vmem:[#allocation3_spill] sm:$0xff] %v5523_v53  ;;  %v3714_v37 = vpop.f32.mrb[57].mxu0  ;;  %v3825_v49 = vpop.f32.mrb[56].mxu1 }
 0x174   : > { %v5525_v18 = vadd.f32 %v3714_v37, %v3713_v3  ;;  %v3716_v11 = vpop.f32.mrb[58].mxu0  ;;  %v3826_v10 = vpop.f32.mrb[57].mxu1 }
 0x175   : > { %v3717_v62 = vpop.f32.mrb[59].mxu0  ;;  %v3827_v15 = vadd.f32 %v3826_v10, %v3825_v49  ;;  %v3828_v1 = vpop.f32.mrb[58].mxu1 }
 0x176   : > { %v5527_v48 = vadd.f32 %v3717_v62, %v3716_v11  ;;  %v3829_v24 = vpop.f32.mrb[59].mxu1 }
 0x177   : > { %v5529_v20 = vadd.f32 %v3827_v15, %v3691_v30  ;;  %v3830_v39 = vadd.f32 %v3829_v24, %v3828_v1 }
 0x179   : > { %v5531_v35 = vadd.f32 %v3830_v39, %v3694_v7 }
 0x17a   : > { %v3719_v14 = vpop.f32.mrb[60].mxu0 }
 0x17b   : > { %v3720_v27 = vpop.f32.mrb[61].mxu0  ;;  %v3831_v52 = vpop.f32.mrb[60].mxu1 }
 0x17c   : > { %v5533_v23 = vadd.f32 %v3720_v27, %v3719_v14  ;;  %v3722_v16 = vpop.f32.mrb[62].mxu0  ;;  %v3832_v50 = vpop.f32.mrb[61].mxu1 }
 0x17d   : > { %v3723_v3 = vpop.f32.mrb[63].mxu0  ;;  %v3833_v37 = vadd.f32 %v3832_v50, %v3831_v52  ;;  %v3834_v53 = vpop.f32.mrb[62].mxu1 }
 0x17e   : > { %v5535_v49 = vadd.f32 %v3723_v3, %v3722_v16  ;;  %v3835_v11 = vpop.f32.mrb[63].mxu1 }
 0x17f   : > { %v5537_v10 = vadd.f32 %v3833_v37, %v3697_v9  ;;  %v3836_v30 = vadd.f32 %v3835_v11, %v3834_v53 }
 0x181   : > { %v5539_v62 = vadd.f32 %v3836_v30, %v3700_v19 }
 0x182   : > { %v4039_v7 = vpop.f32.mrb[64].mxu0 }
 0x183   : > { %v1334_v15 = vadd.f32 %v4039_v7, %v5363_v55  ;;  %v1325_v1 = vpop.f32.mrb[65].mxu0 }
 0x184   : > { %v3837_v24 = vpop.f32.mrb[64].mxu1  ;;  %v1326_v39 = vadd.f32 %v5346_v2, %v1325_v1  ;;  %v4040_v14 = vpop.f32.mrb[66].mxu0 }
 0x185   : > { %v5544_v27 = vadd.f32 %v5440_v54, %v1334_v15  ;;  %v3838_v52 = vpop.f32.mrb[65].mxu1  ;;  %v1337_v16 = vadd.f32 %v4040_v14, %v5367_v12  ;;  %v1328_v50 = vpop.f32.mrb[67].mxu0 }
 0x186   : > { %v5548_v9 = vadd.f32 %v5420_v51, %v1326_v39  ;;  %v3839_v19 = vadd.f32 %v3838_v52, %v3837_v24  ;;  %v3840_v53 = vpop.f32.mrb[66].mxu1  ;;  %v1329_v3 = vadd.f32 %v5350_v38, %v1328_v50 }
 0x187   : > { %v5552_v55 = vadd.f32 %v5446_v28, %v1337_v16  ;;  %v3841_v37 = vpop.f32.mrb[67].mxu1 }
 0x188   : > { %v5555_v2 = vadd.f32 %v3839_v19, %v5509_v33  ;;  %v5558_v54 = vadd.f32 %v5426_v46, %v1329_v3  ;;  %v3842_v11 = vadd.f32 %v3841_v37, %v3840_v53 }
 0x18a   : > { %v5561_v12 = vadd.f32 %v3842_v11, %v5511_v56  ;;  %v4043_v51 = vpop.f32.mrb[68].mxu0 }
 0x18b   : > { %v1350_v30 = vadd.f32 %v4043_v51, %v5399_v43  ;;  %v1341_v7 = vpop.f32.mrb[69].mxu0 }
 0x18c   : > { %v3843_v15 = vpop.f32.mrb[68].mxu1  ;;  %v1342_v38 = vadd.f32 %v5381_v61, %v1341_v7  ;;  %v4044_v28 = vpop.f32.mrb[70].mxu0 }
 0x18d   : > { %v5566_v1 = vadd.f32 %v5476_v45, %v1350_v30  ;;  %v3844_v33 = vpop.f32.mrb[69].mxu1  ;;  %v1353_v24 = vadd.f32 %v4044_v28, %v5403_v0  ;;  %v1344_v46 = vpop.f32.mrb[71].mxu0 }
 0x18e   : > { %v5570_v39 = vadd.f32 %v5459_v34, %v1342_v38  ;;  %v3845_v56 = vadd.f32 %v3844_v33, %v3843_v15  ;;  %v3846_v14 = vpop.f32.mrb[70].mxu1  ;;  %v1345_v52 = vadd.f32 %v5385_v25, %v1344_v46 }
 0x18f   : > { %v5574_v43 = vadd.f32 %v5482_v58, %v1353_v24  ;;  %v3847_v16 = vpop.f32.mrb[71].mxu1 }
 0x190   : > { %v5577_v61 = vadd.f32 %v3845_v56, %v5517_v44  ;;  %v5580_v45 = vadd.f32 %v5465_v59, %v1345_v52  ;;  %v3848_v50 = vadd.f32 %v3847_v16, %v3846_v14 }
 0x192   : > { %v5583_v0 = vadd.f32 %v3848_v50, %v5519_v36  ;;  %v4047_v34 = vpop.f32.mrb[72].mxu0 }
 0x193   : > { %v1366_v19 = vadd.f32 %v4047_v34, %v5436_v47  ;;  %v1357_v53 = vpop.f32.mrb[73].mxu0 }
 0x194   : > { %v3849_v3 = vpop.f32.mrb[72].mxu1  ;;  %v1358_v25 = vadd.f32 %v5416_v32, %v1357_v53  ;;  %v4048_v58 = vpop.f32.mrb[74].mxu0 }
 0x195   : > { %v5588_v37 = vadd.f32 %v5497_v6, %v1366_v19  ;;  %v3850_v44 = vpop.f32.mrb[73].mxu1  ;;  %v1369_v11 = vadd.f32 %v4048_v58, %v5442_v4  ;;  %v1360_v59 = vpop.f32.mrb[75].mxu0 }
 0x196   : > { %v5592_v51 = vadd.f32 %v5490_v29, %v1358_v25  ;;  %v3851_v36 = vadd.f32 %v3850_v44, %v3849_v3  ;;  %v3852_v30 = vpop.f32.mrb[74].mxu1  ;;  %v1361_v7 = vadd.f32 %v5422_v26, %v1360_v59 }
 0x197   : > { %v5596_v47 = vadd.f32 %v5499_v42, %v1369_v11  ;;  %v3853_v15 = vpop.f32.mrb[75].mxu1 }
 0x198   : > { %v5599_v32 = vadd.f32 %v3851_v36, %v5525_v18  ;;  %v1666_v6 = vadd.f32 %v5494_v22, %v1361_v7  ;;  %v3854_v38 = vadd.f32 %v3853_v15, %v3852_v30 }
 0x19a   : > { %v5603_v4 = vadd.f32 %v3854_v38, %v5527_v48  ;;  %v4051_v28 = vpop.f32.mrb[76].mxu0 }
 0x19b   : > { %v1382_v29 = vadd.f32 %v4051_v28, %v5474_v63  ;;  %v1373_v33 = vpop.f32.mrb[77].mxu0 }
 0x19c   : > { %v3855_v24 = vpop.f32.mrb[76].mxu1  ;;  %v1374_v26 = vadd.f32 %v5455_v21, %v1373_v33  ;;  %v4052_v46 = vpop.f32.mrb[78].mxu0 }
 0x19d   : > { %v5608_v42 = vadd.f32 %v5505_v60, %v1382_v29  ;;  %v3856_v56 = vpop.f32.mrb[77].mxu1  ;;  %v1385_v18 = vadd.f32 %v4052_v46, %v5478_v13  ;;  %v1376_v14 = vpop.f32.mrb[79].mxu0 }
 0x19e   : > { %v5612_v22 = vadd.f32 %v5501_v17, %v1374_v26  ;;  %v3857_v48 = vadd.f32 %v3856_v56, %v3855_v24  ;;  %v3858_v52 = vpop.f32.mrb[78].mxu1  ;;  %v1377_v16 = vadd.f32 %v5461_v8, %v1376_v14 }
 0x19f   : > { %v5616_v63 = vadd.f32 %v5507_v31, %v1385_v18  ;;  %v3859_v50 = vpop.f32.mrb[79].mxu1 }
 0x1a0   : > { %v5619_v21 = vadd.f32 %v3857_v48, %v5533_v23  ;;  %v1682_v60 = vadd.f32 %v5503_v41, %v1377_v16  ;;  %v3860_v34 = vadd.f32 %v3859_v50, %v3858_v52 }
 0x1a2   : > { %v5623_v13 = vadd.f32 %v3860_v34, %v5535_v49  ;;  %v3901_v19 = vpop.f32.mrb[80].mxu0 }
 0x1a3   : > { %v3902_v17 = vpop.f32.mrb[81].mxu0 }
 0x1a4   : > { %v3903_v53 = vadd.f32 %v3902_v17, %v3901_v19  ;;  %v3904_v3 = vpop.f32.mrb[82].mxu0 }
 0x1a5   : > { %v3905_v25 = vpop.f32.mrb[83].mxu0 }
 0x1a6   : > { %v3906_v58 = vadd.f32 %v3905_v25, %v3904_v3  ;;  %v5626_v8 = vadd.f32 %v3903_v53, %v5548_v9 }
 0x1a8   : > { %v5629_v31 = vadd.f32 %v3906_v58, %v5558_v54 }
 0x1aa   : > { %v3907_v23 = vpop.f32.mrb[84].mxu0 }
 0x1ab   : > { %v3908_v44 = vpop.f32.mrb[85].mxu0 }
 0x1ac   : > { %v3909_v11 = vadd.f32 %v3908_v44, %v3907_v23  ;;  %v3910_v41 = vpop.f32.mrb[86].mxu0 }
 0x1ad   : > { %v3911_v59 = vpop.f32.mrb[87].mxu0 }
 0x1ae   : > { %v3912_v36 = vadd.f32 %v3911_v59, %v3910_v41  ;;  %v4183_v49 = vadd.f32 %v3909_v11, %v5544_v27 }
 0x1b0   : > { %v4191_v30 = vadd.f32 %v3912_v36, %v5552_v55 }
 0x1b2   : > { %v3913_v7 = vpop.f32.mrb[88].mxu0 }
 0x1b3   : > { %v3914_v15 = vpop.f32.mrb[89].mxu0 }
 0x1b4   : > { %v3915_v38 = vadd.f32 %v3914_v15, %v3913_v7  ;;  %v3916_v28 = vpop.f32.mrb[90].mxu0 }
 0x1b5   : > { %v3917_v29 = vpop.f32.mrb[91].mxu0 }
 0x1b6   : > { %v3918_v9 = vadd.f32 %v3917_v29, %v3916_v28  ;;  %v5634_v33 = vadd.f32 %v3915_v38, %v5570_v39 }
 0x1b8   : > { %v5637_v54 = vadd.f32 %v3918_v9, %v5580_v45 }
 0x1ba   : > { %v3919_v24 = vpop.f32.mrb[92].mxu0 }
 0x1bb   : > { %v3920_v26 = vpop.f32.mrb[93].mxu0 }
 0x1bc   : > { %v3921_v46 = vadd.f32 %v3920_v26, %v3919_v24  ;;  %v3922_v56 = vpop.f32.mrb[94].mxu0 }
 0x1bd   : > { %v3923_v18 = vpop.f32.mrb[95].mxu0 }
 0x1be   : > { %v3924_v27 = vadd.f32 %v3923_v18, %v3922_v56  ;;  %v5640_v55 = vadd.f32 %v3921_v46, %v5566_v1 }
 0x1c0   : > { %v5643_v14 = vadd.f32 %v3924_v27, %v5574_v43 }
 0x1c2   : > { %v3925_v48 = vpop.f32.mrb[96].mxu0 }
 0x1c3   : > { %v3926_v52 = vpop.f32.mrb[97].mxu0 }
 0x1c4   : > { %v3927_v16 = vadd.f32 %v3926_v52, %v3925_v48  ;;  %v3928_v39 = vpop.f32.mrb[98].mxu0 }
 0x1c5   : > { %v3929_v50 = vpop.f32.mrb[99].mxu0 }
 0x1c6   : > { %v3930_v34 = vadd.f32 %v3929_v50, %v3928_v39  ;;  %v5646_v45 = vadd.f32 %v3927_v16, %v5592_v51 }
 0x1c8   : > { %v5648_v19 = vadd.f32 %v3930_v34, %v1666_v6 }
 0x1ca   : > { %v3931_v17 = vpop.f32.mrb[100].mxu0 }
 0x1cb   : > { %v3932_v53 = vpop.f32.mrb[101].mxu0 }
 0x1cc   : > { %v3933_v3 = vadd.f32 %v3932_v53, %v3931_v17  ;;  %v3934_v25 = vpop.f32.mrb[102].mxu0 }
 0x1cd   : > { %v3935_v1 = vpop.f32.mrb[103].mxu0 }
 0x1ce   : > { %v3936_v58 = vadd.f32 %v3935_v1, %v3934_v25  ;;  %v5651_v43 = vadd.f32 %v3933_v3, %v5588_v37 }
 0x1d0   : > { %v5654_v23 = vadd.f32 %v3936_v58, %v5596_v47 }
 0x1d2   : > { %v3937_v44 = vpop.f32.mrb[104].mxu0 }
 0x1d3   : > { %v3938_v11 = vpop.f32.mrb[105].mxu0 }
 0x1d4   : > { %v3939_v41 = vadd.f32 %v3938_v11, %v3937_v44  ;;  %v3940_v59 = vpop.f32.mrb[106].mxu0 }
 0x1d5   : > { %v3941_v51 = vpop.f32.mrb[107].mxu0 }
 0x1d6   : > { %v3942_v36 = vadd.f32 %v3941_v51, %v3940_v59  ;;  %v5657_v6 = vadd.f32 %v3939_v41, %v5612_v22 }
 0x1d8   : > { %v5659_v7 = vadd.f32 %v3942_v36, %v1682_v60 }
 0x1da   : > { %v3943_v15 = vpop.f32.mrb[108].mxu0 }
 0x1db   : > { %v3944_v38 = vpop.f32.mrb[109].mxu0 }
 0x1dc   : > { %v3945_v28 = vadd.f32 %v3944_v38, %v3943_v15  ;;  %v3946_v29 = vpop.f32.mrb[110].mxu0 }
 0x1dd   : > { %v3947_v37 = vpop.f32.mrb[111].mxu0 }
 0x1de   : > { %v3948_v9 = vadd.f32 %v3947_v37, %v3946_v29  ;;  %v5662_v47 = vadd.f32 %v3945_v28, %v5608_v42 }
 0x1e0   : > { %v5665_v24 = vadd.f32 %v3948_v9, %v5616_v63 }
 0x1e2   : > { %v3949_v26 = vpop.f32.mrb[112].mxu0 }
 0x1e3   : > { %v3950_v46 = vpop.f32.mrb[113].mxu0 }
 0x1e4   : > { %v4135_v56 = vpop.f32.mrb[80].mxu1  ;;  %v3951_v22 = vadd.f32 %v3950_v46, %v3949_v26  ;;  %v3952_v18 = vpop.f32.mrb[114].mxu0 }
 0x1e5   : > { %v4184_v60 = vadd.f32 %v4183_v49, %v4135_v56  ;;  %v2356_v27 = vpop.f32.mrb[81].mxu1  ;;  %v3953_v48 = vpop.f32.mrb[115].mxu0 }
 0x1e6   : > { %v4188_v52 = vadd.f32 %v5626_v8, %v2356_v27  ;;  %v4136_v16 = vpop.f32.mrb[82].mxu1  ;;  %v3954_v39 = vadd.f32 %v3953_v48, %v3952_v18  ;;  %v5669_v50 = vadd.f32 %v5513_v40, %v3951_v22  ;;  %v5759_v27 = vld [vmem:[#allocation3_spill] sm:$0xff] }
 0x1e7   : > { %v4192_v42 = vadd.f32 %v4191_v30, %v4136_v16  ;;  %v2359_v34 = vpop.f32.mrb[83].mxu1  ;;  %v2714_v1 = vmul.f32 %v4184_v60, %v4184_v60 }
 0x1e8   : > { %v4196_v63 = vadd.f32 %v5629_v31, %v2359_v34  ;;  %v5680_v49 = vadd.f32 %v5515_v5, %v3954_v39  ;;  %v2712_v17 = vmul.f32 %v4188_v52, %v4188_v52 }
 0x1e9   : > { %v3189_v8 = vpack.c.bf16 %v4192_v42, %v4184_v60  ;;  %v2715_v51 = vmul.f32 %v4192_v42, %v4192_v42 }
 0x1ea   : > { %v3184_v53 = vpack.c.bf16 %v4196_v63, %v4188_v52  ;;  %v2675_v40 = vadd.f32 %v4196_v63, %v4188_v52  ;;  %v2713_v3 = vmul.f32 %v4196_v63, %v4196_v63  ;;  %v3955_v30 = vpop.f32.mrb[116].mxu0 }
 0x1eb   : > { %3276 = vst [vmem:[%s5676_s20 + $0x8] sm:$0xff] %v3189_v8   ;;  %v3956_v25 = vpop.f32.mrb[117].mxu0 }
 0x1ec   : > { %3185 = vst [vmem:[%s5676_s20] sm:$0xff] %v3184_v53   ;;  %v2676_v58 = vadd.f32 %v4184_v60, %v2675_v40  ;;  %v2744_v44 = vadd.f32 %v2713_v3, %v2712_v17  ;;  %v4139_v11 = vpop.f32.mrb[84].mxu1  ;;  %v3957_v41 = vadd.f32 %v3956_v25, %v3955_v30  ;;  %v3958_v59 = vpop.f32.mrb[118].mxu0 }
 0x1ed   : > { %v4200_v31 = vadd.f32 %v5640_v55, %v4139_v11  ;;  %v2372_v5 = vpop.f32.mrb[85].mxu1  ;;  %v3959_v36 = vpop.f32.mrb[119].mxu0 }
 0x1ee   : > { %v2745_v15 = vadd.f32 %v2744_v44, %v2714_v1  ;;  %v4204_v38 = vadd.f32 %v5634_v33, %v2372_v5  ;;  %v2677_v28 = vadd.f32 %v4192_v42, %v2676_v58  ;;  %v4140_v29 = vpop.f32.mrb[86].mxu1  ;;  %v3960_v37 = vadd.f32 %v3959_v36, %v3958_v59 }
 0x1ef   : > { %v4208_v9 = vadd.f32 %v5643_v14, %v4140_v29  ;;  %v2375_v26 = vpop.f32.mrb[87].mxu1  ;;  %v5688_v46 = vadd.f32 %v5521_v57, %v3957_v41  ;;  %v2718_v34 = vmul.f32 %v4200_v31, %v4200_v31 }
 0x1f0   : > { %v2678_v56 = vadd.f32 %v4204_v38, %v2677_v28  ;;  %v2716_v22 = vmul.f32 %v4204_v38, %v4204_v38  ;;  %v2746_v18 = vadd.f32 %v2745_v15, %v2715_v51  ;;  %v4212_v55 = vadd.f32 %v5637_v54, %v2375_v26 }
 0x1f1   : > { %v3199_v60 = vpack.c.bf16 %v4208_v9, %v4200_v31  ;;  %v5692_v48 = vadd.f32 %v5759_v27, %v3960_v37  ;;  %v2719_v40 = vmul.f32 %v4208_v9, %v4208_v9 }
 0x1f2   : > { %v2747_v33 = vadd.f32 %v2746_v18, %v2716_v22  ;;  %v3194_v52 = vpack.c.bf16 %v4212_v55, %v4204_v38  ;;  %v2679_v16 = vadd.f32 %v4212_v55, %v2678_v56  ;;  %v2717_v39 = vmul.f32 %v4212_v55, %v4212_v55  ;;  %v3961_v42 = vpop.f32.mrb[120].mxu0 }
 0x1f3   : > { %3278 = vst [vmem:[%s5676_s20 + $0x18] sm:$0xff] %v3199_v60   ;;  %v3962_v14 = vpop.f32.mrb[121].mxu0 }
 0x1f4   : > { %3277 = vst [vmem:[%s5676_s20 + $0x10] sm:$0xff] %v3194_v52   ;;  %v2680_v57 = vadd.f32 %v4200_v31, %v2679_v16  ;;  %v2748_v63 = vadd.f32 %v2747_v33, %v2717_v39  ;;  %v4143_v8 = vpop.f32.mrb[88].mxu1  ;;  %v3963_v17 = vadd.f32 %v3962_v14, %v3961_v42  ;;  %v3964_v53 = vpop.f32.mrb[122].mxu0 }
 0x1f5   : > { %v4216_v54 = vadd.f32 %v5651_v43, %v4143_v8  ;;  %v2388_v3 = vpop.f32.mrb[89].mxu1  ;;  %v3965_v30 = vpop.f32.mrb[123].mxu0 }
 0x1f6   : > { %v2749_v25 = vadd.f32 %v2748_v63, %v2718_v34  ;;  %v4220_v1 = vadd.f32 %v5646_v45, %v2388_v3  ;;  %v2681_v58 = vadd.f32 %v4208_v9, %v2680_v57  ;;  %v4144_v44 = vpop.f32.mrb[90].mxu1  ;;  %v3966_v11 = vadd.f32 %v3965_v30, %v3964_v53 }
 0x1f7   : > { %v4224_v41 = vadd.f32 %v5654_v23, %v4144_v44  ;;  %v2391_v59 = vpop.f32.mrb[91].mxu1  ;;  %v5700_v51 = vadd.f32 %v5529_v20, %v3963_v17  ;;  %v2722_v26 = vmul.f32 %v4216_v54, %v4216_v54 }
 0x1f8   : > { %v2682_v31 = vadd.f32 %v4220_v1, %v2681_v58  ;;  %v2720_v5 = vmul.f32 %v4220_v1, %v4220_v1  ;;  %v2750_v36 = vadd.f32 %v2749_v25, %v2719_v40  ;;  %v4228_v43 = vadd.f32 %v5648_v19, %v2391_v59 }
 0x1f9   : > { %v3209_v15 = vpack.c.bf16 %v4224_v41, %v4216_v54  ;;  %v5704_v38 = vadd.f32 %v5531_v35, %v3966_v11  ;;  %v2723_v60 = vmul.f32 %v4224_v41, %v4224_v41 }
 0x1fa   : > { %v2751_v45 = vadd.f32 %v2750_v36, %v2720_v5  ;;  %v3204_v28 = vpack.c.bf16 %v4228_v43, %v4220_v1  ;;  %v2683_v29 = vadd.f32 %v4228_v43, %v2682_v31  ;;  %v2721_v37 = vmul.f32 %v4228_v43, %v4228_v43  ;;  %v3967_v9 = vpop.f32.mrb[124].mxu0 }
 0x1fb   : > { %3280 = vst [vmem:[%s5676_s20 + $0x28] sm:$0xff] %v3209_v15   ;;  %v3968_v23 = vpop.f32.mrb[125].mxu0 }
 0x1fc   : > { %3279 = vst [vmem:[%s5676_s20 + $0x20] sm:$0xff] %v3204_v28   ;;  %v2684_v20 = vadd.f32 %v4216_v54, %v2683_v29  ;;  %v2752_v56 = vadd.f32 %v2751_v45, %v2721_v37  ;;  %v4147_v22 = vpop.f32.mrb[92].mxu1  ;;  %v3969_v18 = vadd.f32 %v3968_v23, %v3967_v9  ;;  %v3970_v55 = vpop.f32.mrb[126].mxu0 }
 0x1fd   : > { %v4232_v19 = vadd.f32 %v5662_v47, %v4147_v22  ;;  %v2404_v27 = vpop.f32.mrb[93].mxu1  ;;  %v3971_v35 = vpop.f32.mrb[127].mxu0 }
 0x1fe   : > { %v2753_v33 = vadd.f32 %v2752_v56, %v2722_v26  ;;  %v4236_v52 = vadd.f32 %v5657_v6, %v2404_v27  ;;  %v2685_v16 = vadd.f32 %v4224_v41, %v2684_v20  ;;  %v4148_v39 = vpop.f32.mrb[94].mxu1  ;;  %v3972_v42 = vadd.f32 %v3971_v35, %v3970_v55 }
 0x1ff   : > { %v4240_v14 = vadd.f32 %v5665_v24, %v4148_v39  ;;  %v2407_v34 = vpop.f32.mrb[95].mxu1  ;;  %v4258_v57 = vadd.f32 %v5537_v10, %v3969_v18  ;;  %v2726_v24 = vmul.f32 %v4232_v19, %v4232_v19 }
 0x200   : > { %v2686_v63 = vadd.f32 %v4236_v52, %v2685_v16  ;;  %v2724_v8 = vmul.f32 %v4236_v52, %v4236_v52  ;;  %v2754_v17 = vadd.f32 %v2753_v33, %v2723_v60  ;;  %v4244_v47 = vadd.f32 %v5659_v7, %v2407_v34 }
 0x201   : > { %v3219_v53 = vpack.c.bf16 %v4240_v14, %v4232_v19  ;;  %v4264_v40 = vadd.f32 %v5539_v62, %v3972_v42  ;;  %v2727_v59 = vmul.f32 %v4240_v14, %v4240_v14 }
 0x202   : > { %v2755_v54 = vadd.f32 %v2754_v17, %v2724_v8  ;;  %v3214_v6 = vpack.c.bf16 %v4244_v47, %v4236_v52  ;;  %v2687_v3 = vadd.f32 %v4244_v47, %v2686_v63  ;;  %v2725_v30 = vmul.f32 %v4244_v47, %v4244_v47  ;;  %v3973_v25 = vpop.f32.mrb[128].mxu0 }
 0x203   : > { %3282 = vst [vmem:[%s5676_s20 + $0x38] sm:$0xff] %v3219_v53   ;;  %v3974_v1 = vpop.f32.mrb[129].mxu0 }
 0x204   : > { %3281 = vst [vmem:[%s5676_s20 + $0x30] sm:$0xff] %v3214_v6   ;;  %v2688_v58 = vadd.f32 %v4232_v19, %v2687_v3  ;;  %v2756_v44 = vadd.f32 %v2755_v54, %v2725_v30  ;;  %v4151_v10 = vpop.f32.mrb[0].mxu1  ;;  %v3975_v11 = vadd.f32 %v3974_v1, %v3973_v25  ;;  %v3976_v41 = vpop.f32.mrb[130].mxu0 }
 0x205   : > { %v4247_v7 = vadd.f32 %v5688_v46, %v4151_v10  ;;  %v2420_v31 = vpop.f32.mrb[1].mxu1  ;;  %v3977_v5 = vpop.f32.mrb[131].mxu0 }
 0x206   : > { %v2757_v62 = vadd.f32 %v2756_v44, %v2726_v24  ;;  %v4250_v36 = vadd.f32 %v5669_v50, %v2420_v31  ;;  %v2689_v43 = vadd.f32 %v4240_v14, %v2688_v58  ;;  %v4152_v15 = vpop.f32.mrb[2].mxu1  ;;  %v3978_v45 = vadd.f32 %v3977_v5, %v3976_v41 }
 0x207   : > { %v4253_v28 = vadd.f32 %v5692_v48, %v4152_v15  ;;  %v2423_v29 = vpop.f32.mrb[3].mxu1  ;;  %v4273_v37 = vadd.f32 %v5555_v2, %v3975_v11  ;;  %v2730_v48 = vmul.f32 %v4247_v7, %v4247_v7 }
 0x208   : > { %v2690_v9 = vadd.f32 %v4250_v36, %v2689_v43  ;;  %v2728_v23 = vmul.f32 %v4250_v36, %v4250_v36  ;;  %v2758_v26 = vadd.f32 %v2757_v62, %v2727_v59  ;;  %v4256_v46 = vadd.f32 %v5680_v49, %v2423_v29 }
 0x209   : > { %v3229_v20 = vpack.c.bf16 %v4253_v28, %v4247_v7  ;;  %v4279_v56 = vadd.f32 %v5561_v12, %v3978_v45  ;;  %v2731_v16 = vmul.f32 %v4253_v28, %v4253_v28 }
 0x20a   : > { %v2759_v22 = vadd.f32 %v2758_v26, %v2728_v23  ;;  %v3224_v50 = vpack.c.bf16 %v4256_v46, %v4250_v36  ;;  %v2691_v18 = vadd.f32 %v4256_v46, %v2690_v9  ;;  %v2729_v55 = vmul.f32 %v4256_v46, %v4256_v46  ;;  %v3979_v60 = vpop.f32.mrb[132].mxu0 }
 0x20b   : > { %3284 = vst [vmem:[%s5676_s20 + $0x48] sm:$0xff] %v3229_v20   ;;  %v3980_v19 = vpop.f32.mrb[133].mxu0 }
 0x20c   : > { %3283 = vst [vmem:[%s5676_s20 + $0x40] sm:$0xff] %v3224_v50   ;;  %v2692_v27 = vadd.f32 %v4247_v7, %v2691_v18  ;;  %v2760_v35 = vadd.f32 %v2759_v22, %v2729_v55  ;;  %v4155_v2 = vpop.f32.mrb[4].mxu1  ;;  %v3981_v33 = vadd.f32 %v3980_v19, %v3979_v60  ;;  %v3982_v52 = vpop.f32.mrb[134].mxu0 }
 0x20d   : > { %v4259_v39 = vadd.f32 %v4258_v57, %v4155_v2  ;;  %v2436_v49 = vpop.f32.mrb[5].mxu1  ;;  %v3983_v42 = vpop.f32.mrb[135].mxu0 }
 0x20e   : > { %v2761_v14 = vadd.f32 %v2760_v35, %v2730_v48  ;;  %v4262_v12 = vadd.f32 %v5700_v51, %v2436_v49  ;;  %v2693_v34 = vadd.f32 %v4253_v28, %v2692_v27  ;;  %v4156_v63 = vpop.f32.mrb[6].mxu1  ;;  %v3984_v8 = vadd.f32 %v3983_v42, %v3982_v52 }
 0x20f   : > { %v4265_v17 = vadd.f32 %v4264_v40, %v4156_v63  ;;  %v2439_v47 = vpop.f32.mrb[7].mxu1  ;;  %v4270_v53 = vadd.f32 %v5577_v61, %v3981_v33  ;;  %v2734_v40 = vmul.f32 %v4259_v39, %v4259_v39 }
 0x210   : > { %v2694_v54 = vadd.f32 %v4262_v12, %v2693_v34  ;;  %v2732_v6 = vmul.f32 %v4262_v12, %v4262_v12  ;;  %v2762_v3 = vadd.f32 %v2761_v14, %v2731_v16  ;;  %v4268_v30 = vadd.f32 %v5704_v38, %v2439_v47 }
 0x211   : > { %v3239_v57 = vpack.c.bf16 %v4265_v17, %v4259_v39  ;;  %v4276_v25 = vadd.f32 %v5583_v0, %v3984_v8  ;;  %v2735_v31 = vmul.f32 %v4265_v17, %v4265_v17 }
 0x212   : > { %v2763_v1 = vadd.f32 %v2762_v3, %v2732_v6  ;;  %v3234_v24 = vpack.c.bf16 %v4268_v30, %v4262_v12  ;;  %v2695_v51 = vadd.f32 %v4268_v30, %v2694_v54  ;;  %v2733_v58 = vmul.f32 %v4268_v30, %v4268_v30  ;;  %v3985_v44 = vpop.f32.mrb[136].mxu0 }
 0x213   : > { %3286 = vst [vmem:[%s5676_s20 + $0x58] sm:$0xff] %v3239_v57   ;;  %v3986_v10 = vpop.f32.mrb[137].mxu0 }
 0x214   : > { %3285 = vst [vmem:[%s5676_s20 + $0x50] sm:$0xff] %v3234_v24   ;;  %v2696_v11 = vadd.f32 %v4259_v39, %v2695_v51  ;;  %v2764_v41 = vadd.f32 %v2763_v1, %v2733_v58  ;;  %v4159_v61 = vpop.f32.mrb[8].mxu1  ;;  %v3987_v59 = vadd.f32 %v3986_v10, %v3985_v44  ;;  %v3988_v7 = vpop.f32.mrb[138].mxu0 }
 0x215   : > { %v4271_v5 = vadd.f32 %v4270_v53, %v4159_v61  ;;  %v2452_v38 = vpop.f32.mrb[9].mxu1  ;;  %v3989_v62 = vpop.f32.mrb[139].mxu0 }
 0x216   : > { %v2765_v36 = vadd.f32 %v2764_v41, %v2734_v40  ;;  %v4274_v0 = vadd.f32 %v4273_v37, %v2452_v38  ;;  %v2697_v43 = vadd.f32 %v4265_v17, %v2696_v11  ;;  %v4160_v15 = vpop.f32.mrb[10].mxu1  ;;  %v3990_v45 = vadd.f32 %v3989_v62, %v3988_v7 }
 0x217   : > { %v4277_v28 = vadd.f32 %v4276_v25, %v4160_v15  ;;  %v2455_v29 = vpop.f32.mrb[11].mxu1  ;;  %v4285_v9 = vadd.f32 %v5599_v32, %v3987_v59  ;;  %v2738_v27 = vmul.f32 %v4271_v5, %v4271_v5 }
 0x218   : > { %v2698_v23 = vadd.f32 %v4274_v0, %v2697_v43  ;;  %v2736_v26 = vmul.f32 %v4274_v0, %v4274_v0  ;;  %v2766_v46 = vadd.f32 %v2765_v36, %v2735_v31  ;;  %v4280_v20 = vadd.f32 %v4279_v56, %v2455_v29 }
 0x219   : > { %v3249_v22 = vpack.c.bf16 %v4277_v28, %v4271_v5  ;;  %v4291_v50 = vadd.f32 %v5603_v4, %v3990_v45  ;;  %v2739_v16 = vmul.f32 %v4277_v28, %v4277_v28 }
 0x21a   : > { %v2767_v18 = vadd.f32 %v2766_v46, %v2736_v26  ;;  %v3244_v55 = vpack.c.bf16 %v4280_v20, %v4274_v0  ;;  %v2699_v60 = vadd.f32 %v4280_v20, %v2698_v23  ;;  %v2737_v37 = vmul.f32 %v4280_v20, %v4280_v20  ;;  %v3991_v19 = vpop.f32.mrb[140].mxu0 }
 0x21b   : > { %3288 = vst [vmem:[%s5676_s20 + $0x68] sm:$0xff] %v3249_v22   ;;  %v3992_v48 = vpop.f32.mrb[141].mxu0 }
 0x21c   : > { %3287 = vst [vmem:[%s5676_s20 + $0x60] sm:$0xff] %v3244_v55   ;;  %v2700_v35 = vadd.f32 %v4271_v5, %v2699_v60  ;;  %v2768_v2 = vadd.f32 %v2767_v18, %v2737_v37  ;;  %v4163_v33 = vpop.f32.mrb[12].mxu1  ;;  %v3993_v32 = vadd.f32 %v3992_v48, %v3991_v19  ;;  %v3994_v52 = vpop.f32.mrb[142].mxu0 }
 0x21d   : > { %v2468_v39 = vpop.f32.mrb[13].mxu1  ;;  %v3995_v56 = vpop.f32.mrb[143].mxu0 }
 0x21e   : > { %v2769_v49 = vadd.f32 %v2768_v2, %v2738_v27  ;;  %v4282_v4 = vadd.f32 %v5619_v21, %v3993_v32  ;;  %v4286_v42 = vadd.f32 %v4285_v9, %v2468_v39  ;;  %v2701_v14 = vadd.f32 %v4277_v28, %v2700_v35  ;;  %v4164_v12 = vpop.f32.mrb[14].mxu1 }
 0x21f   : > { %v3996_v34 = vadd.f32 %v3995_v56, %v3994_v52  ;;  %v2471_v63 = vpop.f32.mrb[15].mxu1 }
 0x220   : > { %v4283_v8 = vadd.f32 %v4282_v4, %v4163_v33  ;;  %v2702_v17 = vadd.f32 %v4286_v42, %v2701_v14  ;;  %v2740_v47 = vmul.f32 %v4286_v42, %v4286_v42  ;;  %v2770_v53 = vadd.f32 %v2769_v49, %v2739_v16 }
 0x221   : > { %v4288_v54 = vadd.f32 %v5623_v13, %v3996_v34  ;;  %v4292_v6 = vadd.f32 %v4291_v50, %v2471_v63 }
 0x222   : > { %v2742_v3 = vmul.f32 %v4283_v8, %v4283_v8  ;;  %v2771_v30 = vadd.f32 %v2770_v53, %v2740_v47 }
 0x223   : > { %v4289_v57 = vadd.f32 %v4288_v54, %v4164_v12  ;;  %v3254_v25 = vpack.c.bf16 %v4292_v6, %v4286_v42  ;;  %v2703_v1 = vadd.f32 %v4292_v6, %v2702_v17  ;;  %v2741_v21 = vmul.f32 %v4292_v6, %v4292_v6 }
 0x225   : > { %v3259_v24 = vpack.c.bf16 %v4289_v57, %v4283_v8  ;;  %v2743_v51 = vmul.f32 %v4289_v57, %v4289_v57  ;;  %3289 = vst [vmem:[%s5676_s20 + $0x70] sm:$0xff] %v3254_v25   ;;  %v2704_v58 = vadd.f32 %v4283_v8, %v2703_v1  ;;  %v2772_v44 = vadd.f32 %v2771_v30, %v2741_v21 }
 0x227   : > { %3290 = vst [vmem:[%s5676_s20 + $0x78] sm:$0xff] %v3259_v24   ;;  %v2705_v10 = vadd.f32 %v4289_v57, %v2704_v58  ;;  %v2773_v40 = vadd.f32 %v2772_v44, %v2742_v3 }
 0x229   : > { %v2706_v11 = vrot.slane %v2705_v10, 4  ;;  %v2774_v41 = vadd.f32 %v2773_v40, %v2743_v51 }
 0x22b   : > { %v2707_v61 = vadd.f32 %v2706_v11, %v2705_v10  ;;  %v2775_v13 = vrot.slane %v2774_v41, 4 }
 0x22d   : > { %v2708_v59 = vrot.slane %v2707_v61, 2  ;;  %v2776_v7 = vadd.f32 %v2775_v13, %v2774_v41 }
 0x22f   : > { %v2709_v31 = vadd.f32 %v2708_v59, %v2707_v61  ;;  %v2777_v5 = vrot.slane %v2776_v7, 2 }
 0x231   : > { %v2710_v38 = vrot.slane %v2709_v31, 1  ;;  %v2778_v62 = vadd.f32 %v2777_v5, %v2776_v7 }
 0x233   : > { %v2779_v36 = vrot.slane %v2778_v62, 1  ;;  %v2711_v0 = vadd.f32 %v2710_v38, %v2709_v31 }
 0x235   : > { %v2780_v43 = vadd.f32 %v2779_v36, %v2778_v62 }
 0x237   : > { %v2781_v15 = vsel %vm497_vm0, %v2711_v0, %v2780_v43 }
 0x238   : > { %2782 = vst [vmem:[%s235_s23] sm:$0x3] %v2781_v15 }
 0x239 PF: > { %s16_s18 = sadd.s32 1, %s4429_s18  }
 0x23a   : > { %p13_p4 = scmp.ge.s32.totalorder %s16_s18, 4  }
 0x23c   :  { %15 = sbr.rel (!%p13_p4) target bundleno = 1 (0x1), region = 88 }

</bundles_post_ra>
